<compile_context>
chip_gen: v7x
topology: tpu7x:2x2x1
jax: 0.10.0
libtpu: 0.0.40
codegen_flags: <defaults>
</compile_context>

<pallas_src>
import functools

import jax
import jax.numpy as jnp
from jax.experimental import pallas as pl
from jax.experimental.pallas import tpu as pltpu

EPS = 1e-5  # torch.nn.LayerNorm default eps


def _gelu(x):
    # TODO(synk): PyTorch F.gelu defaults to the exact erf form; the tanh
    # approximation is used here (erf has no guaranteed Mosaic lowering).
    c = 0.7978845608028654  # sqrt(2/pi)
    return 0.5 * x * (1.0 + jnp.tanh(c * (x + 0.044715 * x * x * x)))


# -----------------------------------------------------------------------------
# Fused kernel: all layers + bus MLPs + final LayerNorms for one batch group.
# Activation slab layout: (L, nb*C), L = max_length + M token positions on the
# sublane axis, lanes packed as (batch, channel).
# -----------------------------------------------------------------------------
def _fused_encoder_kernel(x_ref, avg_ref,
                          tw1_ref, tb1_ref, tw2_ref, tb2_ref,
                          cw1_ref, cb1_ref, cw2_ref, cb2_ref,
                          g1_ref, be1_ref, g2_ref, be2_ref,
                          bw1_ref, bb1_ref, bw2_ref, bb2_ref,
                          og_ref, ob_ref, bg_ref, bb_ref,
                          out_ref, mem_ref,
                          *, num_layers, nbc, hw, max_length, M):
    L = max_length + M

    # Block-diagonal averaging matrix: (nbc, nbc), 1/C within each C-lane group.
    avg = avg_ref[...]

    def group_ln(x, gv, bv):
        # LayerNorm over each C-wide lane group (per (position, batch) row),
        # computed lane-dense via MXU matmuls (no sub-128 lane slicing).
        mu = jnp.dot(x, avg, preferred_element_type=jnp.float32)
        xc = x - mu
        var = jnp.dot(xc * xc, avg, preferred_element_type=jnp.float32)
        return xc * jax.lax.rsqrt(var + EPS) * gv + bv

    # Load weights / hoist bias broadcasts once (outside the layer loop).
    tw1 = tw1_ref[...]                                        # (H1p, L)
    tw2 = tw2_ref[...]                                        # (L, H1p)
    tb1 = jnp.broadcast_to(tb1_ref[...], (tw1.shape[0], nbc))
    tb2 = jnp.broadcast_to(tb2_ref[...], (L, nbc))
    cw1, cb1 = cw1_ref[...], cb1_ref[...]                     # block-diag (nbc,nbc)
    cw2, cb2 = cw2_ref[...], cb2_ref[...]
    bw1, bb1 = bw1_ref[...], bb1_ref[...]
    bw2, bb2 = bw2_ref[...], bb2_ref[...]
    g1, be1 = g1_ref[...], be1_ref[...]                       # (1, nbc) tiled
    g2, be2 = g2_ref[...], be2_ref[...]

    row = jax.lax.broadcasted_iota(jnp.int32, (L, nbc), 0)
    keep = row < hw                    # spatial rows kept for the next layer
    is_mem = row >= max_length         # memory-bus rows

    x = x_ref[...]                     # (L, nbc) current-layer input slab
    y = x                              # last mixer output
    bus = x                            # last bus-MLP output (mem rows valid)

    for _ in range(num_layers):        # deepcopy clones share parameters
        # ---- MLPMixerEncoderLayer: norm1 + tokenMixer (+ residual) ----
        # token mixing column-wise: (H1,L)@(L, nb*C) keeps 128 lanes hot and
        # avoids materializing any (N, C, L) transpose.
        xn = group_ln(x, g1, be1)
        h = _gelu(jnp.dot(tw1, xn, preferred_element_type=jnp.float32) + tb1)
        x = x + jnp.dot(tw2, h, preferred_element_type=jnp.float32) + tb2
        # ---- norm2 + channelMixer (+ residual), block-diag over batch lanes ----
        xn2 = group_ln(x, g2, be2)
        h2 = _gelu(jnp.dot(xn2, cw1, preferred_element_type=jnp.float32) + cb1)
        y = x + jnp.dot(h2, cw2, preferred_element_type=jnp.float32) + cb2
        # ---- bus MLP (row-wise over C).  The torch (M,bs,t,c) reshuffle around
        #      it is an exact inverse permutation of rows -> dropped.  Applied to
        #      every row for lane/sublane density; only mem rows are kept. ----
        hb = _gelu(jnp.dot(y, bw1, preferred_element_type=jnp.float32) + bb1)
        bus = jnp.dot(hb, bw2, preferred_element_type=jnp.float32) + bb2
        # ---- rebuild next-layer slab: [mixer out | zero pad | updated memory] ----
        x = jnp.where(keep, y, jnp.where(is_mem, bus, 0.0))

    # Final LayerNorms (out_norm for spatial rows, bus_norm for memory rows),
    # computed lane-dense on the full slab; the wrapper slices the rows it needs.
    out_ref[...] = group_ln(y, og_ref[...], ob_ref[...]).astype(out_ref.dtype)
    mem_ref[...] = group_ln(bus, bg_ref[...], bb_ref[...]).astype(mem_ref.dtype)


def _batch_group(nbt, C):
    """Batch elements per grid block: keep nb*C a multiple of 128 (lane-dense)
    when possible, using the smallest such nb so large batches split across
    grid steps (megacore sharding on v7x, bounded VMEM)."""
    if (nbt * C) % 128 != 0:
        return nbt                      # fall back: one block covering everything
    for nb in range(1, nbt + 1):
        if nbt % nb == 0 and (nb * C) % 128 == 0:
            return nb
    return nbt


# -----------------------------------------------------------------------------
# IFCEncoder.forward (MLPMixerEncoderLayer branch).
# -----------------------------------------------------------------------------
def ifc_encoder_forward(src, memory_bus, memory_pos, pos, params, *,
                        num_frames, num_layers, h, w, max_length, is_train=True):
    # src: (hw, bs*t, c) sequence-first; memory_bus: (M, c)
    hw, nbt, c = src.shape
    M = memory_bus.shape[0]
    assert M <= w, "Too large the memory bus size"
    assert hw <= max_length, "too large the input image!"
    # memory_pos / pos / mask / src_key_padding_mask are never consumed in the
    # MLPMixer branch; num_frames / is_train only fed the (removed) no-op bus
    # reshuffle, so they are accepted and ignored.
    del memory_pos, pos, num_frames, is_train, h

    L = max_length + M
    nb = _batch_group(nbt, c)
    nbc = nb * c
    grid = (nbt // nb,)

    # ----- one-time layout glue (hoisted out of the layer loop) -----
    # slab rows: [src (hw) | zeros (max_length-hw) | memory bus (M)]
    # slab lanes: (batch, channel) packed -> (L, nbt*c).  memory_bus is used
    # only up to M rows, so no broadcast to width w.
    x0 = jnp.concatenate([
        src.reshape(hw, nbt * c),
        jnp.zeros((max_length - hw, nbt * c), src.dtype),
        jnp.broadcast_to(memory_bus[:, None, :], (M, nbt, c)).reshape(M, nbt * c),
    ], axis=0)

    # ----- kernel-layout parameter prep (tiny, one-time) -----
    mp, bp = params["mixer"], params["bus"]
    H1 = mp["tok_w1"].shape[0]
    H1p = -(-H1 // 8) * 8                       # pad hidden dim to sublane multiple
    tw1 = jnp.pad(mp["tok_w1"], ((0, H1p - H1), (0, 0)))
    tb1 = jnp.pad(mp["tok_b1"], ((0, H1p - H1), (0, 0)))
    tw2 = jnp.pad(mp["tok_w2"], ((0, 0), (0, H1p - H1)))
    tb2 = mp["tok_b2"]
    eye_nb = jnp.eye(nb, dtype=jnp.float32)
    blk = lambda wt: jnp.kron(eye_nb, wt)       # block-diag: batch C->C matmuls over lanes
    tile = lambda b: jnp.tile(b, (1, nb))       # per-channel params tiled over batch lanes
    avg = jnp.kron(eye_nb, jnp.full((c, c), 1.0 / c, jnp.float32))  # group-mean matrix

    weights = (
        avg,
        tw1, tb1, tw2, tb2,
        blk(mp["ch_w1t"]), tile(mp["ch_b1"]), blk(mp["ch_w2t"]), tile(mp["ch_b2"]),
        tile(mp["g1"]), tile(mp["be1"]), tile(mp["g2"]), tile(mp["be2"]),
        blk(bp["w1t"]), tile(bp["b1"]), blk(bp["w2t"]), tile(bp["b2"]),
        tile(params["out_norm_g"]), tile(params["out_norm_b"]),
        tile(params["bus_norm_g"]), tile(params["bus_norm_b"]),
    )

    kernel = functools.partial(
        _fused_encoder_kernel, num_layers=num_layers, nbc=nbc,
        hw=hw, max_length=max_length, M=M)

    xmap = lambda g: (0, g)   # batch-group tiling along lanes
    wmap = lambda g: (0, 0)   # weights: same block every step -> no re-fetch
    out_full, mem_full = pl.pallas_call(
        kernel,
        grid=grid,
        in_specs=[pl.BlockSpec((L, nbc), xmap)]
        + [pl.BlockSpec(a.shape, wmap) for a in weights],
        out_specs=(pl.BlockSpec((L, nbc), xmap),
                   pl.BlockSpec((L, nbc), xmap)),
        out_shape=(jax.ShapeDtypeStruct((L, nbt * c), src.dtype),
                   jax.ShapeDtypeStruct((L, nbt * c), src.dtype)),
        compiler_params=pltpu.CompilerParams(
            dimension_semantics=("parallel",)),
    )(x0, *weights)

    output = out_full[:hw].reshape(hw, nbt, c)              # out_norm(output)
    memory_out = mem_full[max_length:].reshape(M, nbt, c)   # bus_norm(memory_bus)
    return output, memory_out


# -----------------------------------------------------------------------------
# Deterministic parameter init (mirrors shapes in the PyTorch __init__s).
# -----------------------------------------------------------------------------
def init_params(key, d_model, max_length, memory_bus):
    C = d_model
    L = max_length + memory_bus
    H1 = 15 * 27 + 8  # hardwired tokenMixer hidden size in MLPMixerEncoderLayer
    ks = jax.random.split(key, 12)

    def kaiming(k, out_f, in_f):  # kaiming_normal_(mode='fan_out', relu)
        return ((2.0 / out_f) ** 0.5) * jax.random.normal(k, (out_f, in_f), jnp.float32)

    def bias(k, n, fan_in):       # torch Linear default bias init
        bound = 1.0 / (fan_in ** 0.5)
        return jax.random.uniform(k, (n,), jnp.float32, -bound, bound)

    # MLPMixerEncoderLayer params (shared across enc_layers via deepcopy semantics)
    tok_w1 = kaiming(ks[0], H1, L)
    tok_b1 = bias(ks[1], H1, L).reshape(H1, 1)
    tok_w2 = kaiming(ks[2], L, H1)
    tok_b2 = bias(ks[3], L, H1).reshape(L, 1)
    ch_w1 = kaiming(ks[4], C, C)
    ch_b1 = bias(ks[5], C, C).reshape(1, C)
    ch_w2 = kaiming(ks[6], C, C)
    ch_b2 = bias(ks[7], C, C).reshape(1, C)
    mixer = dict(
        tok_w1=tok_w1, tok_b1=tok_b1, tok_w2=tok_w2, tok_b2=tok_b2,
        ch_w1t=ch_w1.T, ch_b1=ch_b1, ch_w2t=ch_w2.T, ch_b2=ch_b2,
        g1=jnp.ones((1, C), jnp.float32), be1=jnp.zeros((1, C), jnp.float32),
        g2=jnp.ones((1, C), jnp.float32), be2=jnp.zeros((1, C), jnp.float32),
    )

    # memory_layer = MLP(d_model) params (shared across bus_layers)
    bw1 = kaiming(ks[8], C, C)
    bb1 = bias(ks[9], C, C).reshape(1, C)
    bw2 = kaiming(ks[10], C, C)
    bb2 = bias(ks[11], C, C).reshape(1, C)
    bus = dict(w1t=bw1.T, b1=bb1, w2t=bw2.T, b2=bb2)

    return dict(
        mixer=mixer, bus=bus,
        out_norm_g=jnp.ones((1, C), jnp.float32), out_norm_b=jnp.zeros((1, C), jnp.float32),
        bus_norm_g=jnp.ones((1, C), jnp.float32), bus_norm_b=jnp.zeros((1, C), jnp.float32),
    )


if __name__ == "__main__":
    # Small, self-consistent configuration.
    num_frames = 2
    bs = 2
    h, w = 2, 8
    hw = h * w            # 16 spatial tokens
    c = 32                # d_model
    M = 4                 # memory bus size
    max_length = 20       # > hw, exercises the zero-padding path
    num_layers = 2
    nbt = bs * num_frames

    key = jax.random.PRNGKey(0)
    k1, k2, k3, k4, kp = jax.random.split(key, 5)
    src = jax.random.normal(k1, (hw, nbt, c), jnp.float32)
    memory_bus = jax.random.normal(k2, (M, c), jnp.float32)
    memory_pos = jax.random.normal(k3, (M, c), jnp.float32)
    pos = jax.random.normal(k4, (hw, nbt, c), jnp.float32)

    params = init_params(kp, c, max_length, M)

    fwd = jax.jit(functools.partial(
        ifc_encoder_forward, num_frames=num_frames, num_layers=num_layers,
        h=h, w=w, max_length=max_length, is_train=True))
    out, mem = fwd(src, memory_bus, memory_pos, pos, params)
    jax.block_until_ready((out, mem))

    assert out.shape == (hw, nbt, c) and out.dtype == jnp.float32
    assert mem.shape == (M, nbt, c) and mem.dtype == jnp.float32
    assert bool(jnp.all(jnp.isfinite(out))) and bool(jnp.all(jnp.isfinite(mem)))
    print("KERNEL_OK")
</pallas_src>

<mosaic_0001>
module attributes {stable_mosaic.version = 11 : i64} {
  func.func @_fused_encoder_kernel(%arg0: i32, %arg1: memref<24x128xf32, #tpu.memory_space<vmem>>, %arg2: memref<128x128xf32, #tpu.memory_space<vmem>>, %arg3: memref<416x24xf32, #tpu.memory_space<vmem>>, %arg4: memref<416x1xf32, #tpu.memory_space<vmem>>, %arg5: memref<24x416xf32, #tpu.memory_space<vmem>>, %arg6: memref<24x1xf32, #tpu.memory_space<vmem>>, %arg7: memref<128x128xf32, #tpu.memory_space<vmem>>, %arg8: memref<1x128xf32, #tpu.memory_space<vmem>>, %arg9: memref<128x128xf32, #tpu.memory_space<vmem>>, %arg10: memref<1x128xf32, #tpu.memory_space<vmem>>, %arg11: memref<1x128xf32, #tpu.memory_space<vmem>>, %arg12: memref<1x128xf32, #tpu.memory_space<vmem>>, %arg13: memref<1x128xf32, #tpu.memory_space<vmem>>, %arg14: memref<1x128xf32, #tpu.memory_space<vmem>>, %arg15: memref<128x128xf32, #tpu.memory_space<vmem>>, %arg16: memref<1x128xf32, #tpu.memory_space<vmem>>, %arg17: memref<128x128xf32, #tpu.memory_space<vmem>>, %arg18: memref<1x128xf32, #tpu.memory_space<vmem>>, %arg19: memref<1x128xf32, #tpu.memory_space<vmem>>, %arg20: memref<1x128xf32, #tpu.memory_space<vmem>>, %arg21: memref<1x128xf32, #tpu.memory_space<vmem>>, %arg22: memref<1x128xf32, #tpu.memory_space<vmem>>, %arg23: memref<24x128xf32, #tpu.memory_space<vmem>>, %arg24: memref<24x128xf32, #tpu.memory_space<vmem>>) attributes {dimension_semantics = [#tpu.dimension_semantics<parallel>], iteration_bounds = array<i64: 1>, scalar_prefetch = 0 : i64, scratch_operands = 0 : i64, tpu.core_type = #tpu.core_type<tc>, window_params = [{transform_indices = @transform_0, window_bounds = array<i64: 24, 128>}, {pipeline_mode = #tpu.pipeline_mode<synchronous>, transform_indices = @transform_1, window_bounds = array<i64: 128, 128>}, {pipeline_mode = #tpu.pipeline_mode<synchronous>, transform_indices = @transform_2, window_bounds = array<i64: 416, 24>}, {pipeline_mode = #tpu.pipeline_mode<synchronous>, transform_indices = @transform_3, window_bounds = array<i64: 416, 1>}, {pipeline_mode = #tpu.pipeline_mode<synchronous>, transform_indices = @transform_4, window_bounds = array<i64: 24, 416>}, {pipeline_mode = #tpu.pipeline_mode<synchronous>, transform_indices = @transform_5, window_bounds = array<i64: 24, 1>}, {pipeline_mode = #tpu.pipeline_mode<synchronous>, transform_indices = @transform_6, window_bounds = array<i64: 128, 128>}, {pipeline_mode = #tpu.pipeline_mode<synchronous>, transform_indices = @transform_7, window_bounds = array<i64: 1, 128>}, {pipeline_mode = #tpu.pipeline_mode<synchronous>, transform_indices = @transform_8, window_bounds = array<i64: 128, 128>}, {pipeline_mode = #tpu.pipeline_mode<synchronous>, transform_indices = @transform_9, window_bounds = array<i64: 1, 128>}, {pipeline_mode = #tpu.pipeline_mode<synchronous>, transform_indices = @transform_10, window_bounds = array<i64: 1, 128>}, {pipeline_mode = #tpu.pipeline_mode<synchronous>, transform_indices = @transform_11, window_bounds = array<i64: 1, 128>}, {pipeline_mode = #tpu.pipeline_mode<synchronous>, transform_indices = @transform_12, window_bounds = array<i64: 1, 128>}, {pipeline_mode = #tpu.pipeline_mode<synchronous>, transform_indices = @transform_13, window_bounds = array<i64: 1, 128>}, {pipeline_mode = #tpu.pipeline_mode<synchronous>, transform_indices = @transform_14, window_bounds = array<i64: 128, 128>}, {pipeline_mode = #tpu.pipeline_mode<synchronous>, transform_indices = @transform_15, window_bounds = array<i64: 1, 128>}, {pipeline_mode = #tpu.pipeline_mode<synchronous>, transform_indices = @transform_16, window_bounds = array<i64: 128, 128>}, {pipeline_mode = #tpu.pipeline_mode<synchronous>, transform_indices = @transform_17, window_bounds = array<i64: 1, 128>}, {pipeline_mode = #tpu.pipeline_mode<synchronous>, transform_indices = @transform_18, window_bounds = array<i64: 1, 128>}, {pipeline_mode = #tpu.pipeline_mode<synchronous>, transform_indices = @transform_19, window_bounds = array<i64: 1, 128>}, {pipeline_mode = #tpu.pipeline_mode<synchronous>, transform_indices = @transform_20, window_bounds = array<i64: 1, 128>}, {pipeline_mode = #tpu.pipeline_mode<synchronous>, transform_indices = @transform_21, window_bounds = array<i64: 1, 128>}, {transform_indices = @transform_22, window_bounds = array<i64: 24, 128>}, {transform_indices = @transform_23, window_bounds = array<i64: 24, 128>}]} {
    %c0 = arith.constant 0 : index
    %c0_0 = arith.constant 0 : index
    %0 = vector.load %arg2[%c0, %c0_0] : memref<128x128xf32, #tpu.memory_space<vmem>>, vector<128x128xf32>
    %c0_1 = arith.constant 0 : index
    %c0_2 = arith.constant 0 : index
    %1 = vector.load %arg3[%c0_1, %c0_2] : memref<416x24xf32, #tpu.memory_space<vmem>>, vector<416x24xf32>
    %c0_3 = arith.constant 0 : index
    %c0_4 = arith.constant 0 : index
    %2 = vector.load %arg5[%c0_3, %c0_4] : memref<24x416xf32, #tpu.memory_space<vmem>>, vector<24x416xf32>
    %c0_5 = arith.constant 0 : index
    %c0_6 = arith.constant 0 : index
    %3 = vector.load %arg4[%c0_5, %c0_6] : memref<416x1xf32, #tpu.memory_space<vmem>>, vector<416x1xf32>
    %4 = vector.shape_cast %3 : vector<416x1xf32> to vector<416x1xf32>
    %5 = vector.broadcast %4 : vector<416x1xf32> to vector<416x128xf32>
    %c0_7 = arith.constant 0 : index
    %c0_8 = arith.constant 0 : index
    %6 = vector.load %arg6[%c0_7, %c0_8] : memref<24x1xf32, #tpu.memory_space<vmem>>, vector<24x1xf32>
    %7 = vector.shape_cast %6 : vector<24x1xf32> to vector<24x1xf32>
    %8 = vector.broadcast %7 : vector<24x1xf32> to vector<24x128xf32>
    %c0_9 = arith.constant 0 : index
    %c0_10 = arith.constant 0 : index
    %9 = vector.load %arg7[%c0_9, %c0_10] : memref<128x128xf32, #tpu.memory_space<vmem>>, vector<128x128xf32>
    %c0_11 = arith.constant 0 : index
    %c0_12 = arith.constant 0 : index
    %10 = vector.load %arg8[%c0_11, %c0_12] : memref<1x128xf32, #tpu.memory_space<vmem>>, vector<1x128xf32>
    %c0_13 = arith.constant 0 : index
    %c0_14 = arith.constant 0 : index
    %11 = vector.load %arg9[%c0_13, %c0_14] : memref<128x128xf32, #tpu.memory_space<vmem>>, vector<128x128xf32>
    %c0_15 = arith.constant 0 : index
    %c0_16 = arith.constant 0 : index
    %12 = vector.load %arg10[%c0_15, %c0_16] : memref<1x128xf32, #tpu.memory_space<vmem>>, vector<1x128xf32>
    %c0_17 = arith.constant 0 : index
    %c0_18 = arith.constant 0 : index
    %13 = vector.load %arg15[%c0_17, %c0_18] : memref<128x128xf32, #tpu.memory_space<vmem>>, vector<128x128xf32>
    %c0_19 = arith.constant 0 : index
    %c0_20 = arith.constant 0 : index
    %14 = vector.load %arg16[%c0_19, %c0_20] : memref<1x128xf32, #tpu.memory_space<vmem>>, vector<1x128xf32>
    %c0_21 = arith.constant 0 : index
    %c0_22 = arith.constant 0 : index
    %15 = vector.load %arg17[%c0_21, %c0_22] : memref<128x128xf32, #tpu.memory_space<vmem>>, vector<128x128xf32>
    %c0_23 = arith.constant 0 : index
    %c0_24 = arith.constant 0 : index
    %16 = vector.load %arg18[%c0_23, %c0_24] : memref<1x128xf32, #tpu.memory_space<vmem>>, vector<1x128xf32>
    %c0_25 = arith.constant 0 : index
    %c0_26 = arith.constant 0 : index
    %17 = vector.load %arg11[%c0_25, %c0_26] : memref<1x128xf32, #tpu.memory_space<vmem>>, vector<1x128xf32>
    %c0_27 = arith.constant 0 : index
    %c0_28 = arith.constant 0 : index
    %18 = vector.load %arg12[%c0_27, %c0_28] : memref<1x128xf32, #tpu.memory_space<vmem>>, vector<1x128xf32>
    %c0_29 = arith.constant 0 : index
    %c0_30 = arith.constant 0 : index
    %19 = vector.load %arg13[%c0_29, %c0_30] : memref<1x128xf32, #tpu.memory_space<vmem>>, vector<1x128xf32>
    %c0_31 = arith.constant 0 : index
    %c0_32 = arith.constant 0 : index
    %20 = vector.load %arg14[%c0_31, %c0_32] : memref<1x128xf32, #tpu.memory_space<vmem>>, vector<1x128xf32>
    %21 = tpu.iota {dimensions = array<i32: 0>} : vector<24x128xi32>
    %c16_i32 = arith.constant 16 : i32
    %22 = vector.broadcast %c16_i32 : i32 to vector<24x128xi32>
    %23 = arith.cmpi slt, %21, %22 : vector<24x128xi32>
    %c20_i32 = arith.constant 20 : i32
    %24 = vector.broadcast %c20_i32 : i32 to vector<24x128xi32>
    %25 = arith.cmpi sge, %21, %24 : vector<24x128xi32>
    %c0_33 = arith.constant 0 : index
    %c0_34 = arith.constant 0 : index
    %26 = vector.load %arg1[%c0_33, %c0_34] : memref<24x128xf32, #tpu.memory_space<vmem>>, vector<24x128xf32>
    %cst = arith.constant dense<0.000000e+00> : vector<24x128xf32>
    %27 = tpu.matmul %26, %0, %cst {dimension_numbers = #tpu.dot_dimension_numbers<[1], [0], [0], [1], [0, 0, 1, 1], [], []>} : vector<24x128xf32>, vector<128x128xf32>, vector<24x128xf32> -> vector<24x128xf32>
    %28 = arith.subf %26, %27 : vector<24x128xf32>
    %29 = arith.mulf %28, %28 : vector<24x128xf32>
    %cst_35 = arith.constant dense<0.000000e+00> : vector<24x128xf32>
    %30 = tpu.matmul %29, %0, %cst_35 {dimension_numbers = #tpu.dot_dimension_numbers<[1], [0], [0], [1], [0, 0, 1, 1], [], []>} : vector<24x128xf32>, vector<128x128xf32>, vector<24x128xf32> -> vector<24x128xf32>
    %cst_36 = arith.constant 9.99999974E-6 : f32
    %31 = vector.broadcast %cst_36 : f32 to vector<24x128xf32>
    %32 = arith.addf %30, %31 : vector<24x128xf32>
    %33 = math.rsqrt %32 : vector<24x128xf32>
    %34 = arith.mulf %28, %33 : vector<24x128xf32>
    %35 = vector.broadcast %17 : vector<1x128xf32> to vector<24x128xf32>
    %36 = arith.mulf %34, %35 : vector<24x128xf32>
    %37 = vector.broadcast %18 : vector<1x128xf32> to vector<24x128xf32>
    %38 = arith.addf %36, %37 : vector<24x128xf32>
    %cst_37 = arith.constant dense<0.000000e+00> : vector<416x128xf32>
    %39 = tpu.matmul %1, %38, %cst_37 {dimension_numbers = #tpu.dot_dimension_numbers<[1], [0], [0], [1], [0, 0, 1, 1], [], []>} : vector<416x24xf32>, vector<24x128xf32>, vector<416x128xf32> -> vector<416x128xf32>
    %40 = arith.addf %39, %5 : vector<416x128xf32>
    %cst_38 = arith.constant 5.000000e-01 : f32
    %41 = vector.broadcast %cst_38 : f32 to vector<416x128xf32>
    %42 = arith.mulf %41, %40 : vector<416x128xf32>
    %cst_39 = arith.constant 4.471500e-02 : f32
    %43 = vector.broadcast %cst_39 : f32 to vector<416x128xf32>
    %44 = arith.mulf %43, %40 : vector<416x128xf32>
    %45 = arith.mulf %44, %40 : vector<416x128xf32>
    %46 = arith.mulf %45, %40 : vector<416x128xf32>
    %47 = arith.addf %40, %46 : vector<416x128xf32>
    %cst_40 = arith.constant 0.797884583 : f32
    %48 = vector.broadcast %cst_40 : f32 to vector<416x128xf32>
    %49 = arith.mulf %48, %47 : vector<416x128xf32>
    %50 = math.tanh %49 : vector<416x128xf32>
    %cst_41 = arith.constant 1.000000e+00 : f32
    %51 = vector.broadcast %cst_41 : f32 to vector<416x128xf32>
    %52 = arith.addf %51, %50 : vector<416x128xf32>
    %53 = arith.mulf %42, %52 : vector<416x128xf32>
    %cst_42 = arith.constant dense<0.000000e+00> : vector<24x128xf32>
    %54 = tpu.matmul %2, %53, %cst_42 {dimension_numbers = #tpu.dot_dimension_numbers<[1], [0], [0], [1], [0, 0, 1, 1], [], []>} : vector<24x416xf32>, vector<416x128xf32>, vector<24x128xf32> -> vector<24x128xf32>
    %55 = arith.addf %26, %54 : vector<24x128xf32>
    %56 = arith.addf %55, %8 : vector<24x128xf32>
    %cst_43 = arith.constant dense<0.000000e+00> : vector<24x128xf32>
    %57 = tpu.matmul %56, %0, %cst_43 {dimension_numbers = #tpu.dot_dimension_numbers<[1], [0], [0], [1], [0, 0, 1, 1], [], []>} : vector<24x128xf32>, vector<128x128xf32>, vector<24x128xf32> -> vector<24x128xf32>
    %58 = arith.subf %56, %57 : vector<24x128xf32>
    %59 = arith.mulf %58, %58 : vector<24x128xf32>
    %cst_44 = arith.constant dense<0.000000e+00> : vector<24x128xf32>
    %60 = tpu.matmul %59, %0, %cst_44 {dimension_numbers = #tpu.dot_dimension_numbers<[1], [0], [0], [1], [0, 0, 1, 1], [], []>} : vector<24x128xf32>, vector<128x128xf32>, vector<24x128xf32> -> vector<24x128xf32>
    %cst_45 = arith.constant 9.99999974E-6 : f32
    %61 = vector.broadcast %cst_45 : f32 to vector<24x128xf32>
    %62 = arith.addf %60, %61 : vector<24x128xf32>
    %63 = math.rsqrt %62 : vector<24x128xf32>
    %64 = arith.mulf %58, %63 : vector<24x128xf32>
    %65 = vector.broadcast %19 : vector<1x128xf32> to vector<24x128xf32>
    %66 = arith.mulf %64, %65 : vector<24x128xf32>
    %67 = vector.broadcast %20 : vector<1x128xf32> to vector<24x128xf32>
    %68 = arith.addf %66, %67 : vector<24x128xf32>
    %cst_46 = arith.constant dense<0.000000e+00> : vector<24x128xf32>
    %69 = tpu.matmul %68, %9, %cst_46 {dimension_numbers = #tpu.dot_dimension_numbers<[1], [0], [0], [1], [0, 0, 1, 1], [], []>} : vector<24x128xf32>, vector<128x128xf32>, vector<24x128xf32> -> vector<24x128xf32>
    %70 = vector.broadcast %10 : vector<1x128xf32> to vector<24x128xf32>
    %71 = arith.addf %69, %70 : vector<24x128xf32>
    %cst_47 = arith.constant 5.000000e-01 : f32
    %72 = vector.broadcast %cst_47 : f32 to vector<24x128xf32>
    %73 = arith.mulf %72, %71 : vector<24x128xf32>
    %cst_48 = arith.constant 4.471500e-02 : f32
    %74 = vector.broadcast %cst_48 : f32 to vector<24x128xf32>
    %75 = arith.mulf %74, %71 : vector<24x128xf32>
    %76 = arith.mulf %75, %71 : vector<24x128xf32>
    %77 = arith.mulf %76, %71 : vector<24x128xf32>
    %78 = arith.addf %71, %77 : vector<24x128xf32>
    %cst_49 = arith.constant 0.797884583 : f32
    %79 = vector.broadcast %cst_49 : f32 to vector<24x128xf32>
    %80 = arith.mulf %79, %78 : vector<24x128xf32>
    %81 = math.tanh %80 : vector<24x128xf32>
    %cst_50 = arith.constant 1.000000e+00 : f32
    %82 = vector.broadcast %cst_50 : f32 to vector<24x128xf32>
    %83 = arith.addf %82, %81 : vector<24x128xf32>
    %84 = arith.mulf %73, %83 : vector<24x128xf32>
    %cst_51 = arith.constant dense<0.000000e+00> : vector<24x128xf32>
    %85 = tpu.matmul %84, %11, %cst_51 {dimension_numbers = #tpu.dot_dimension_numbers<[1], [0], [0], [1], [0, 0, 1, 1], [], []>} : vector<24x128xf32>, vector<128x128xf32>, vector<24x128xf32> -> vector<24x128xf32>
    %86 = arith.addf %56, %85 : vector<24x128xf32>
    %87 = vector.broadcast %12 : vector<1x128xf32> to vector<24x128xf32>
    %88 = arith.addf %86, %87 : vector<24x128xf32>
    %cst_52 = arith.constant dense<0.000000e+00> : vector<24x128xf32>
    %89 = tpu.matmul %88, %13, %cst_52 {dimension_numbers = #tpu.dot_dimension_numbers<[1], [0], [0], [1], [0, 0, 1, 1], [], []>} : vector<24x128xf32>, vector<128x128xf32>, vector<24x128xf32> -> vector<24x128xf32>
    %90 = vector.broadcast %14 : vector<1x128xf32> to vector<24x128xf32>
    %91 = arith.addf %89, %90 : vector<24x128xf32>
    %cst_53 = arith.constant 5.000000e-01 : f32
    %92 = vector.broadcast %cst_53 : f32 to vector<24x128xf32>
    %93 = arith.mulf %92, %91 : vector<24x128xf32>
    %cst_54 = arith.constant 4.471500e-02 : f32
    %94 = vector.broadcast %cst_54 : f32 to vector<24x128xf32>
    %95 = arith.mulf %94, %91 : vector<24x128xf32>
    %96 = arith.mulf %95, %91 : vector<24x128xf32>
    %97 = arith.mulf %96, %91 : vector<24x128xf32>
    %98 = arith.addf %91, %97 : vector<24x128xf32>
    %cst_55 = arith.constant 0.797884583 : f32
    %99 = vector.broadcast %cst_55 : f32 to vector<24x128xf32>
    %100 = arith.mulf %99, %98 : vector<24x128xf32>
    %101 = math.tanh %100 : vector<24x128xf32>
    %cst_56 = arith.constant 1.000000e+00 : f32
    %102 = vector.broadcast %cst_56 : f32 to vector<24x128xf32>
    %103 = arith.addf %102, %101 : vector<24x128xf32>
    %104 = arith.mulf %93, %103 : vector<24x128xf32>
    %cst_57 = arith.constant dense<0.000000e+00> : vector<24x128xf32>
    %105 = tpu.matmul %104, %15, %cst_57 {dimension_numbers = #tpu.dot_dimension_numbers<[1], [0], [0], [1], [0, 0, 1, 1], [], []>} : vector<24x128xf32>, vector<128x128xf32>, vector<24x128xf32> -> vector<24x128xf32>
    %106 = vector.broadcast %16 : vector<1x128xf32> to vector<24x128xf32>
    %107 = arith.addf %105, %106 : vector<24x128xf32>
    %cst_58 = arith.constant 0.000000e+00 : f32
    %108 = vector.broadcast %cst_58 : f32 to vector<24x128xf32>
    %109 = arith.select %25, %107, %108 : vector<24x128xi1>, vector<24x128xf32>
    %110 = arith.select %23, %88, %109 : vector<24x128xi1>, vector<24x128xf32>
    %cst_59 = arith.constant dense<0.000000e+00> : vector<24x128xf32>
    %111 = tpu.matmul %110, %0, %cst_59 {dimension_numbers = #tpu.dot_dimension_numbers<[1], [0], [0], [1], [0, 0, 1, 1], [], []>} : vector<24x128xf32>, vector<128x128xf32>, vector<24x128xf32> -> vector<24x128xf32>
    %112 = arith.subf %110, %111 : vector<24x128xf32>
    %113 = arith.mulf %112, %112 : vector<24x128xf32>
    %cst_60 = arith.constant dense<0.000000e+00> : vector<24x128xf32>
    %114 = tpu.matmul %113, %0, %cst_60 {dimension_numbers = #tpu.dot_dimension_numbers<[1], [0], [0], [1], [0, 0, 1, 1], [], []>} : vector<24x128xf32>, vector<128x128xf32>, vector<24x128xf32> -> vector<24x128xf32>
    %cst_61 = arith.constant 9.99999974E-6 : f32
    %115 = vector.broadcast %cst_61 : f32 to vector<24x128xf32>
    %116 = arith.addf %114, %115 : vector<24x128xf32>
    %117 = math.rsqrt %116 : vector<24x128xf32>
    %118 = arith.mulf %112, %117 : vector<24x128xf32>
    %119 = vector.broadcast %17 : vector<1x128xf32> to vector<24x128xf32>
    %120 = arith.mulf %118, %119 : vector<24x128xf32>
    %121 = vector.broadcast %18 : vector<1x128xf32> to vector<24x128xf32>
    %122 = arith.addf %120, %121 : vector<24x128xf32>
    %cst_62 = arith.constant dense<0.000000e+00> : vector<416x128xf32>
    %123 = tpu.matmul %1, %122, %cst_62 {dimension_numbers = #tpu.dot_dimension_numbers<[1], [0], [0], [1], [0, 0, 1, 1], [], []>} : vector<416x24xf32>, vector<24x128xf32>, vector<416x128xf32> -> vector<416x128xf32>
    %124 = arith.addf %123, %5 : vector<416x128xf32>
    %cst_63 = arith.constant 5.000000e-01 : f32
    %125 = vector.broadcast %cst_63 : f32 to vector<416x128xf32>
    %126 = arith.mulf %125, %124 : vector<416x128xf32>
    %cst_64 = arith.constant 4.471500e-02 : f32
    %127 = vector.broadcast %cst_64 : f32 to vector<416x128xf32>
    %128 = arith.mulf %127, %124 : vector<416x128xf32>
    %129 = arith.mulf %128, %124 : vector<416x128xf32>
    %130 = arith.mulf %129, %124 : vector<416x128xf32>
    %131 = arith.addf %124, %130 : vector<416x128xf32>
    %cst_65 = arith.constant 0.797884583 : f32
    %132 = vector.broadcast %cst_65 : f32 to vector<416x128xf32>
    %133 = arith.mulf %132, %131 : vector<416x128xf32>
    %134 = math.tanh %133 : vector<416x128xf32>
    %cst_66 = arith.constant 1.000000e+00 : f32
    %135 = vector.broadcast %cst_66 : f32 to vector<416x128xf32>
    %136 = arith.addf %135, %134 : vector<416x128xf32>
    %137 = arith.mulf %126, %136 : vector<416x128xf32>
    %cst_67 = arith.constant dense<0.000000e+00> : vector<24x128xf32>
    %138 = tpu.matmul %2, %137, %cst_67 {dimension_numbers = #tpu.dot_dimension_numbers<[1], [0], [0], [1], [0, 0, 1, 1], [], []>} : vector<24x416xf32>, vector<416x128xf32>, vector<24x128xf32> -> vector<24x128xf32>
    %139 = arith.addf %110, %138 : vector<24x128xf32>
    %140 = arith.addf %139, %8 : vector<24x128xf32>
    %cst_68 = arith.constant dense<0.000000e+00> : vector<24x128xf32>
    %141 = tpu.matmul %140, %0, %cst_68 {dimension_numbers = #tpu.dot_dimension_numbers<[1], [0], [0], [1], [0, 0, 1, 1], [], []>} : vector<24x128xf32>, vector<128x128xf32>, vector<24x128xf32> -> vector<24x128xf32>
    %142 = arith.subf %140, %141 : vector<24x128xf32>
    %143 = arith.mulf %142, %142 : vector<24x128xf32>
    %cst_69 = arith.constant dense<0.000000e+00> : vector<24x128xf32>
    %144 = tpu.matmul %143, %0, %cst_69 {dimension_numbers = #tpu.dot_dimension_numbers<[1], [0], [0], [1], [0, 0, 1, 1], [], []>} : vector<24x128xf32>, vector<128x128xf32>, vector<24x128xf32> -> vector<24x128xf32>
    %cst_70 = arith.constant 9.99999974E-6 : f32
    %145 = vector.broadcast %cst_70 : f32 to vector<24x128xf32>
    %146 = arith.addf %144, %145 : vector<24x128xf32>
    %147 = math.rsqrt %146 : vector<24x128xf32>
    %148 = arith.mulf %142, %147 : vector<24x128xf32>
    %149 = vector.broadcast %19 : vector<1x128xf32> to vector<24x128xf32>
    %150 = arith.mulf %148, %149 : vector<24x128xf32>
    %151 = vector.broadcast %20 : vector<1x128xf32> to vector<24x128xf32>
    %152 = arith.addf %150, %151 : vector<24x128xf32>
    %cst_71 = arith.constant dense<0.000000e+00> : vector<24x128xf32>
    %153 = tpu.matmul %152, %9, %cst_71 {dimension_numbers = #tpu.dot_dimension_numbers<[1], [0], [0], [1], [0, 0, 1, 1], [], []>} : vector<24x128xf32>, vector<128x128xf32>, vector<24x128xf32> -> vector<24x128xf32>
    %154 = vector.broadcast %10 : vector<1x128xf32> to vector<24x128xf32>
    %155 = arith.addf %153, %154 : vector<24x128xf32>
    %cst_72 = arith.constant 5.000000e-01 : f32
    %156 = vector.broadcast %cst_72 : f32 to vector<24x128xf32>
    %157 = arith.mulf %156, %155 : vector<24x128xf32>
    %cst_73 = arith.constant 4.471500e-02 : f32
    %158 = vector.broadcast %cst_73 : f32 to vector<24x128xf32>
    %159 = arith.mulf %158, %155 : vector<24x128xf32>
    %160 = arith.mulf %159, %155 : vector<24x128xf32>
    %161 = arith.mulf %160, %155 : vector<24x128xf32>
    %162 = arith.addf %155, %161 : vector<24x128xf32>
    %cst_74 = arith.constant 0.797884583 : f32
    %163 = vector.broadcast %cst_74 : f32 to vector<24x128xf32>
    %164 = arith.mulf %163, %162 : vector<24x128xf32>
    %165 = math.tanh %164 : vector<24x128xf32>
    %cst_75 = arith.constant 1.000000e+00 : f32
    %166 = vector.broadcast %cst_75 : f32 to vector<24x128xf32>
    %167 = arith.addf %166, %165 : vector<24x128xf32>
    %168 = arith.mulf %157, %167 : vector<24x128xf32>
    %cst_76 = arith.constant dense<0.000000e+00> : vector<24x128xf32>
    %169 = tpu.matmul %168, %11, %cst_76 {dimension_numbers = #tpu.dot_dimension_numbers<[1], [0], [0], [1], [0, 0, 1, 1], [], []>} : vector<24x128xf32>, vector<128x128xf32>, vector<24x128xf32> -> vector<24x128xf32>
    %170 = arith.addf %140, %169 : vector<24x128xf32>
    %171 = vector.broadcast %12 : vector<1x128xf32> to vector<24x128xf32>
    %172 = arith.addf %170, %171 : vector<24x128xf32>
    %cst_77 = arith.constant dense<0.000000e+00> : vector<24x128xf32>
    %173 = tpu.matmul %172, %13, %cst_77 {dimension_numbers = #tpu.dot_dimension_numbers<[1], [0], [0], [1], [0, 0, 1, 1], [], []>} : vector<24x128xf32>, vector<128x128xf32>, vector<24x128xf32> -> vector<24x128xf32>
    %174 = vector.broadcast %14 : vector<1x128xf32> to vector<24x128xf32>
    %175 = arith.addf %173, %174 : vector<24x128xf32>
    %cst_78 = arith.constant 5.000000e-01 : f32
    %176 = vector.broadcast %cst_78 : f32 to vector<24x128xf32>
    %177 = arith.mulf %176, %175 : vector<24x128xf32>
    %cst_79 = arith.constant 4.471500e-02 : f32
    %178 = vector.broadcast %cst_79 : f32 to vector<24x128xf32>
    %179 = arith.mulf %178, %175 : vector<24x128xf32>
    %180 = arith.mulf %179, %175 : vector<24x128xf32>
    %181 = arith.mulf %180, %175 : vector<24x128xf32>
    %182 = arith.addf %175, %181 : vector<24x128xf32>
    %cst_80 = arith.constant 0.797884583 : f32
    %183 = vector.broadcast %cst_80 : f32 to vector<24x128xf32>
    %184 = arith.mulf %183, %182 : vector<24x128xf32>
    %185 = math.tanh %184 : vector<24x128xf32>
    %cst_81 = arith.constant 1.000000e+00 : f32
    %186 = vector.broadcast %cst_81 : f32 to vector<24x128xf32>
    %187 = arith.addf %186, %185 : vector<24x128xf32>
    %188 = arith.mulf %177, %187 : vector<24x128xf32>
    %cst_82 = arith.constant dense<0.000000e+00> : vector<24x128xf32>
    %189 = tpu.matmul %188, %15, %cst_82 {dimension_numbers = #tpu.dot_dimension_numbers<[1], [0], [0], [1], [0, 0, 1, 1], [], []>} : vector<24x128xf32>, vector<128x128xf32>, vector<24x128xf32> -> vector<24x128xf32>
    %190 = vector.broadcast %16 : vector<1x128xf32> to vector<24x128xf32>
    %191 = arith.addf %189, %190 : vector<24x128xf32>
    %c0_83 = arith.constant 0 : index
    %c0_84 = arith.constant 0 : index
    %192 = vector.load %arg19[%c0_83, %c0_84] : memref<1x128xf32, #tpu.memory_space<vmem>>, vector<1x128xf32>
    %c0_85 = arith.constant 0 : index
    %c0_86 = arith.constant 0 : index
    %193 = vector.load %arg20[%c0_85, %c0_86] : memref<1x128xf32, #tpu.memory_space<vmem>>, vector<1x128xf32>
    %cst_87 = arith.constant dense<0.000000e+00> : vector<24x128xf32>
    %194 = tpu.matmul %172, %0, %cst_87 {dimension_numbers = #tpu.dot_dimension_numbers<[1], [0], [0], [1], [0, 0, 1, 1], [], []>} : vector<24x128xf32>, vector<128x128xf32>, vector<24x128xf32> -> vector<24x128xf32>
    %195 = arith.subf %172, %194 : vector<24x128xf32>
    %196 = arith.mulf %195, %195 : vector<24x128xf32>
    %cst_88 = arith.constant dense<0.000000e+00> : vector<24x128xf32>
    %197 = tpu.matmul %196, %0, %cst_88 {dimension_numbers = #tpu.dot_dimension_numbers<[1], [0], [0], [1], [0, 0, 1, 1], [], []>} : vector<24x128xf32>, vector<128x128xf32>, vector<24x128xf32> -> vector<24x128xf32>
    %cst_89 = arith.constant 9.99999974E-6 : f32
    %198 = vector.broadcast %cst_89 : f32 to vector<24x128xf32>
    %199 = arith.addf %197, %198 : vector<24x128xf32>
    %200 = math.rsqrt %199 : vector<24x128xf32>
    %201 = arith.mulf %195, %200 : vector<24x128xf32>
    %202 = vector.broadcast %192 : vector<1x128xf32> to vector<24x128xf32>
    %203 = arith.mulf %201, %202 : vector<24x128xf32>
    %204 = vector.broadcast %193 : vector<1x128xf32> to vector<24x128xf32>
    %205 = arith.addf %203, %204 : vector<24x128xf32>
    %c0_90 = arith.constant 0 : index
    %c0_91 = arith.constant 0 : index
    %206 = vector.load %arg23[%c0_90, %c0_91] : memref<24x128xf32, #tpu.memory_space<vmem>>, vector<24x128xf32>
    tpu.vector_store %arg23[%c0_90, %c0_91], %205 {strides = array<i32>} : memref<24x128xf32, #tpu.memory_space<vmem>>, vector<24x128xf32>,
    %c0_92 = arith.constant 0 : index
    %c0_93 = arith.constant 0 : index
    %207 = vector.load %arg21[%c0_92, %c0_93] : memref<1x128xf32, #tpu.memory_space<vmem>>, vector<1x128xf32>
    %c0_94 = arith.constant 0 : index
    %c0_95 = arith.constant 0 : index
    %208 = vector.load %arg22[%c0_94, %c0_95] : memref<1x128xf32, #tpu.memory_space<vmem>>, vector<1x128xf32>
    %cst_96 = arith.constant dense<0.000000e+00> : vector<24x128xf32>
    %209 = tpu.matmul %191, %0, %cst_96 {dimension_numbers = #tpu.dot_dimension_numbers<[1], [0], [0], [1], [0, 0, 1, 1], [], []>} : vector<24x128xf32>, vector<128x128xf32>, vector<24x128xf32> -> vector<24x128xf32>
    %210 = arith.subf %191, %209 : vector<24x128xf32>
    %211 = arith.mulf %210, %210 : vector<24x128xf32>
    %cst_97 = arith.constant dense<0.000000e+00> : vector<24x128xf32>
    %212 = tpu.matmul %211, %0, %cst_97 {dimension_numbers = #tpu.dot_dimension_numbers<[1], [0], [0], [1], [0, 0, 1, 1], [], []>} : vector<24x128xf32>, vector<128x128xf32>, vector<24x128xf32> -> vector<24x128xf32>
    %cst_98 = arith.constant 9.99999974E-6 : f32
    %213 = vector.broadcast %cst_98 : f32 to vector<24x128xf32>
    %214 = arith.addf %212, %213 : vector<24x128xf32>
    %215 = math.rsqrt %214 : vector<24x128xf32>
    %216 = arith.mulf %210, %215 : vector<24x128xf32>
    %217 = vector.broadcast %207 : vector<1x128xf32> to vector<24x128xf32>
    %218 = arith.mulf %216, %217 : vector<24x128xf32>
    %219 = vector.broadcast %208 : vector<1x128xf32> to vector<24x128xf32>
    %220 = arith.addf %218, %219 : vector<24x128xf32>
    %c0_99 = arith.constant 0 : index
    %c0_100 = arith.constant 0 : index
    %221 = vector.load %arg24[%c0_99, %c0_100] : memref<24x128xf32, #tpu.memory_space<vmem>>, vector<24x128xf32>
    tpu.vector_store %arg24[%c0_99, %c0_100], %220 {strides = array<i32>} : memref<24x128xf32, #tpu.memory_space<vmem>>, vector<24x128xf32>,
    return
  }
  func.func @transform_0(%arg0: i32) -> (i32, i32) {
    %c0_i32 = arith.constant 0 : i32
    %c0_i32_0 = arith.constant 0 : i32
    return %c0_i32, %arg0 : i32, i32
  }
  func.func @transform_1(%arg0: i32) -> (i32, i32) {
    %c0_i32 = arith.constant 0 : i32
    %c0_i32_0 = arith.constant 0 : i32
    %c0_i32_1 = arith.constant 0 : i32
    return %c0_i32, %c0_i32_0 : i32, i32
  }
  func.func @transform_2(%arg0: i32) -> (i32, i32) {
    %c0_i32 = arith.constant 0 : i32
    %c0_i32_0 = arith.constant 0 : i32
    %c0_i32_1 = arith.constant 0 : i32
    return %c0_i32, %c0_i32_0 : i32, i32
  }
  func.func @transform_3(%arg0: i32) -> (i32, i32) {
    %c0_i32 = arith.constant 0 : i32
    %c0_i32_0 = arith.constant 0 : i32
    %c0_i32_1 = arith.constant 0 : i32
    return %c0_i32, %c0_i32_0 : i32, i32
  }
  func.func @transform_4(%arg0: i32) -> (i32, i32) {
    %c0_i32 = arith.constant 0 : i32
    %c0_i32_0 = arith.constant 0 : i32
    %c0_i32_1 = arith.constant 0 : i32
    return %c0_i32, %c0_i32_0 : i32, i32
  }
  func.func @transform_5(%arg0: i32) -> (i32, i32) {
    %c0_i32 = arith.constant 0 : i32
    %c0_i32_0 = arith.constant 0 : i32
    %c0_i32_1 = arith.constant 0 : i32
    return %c0_i32, %c0_i32_0 : i32, i32
  }
  func.func @transform_6(%arg0: i32) -> (i32, i32) {
    %c0_i32 = arith.constant 0 : i32
    %c0_i32_0 = arith.constant 0 : i32
    %c0_i32_1 = arith.constant 0 : i32
    return %c0_i32, %c0_i32_0 : i32, i32
  }
  func.func @transform_7(%arg0: i32) -> (i32, i32) {
    %c0_i32 = arith.constant 0 : i32
    %c0_i32_0 = arith.constant 0 : i32
    %c0_i32_1 = arith.constant 0 : i32
    return %c0_i32, %c0_i32_0 : i32, i32
  }
  func.func @transform_8(%arg0: i32) -> (i32, i32) {
    %c0_i32 = arith.constant 0 : i32
    %c0_i32_0 = arith.constant 0 : i32
    %c0_i32_1 = arith.constant 0 : i32
    return %c0_i32, %c0_i32_0 : i32, i32
  }
  func.func @transform_9(%arg0: i32) -> (i32, i32) {
    %c0_i32 = arith.constant 0 : i32
    %c0_i32_0 = arith.constant 0 : i32
    %c0_i32_1 = arith.constant 0 : i32
    return %c0_i32, %c0_i32_0 : i32, i32
  }
  func.func @transform_10(%arg0: i32) -> (i32, i32) {
    %c0_i32 = arith.constant 0 : i32
    %c0_i32_0 = arith.constant 0 : i32
    %c0_i32_1 = arith.constant 0 : i32
    return %c0_i32, %c0_i32_0 : i32, i32
  }
  func.func @transform_11(%arg0: i32) -> (i32, i32) {
    %c0_i32 = arith.constant 0 : i32
    %c0_i32_0 = arith.constant 0 : i32
    %c0_i32_1 = arith.constant 0 : i32
    return %c0_i32, %c0_i32_0 : i32, i32
  }
  func.func @transform_12(%arg0: i32) -> (i32, i32) {
    %c0_i32 = arith.constant 0 : i32
    %c0_i32_0 = arith.constant 0 : i32
    %c0_i32_1 = arith.constant 0 : i32
    return %c0_i32, %c0_i32_0 : i32, i32
  }
  func.func @transform_13(%arg0: i32) -> (i32, i32) {
    %c0_i32 = arith.constant 0 : i32
    %c0_i32_0 = arith.constant 0 : i32
    %c0_i32_1 = arith.constant 0 : i32
    return %c0_i32, %c0_i32_0 : i32, i32
  }
  func.func @transform_14(%arg0: i32) -> (i32, i32) {
    %c0_i32 = arith.constant 0 : i32
    %c0_i32_0 = arith.constant 0 : i32
    %c0_i32_1 = arith.constant 0 : i32
    return %c0_i32, %c0_i32_0 : i32, i32
  }
  func.func @transform_15(%arg0: i32) -> (i32, i32) {
    %c0_i32 = arith.constant 0 : i32
    %c0_i32_0 = arith.constant 0 : i32
    %c0_i32_1 = arith.constant 0 : i32
    return %c0_i32, %c0_i32_0 : i32, i32
  }
  func.func @transform_16(%arg0: i32) -> (i32, i32) {
    %c0_i32 = arith.constant 0 : i32
    %c0_i32_0 = arith.constant 0 : i32
    %c0_i32_1 = arith.constant 0 : i32
    return %c0_i32, %c0_i32_0 : i32, i32
  }
  func.func @transform_17(%arg0: i32) -> (i32, i32) {
    %c0_i32 = arith.constant 0 : i32
    %c0_i32_0 = arith.constant 0 : i32
    %c0_i32_1 = arith.constant 0 : i32
    return %c0_i32, %c0_i32_0 : i32, i32
  }
  func.func @transform_18(%arg0: i32) -> (i32, i32) {
    %c0_i32 = arith.constant 0 : i32
    %c0_i32_0 = arith.constant 0 : i32
    %c0_i32_1 = arith.constant 0 : i32
    return %c0_i32, %c0_i32_0 : i32, i32
  }
  func.func @transform_19(%arg0: i32) -> (i32, i32) {
    %c0_i32 = arith.constant 0 : i32
    %c0_i32_0 = arith.constant 0 : i32
    %c0_i32_1 = arith.constant 0 : i32
    return %c0_i32, %c0_i32_0 : i32, i32
  }
  func.func @transform_20(%arg0: i32) -> (i32, i32) {
    %c0_i32 = arith.constant 0 : i32
    %c0_i32_0 = arith.constant 0 : i32
    %c0_i32_1 = arith.constant 0 : i32
    return %c0_i32, %c0_i32_0 : i32, i32
  }
  func.func @transform_21(%arg0: i32) -> (i32, i32) {
    %c0_i32 = arith.constant 0 : i32
    %c0_i32_0 = arith.constant 0 : i32
    %c0_i32_1 = arith.constant 0 : i32
    return %c0_i32, %c0_i32_0 : i32, i32
  }
  func.func @transform_22(%arg0: i32) -> (i32, i32) {
    %c0_i32 = arith.constant 0 : i32
    %c0_i32_0 = arith.constant 0 : i32
    return %c0_i32, %arg0 : i32, i32
  }
  func.func @transform_23(%arg0: i32) -> (i32, i32) {
    %c0_i32 = arith.constant 0 : i32
    %c0_i32_0 = arith.constant 0 : i32
    return %c0_i32, %arg0 : i32, i32
  }
}

</mosaic_0001>

<bundles_post_ra>
// kernel: ifc_encoder_forward.1
= control target key start
LH: loop header
LB: loop body
LE: loop exit
PB: predicated region body
PF: predicated region fallthrough
CT: control target
= control target key end

     0   :  { %v10278_v0 = vmov 0.0|0.0   ;;  %vm7222_vm0 = vmmov 0   ;;  %v10276_v4 = vmov 0.0   ;;  %v7224_v41 = vmov 0   ;;  %s10244_s1 = inlined_call_operand.vmem [shape: f32[128,128], index: 1, kind: input, shape index: {}]   ;;  %s10245_s0 = inlined_call_operand.vmem [shape: f32[24,128], index: 0, kind: input, shape index: {}]   ;;  %s10246_s3 = inlined_call_operand.vmem [shape: f32[416,1], index: 3, kind: input, shape index: {}]   ;;  %s10247_s2 = inlined_call_operand.vmem [shape: f32[416,24], index: 2, kind: input, shape index: {}]   ;;  %s10248_s5 = inlined_call_operand.vmem [shape: f32[24,1], index: 5, kind: input, shape index: {}]   ;;  %s10249_s10 = inlined_call_operand.vmem [shape: f32[1,128], index: 10, kind: input, shape index: {}]   ;;  %s10250_s11 = inlined_call_operand.vmem [shape: f32[1,128], index: 11, kind: input, shape index: {}]   ;;  %s10251_s4 = inlined_call_operand.vmem [shape: f32[24,416], index: 4, kind: input, shape index: {}]   ;;  %s10252_s6 = inlined_call_operand.vmem [shape: f32[128,128], index: 6, kind: input, shape index: {}]   ;;  %s10253_s8 = inlined_call_operand.vmem [shape: f32[128,128], index: 8, kind: input, shape index: {}]   ;;  %s10254_s12 = inlined_call_operand.vmem [shape: f32[1,128], index: 12, kind: input, shape index: {}]   ;;  %s10255_s13 = inlined_call_operand.vmem [shape: f32[1,128], index: 13, kind: input, shape index: {}]   ;;  %s10256_s14 = inlined_call_operand.vmem [shape: f32[128,128], index: 14, kind: input, shape index: {}]   ;;  %s10257_s7 = inlined_call_operand.vmem [shape: f32[1,128], index: 7, kind: input, shape index: {}]   ;;  %s10258_s16 = inlined_call_operand.vmem [shape: f32[128,128], index: 16, kind: input, shape index: {}]   ;;  %s10259_s9 = inlined_call_operand.vmem [shape: f32[1,128], index: 9, kind: input, shape index: {}]   ;;  %s10260_s15 = inlined_call_operand.vmem [shape: f32[1,128], index: 15, kind: input, shape index: {}]   ;;  %s10261_s17 = inlined_call_operand.vmem [shape: f32[1,128], index: 17, kind: input, shape index: {}]   ;;  %s10262_s18 = inlined_call_operand.vmem [shape: f32[1,128], index: 18, kind: input, shape index: {}]   ;;  %s10263_s19 = inlined_call_operand.vmem [shape: f32[1,128], index: 19, kind: input, shape index: {}]   ;;  %s10264_s22 = inlined_call_operand.vmem [shape: f32[24,128], index: 22, kind: output, shape index: {0}]   ;;  %s10265_s20 = inlined_call_operand.vmem [shape: f32[1,128], index: 20, kind: input, shape index: {}]   ;;  %s10266_s21 = inlined_call_operand.vmem [shape: f32[1,128], index: 21, kind: input, shape index: {}]   ;;  %s10267_s23 = inlined_call_operand.vmem [shape: f32[24,128], index: 23, kind: output, shape index: {1}]  }
   0x1   :  { %10395 = sst [smem:[#allocation95_spill]] %s10244_s1  ;;  %6260 = vmatprep.subr.bf16.mxu0 %v10278_v0  ;;  %5304 = vmatprep.mubr.msk.f32.mxu0 %vm7222_vm0, %v10276_v4  ;;  %vm758_vm1 = vcmask 195584   ;;  %vm1708_vm2 = vcmask 261120  }
   0x2   :  { %10396 = sst [smem:[#allocation96_spill]] %s10245_s0  ;;  %s10403_s24 = sld [smem:[#allocation95_spill]]  ;;  %6284 = vmatprep.subr.bf16.mxu1 %v10278_v0  ;;  %5345 = vmatprep.mubr.msk.f32.mxu1 %vm7222_vm0, %v10276_v4 }
   0x3   :  { %10397 = sst [smem:[#allocation97_spill]] %s10246_s3  ;;  %s10412_s3 = sld [smem:[#allocation96_spill]]  ;;  %6876 = vset.pattern.permute.xlu0 %v7224_v41  ;;  %6877 = vset.pattern.permute.xlu1 %v7224_v41 }
   0x4   :  { %10398 = sst [smem:[#allocation98_spill]] %s10247_s2  ;;  %s10413_s2 = sld [smem:[#allocation97_spill]] }
   0x5   :  { %10399 = sst [smem:[#allocation99_spill]] %s10248_s5  ;;  %s10414_s27 = sld [smem:[#allocation98_spill]] }
   0x6   :  { %10400 = sst [smem:[#allocation100_spill]] %s10249_s10 }
   0x7   :  { %10401 = sst [smem:[#allocation101_spill]] %s10250_s11  ;;  %s10416_s25 = sld [smem:[#allocation100_spill]] }
   0x8   :  { %10402 = sst [smem:[#allocation102_spill]] %s10251_s4  ;;  %v73_v1 = vld [vmem:[%s10403_s24] sm:$0xff]  ;;  %v74_v2 = vld [vmem:[%s10403_s24 + $0x8] sm:$0xff]  ;;  %v75_v3 = vld [vmem:[%s10403_s24 + $0x10] sm:$0xff]  ;;  %s10417_s26 = sld [smem:[#allocation101_spill]] }
   0x9   :  { %v7357_v5 = vpack.c.bf16 %v74_v2, %v73_v1  ;;  %v76_v6 = vld [vmem:[%s10403_s24 + $0x18] sm:$0xff]  ;;  %v77_v8 = vld [vmem:[%s10403_s24 + $0x20] sm:$0xff]  ;;  %v78_v9 = vld [vmem:[%s10403_s24 + $0x28] sm:$0xff]  ;;  %s10440_s1 = sld [smem:[#allocation102_spill]] }
   0xa   :  { %v7366_v7 = vpack.c.bf16 %v76_v6, %v75_v3  ;;  %v7378_v10 = vpack.c.bf16 %v78_v9, %v77_v8  ;;  %v79_v11 = vld [vmem:[%s10403_s24 + $0x30] sm:$0xff]  ;;  %v80_v12 = vld [vmem:[%s10403_s24 + $0x38] sm:$0xff]  ;;  %v81_v14 = vld [vmem:[%s10403_s24 + $0x40] sm:$0xff] }
   0xb   :  { %10404 = vst [vmem:[#allocation2_spill] sm:$0xff] %v7357_v5  ;;  %6262 = vmatpush3.bf16.msra.mxu0 %v7357_v5  ;;  %6286 = vmatpush3.bf16.msra.mxu1 %v7357_v5  ;;  %v7390_v13 = vpack.c.bf16 %v80_v12, %v79_v11  ;;  %v82_v15 = vld [vmem:[%s10403_s24 + $0x48] sm:$0xff]  ;;  %v83_v17 = vld [vmem:[%s10403_s24 + $0x50] sm:$0xff]  ;;  %v84_v18 = vld [vmem:[%s10403_s24 + $0x58] sm:$0xff] }
   0xc   :  { %10405 = vst [vmem:[#allocation3_spill] sm:$0xff] %v7366_v7  ;;  %6263 = vmatprep.subr.bf16.mxu0 %v10278_v0  ;;  %6287 = vmatprep.subr.bf16.mxu1 %v10278_v0  ;;  %10406 = vst [vmem:[#allocation4_spill] sm:$0xff] %v7378_v10  ;;  %v7402_v16 = vpack.c.bf16 %v82_v15, %v81_v14  ;;  %v7414_v19 = vpack.c.bf16 %v84_v18, %v83_v17  ;;  %v85_v20 = vld [vmem:[%s10403_s24 + $0x60] sm:$0xff]  ;;  %v86_v21 = vld [vmem:[%s10403_s24 + $0x68] sm:$0xff] }
   0xd   :  { %10407 = vst [vmem:[#allocation5_spill] sm:$0xff] %v7390_v13  ;;  %v7426_v22 = vpack.c.bf16 %v86_v21, %v85_v20  ;;  %v87_v23 = vld [vmem:[%s10403_s24 + $0x70] sm:$0xff]  ;;  %v88_v24 = vld [vmem:[%s10403_s24 + $0x78] sm:$0xff]  ;;  %v565_v26 = vld [vmem:[%s10412_s3] sm:$0xff]  ;;  %s10415_s24 = sld [smem:[#allocation99_spill]] }
   0xe   :  { %10408 = vst [vmem:[#allocation6_spill] sm:$0xff] %v7402_v16  ;;  %10409 = vst [vmem:[#allocation7_spill] sm:$0xff] %v7414_v19  ;;  %v7438_v25 = vpack.c.bf16 %v88_v24, %v87_v23  ;;  %v566_v27 = vld [vmem:[%s10412_s3 + $0x8] sm:$0xff]  ;;  %v567_v28 = vld [vmem:[%s10412_s3 + $0x10] sm:$0xff] }
   0xf   :  { %6265 = vmatpush3.bf16.msra.mxu0 %v7366_v7  ;;  %6289 = vmatpush3.bf16.msra.mxu1 %v7366_v7  ;;  %10410 = vst [vmem:[#allocation8_spill] sm:$0xff] %v7426_v22  ;;  %v169_v42 = vld [vmem:[%s10413_s2 + $0x80] sm:$0xff]  ;;  %v170_v43 = vld [vmem:[%s10413_s2 + $0x88] sm:$0xff]  ;;  %v171_v46 = vld [vmem:[%s10413_s2 + $0x90] sm:$0xff] }
  0x10   :  { %6266 = vmatprep.subr.bf16.mxu0 %v10278_v0  ;;  %6290 = vmatprep.subr.bf16.mxu1 %v10278_v0  ;;  %10411 = vst [vmem:[#allocation9_spill] sm:$0xff] %v7438_v25  ;;  %v153_v44 = vld [vmem:[%s10413_s2] sm:$0xff]  ;;  %v154_v45 = vld [vmem:[%s10413_s2 + $0x8] sm:$0xff]  ;;  %v172_v47 = vld [vmem:[%s10413_s2 + $0x98] sm:$0xff] }
  0x11   :  { %287 = vperm.xlu0 %6876, %v169_v42   ;;  %207 = vperm.xlu1 %6877, %v153_v44   ;;  %v155_v48 = vld [vmem:[%s10413_s2 + $0x10] sm:$0xff]  ;;  %v173_v49 = vld [vmem:[%s10413_s2 + $0xa0] sm:$0xff]  ;;  %v156_v50 = vld [vmem:[%s10413_s2 + $0x18] sm:$0xff] }
  0x12   :  { %v157_v51 = vld [vmem:[%s10413_s2 + $0x20] sm:$0xff]  ;;  %v174_v52 = vld [vmem:[%s10413_s2 + $0xa8] sm:$0xff]  ;;  %v175_v54 = vld [vmem:[%s10413_s2 + $0xb0] sm:$0xff] }
  0x13   :  { %6268 = vmatpush3.bf16.msra.mxu0 %v7378_v10  ;;  %6292 = vmatpush3.bf16.msra.mxu1 %v7378_v10  ;;  %v89_v53 = vld [vmem:[%s10414_s27] sm:$0xff]  ;;  %v158_v55 = vld [vmem:[%s10413_s2 + $0x28] sm:$0xff]  ;;  %v159_v56 = vld [vmem:[%s10413_s2 + $0x30] sm:$0xff] }
  0x14   :  { %6269 = vmatprep.subr.bf16.mxu0 %v10278_v0  ;;  %6293 = vmatprep.subr.bf16.mxu1 %v10278_v0  ;;  %v176_v57 = vld [vmem:[%s10413_s2 + $0xb8] sm:$0xff]  ;;  %v177_v58 = vld [vmem:[%s10413_s2 + $0xc0] sm:$0xff]  ;;  %v178_v61 = vld [vmem:[%s10413_s2 + $0xc8] sm:$0xff] }
  0x15   :  { %292 = vperm.xlu0 %6876, %v170_v43   ;;  %212 = vperm.xlu1 %6877, %v154_v45   ;;  %v160_v59 = vld [vmem:[%s10413_s2 + $0x38] sm:$0xff]  ;;  %v161_v60 = vld [vmem:[%s10413_s2 + $0x40] sm:$0xff]  ;;  %v179_v62 = vld [vmem:[%s10413_s2 + $0xd0] sm:$0xff] }
  0x16   :  { %v162_v63 = vld [vmem:[%s10413_s2 + $0x48] sm:$0xff]  ;;  %v163_v1 = vld [vmem:[%s10413_s2 + $0x50] sm:$0xff]  ;;  %v180_v2 = vld [vmem:[%s10413_s2 + $0xd8] sm:$0xff] }
  0x17   :  { %6271 = vmatpush3.bf16.msra.mxu0 %v7390_v13  ;;  %6295 = vmatpush3.bf16.msra.mxu1 %v7390_v13  ;;  %v181_v3 = vld [vmem:[%s10413_s2 + $0xe0] sm:$0xff]  ;;  %v164_v6 = vld [vmem:[%s10413_s2 + $0x58] sm:$0xff]  ;;  %v182_v9 = vld [vmem:[%s10413_s2 + $0xe8] sm:$0xff] }
  0x18   :  { %6272 = vmatprep.subr.bf16.mxu0 %v10278_v0  ;;  %6296 = vmatprep.subr.bf16.mxu1 %v10278_v0  ;;  %v165_v8 = vld [vmem:[%s10413_s2 + $0x60] sm:$0xff]  ;;  %v183_v11 = vld [vmem:[%s10413_s2 + $0xf0] sm:$0xff]  ;;  %v166_v12 = vld [vmem:[%s10413_s2 + $0x68] sm:$0xff] }
  0x19   :  { %297 = vperm.xlu0 %6876, %v171_v46   ;;  %302 = vperm.xlu1 %6877, %v172_v47   ;;  %v167_v14 = vld [vmem:[%s10413_s2 + $0x70] sm:$0xff]  ;;  %v184_v15 = vld [vmem:[%s10413_s2 + $0xf8] sm:$0xff]  ;;  %v185_v17 = vld [vmem:[%s10413_s2 + $0x100] sm:$0xff] }
  0x1a   :  { %v168_v18 = vld [vmem:[%s10413_s2 + $0x78] sm:$0xff]  ;;  %v187_v20 = vld [vmem:[%s10413_s2 + $0x110] sm:$0xff]  ;;  %v186_v21 = vld [vmem:[%s10413_s2 + $0x108] sm:$0xff] }
  0x1b   :  { %6274 = vmatpush3.bf16.msra.mxu0 %v7402_v16  ;;  %6298 = vmatpush3.bf16.msra.mxu1 %v7402_v16  ;;  %v189_v23 = vld [vmem:[%s10413_s2 + $0x120] sm:$0xff]  ;;  %v188_v24 = vld [vmem:[%s10413_s2 + $0x118] sm:$0xff]  ;;  %v203_v41 = vld [vmem:[%s10413_s2 + $0x190] sm:$0xff] }
  0x1c   :  { %6275 = vmatprep.subr.bf16.mxu0 %v10278_v0  ;;  %6299 = vmatprep.subr.bf16.mxu1 %v10278_v0  ;;  %v202_v42 = vld [vmem:[%s10413_s2 + $0x188] sm:$0xff]  ;;  %v465_v43 = vld [vmem:[%s10415_s24] sm:$0xff]  ;;  %v204_v44 = vld [vmem:[%s10413_s2 + $0x198] sm:$0xff] }
  0x1d   :  { %217 = vperm.xlu0 %6876, %v155_v48   ;;  %222 = vperm.xlu1 %6877, %v156_v50   ;;  %v467_v45 = vld [vmem:[%s10415_s24 + $0x10] sm:$0xff]  ;;  %v466_v46 = vld [vmem:[%s10415_s24 + $0x8] sm:$0xff] }
  0x1f   :  { %6277 = vmatpush3.bf16.msra.mxu0 %v7414_v19  ;;  %6301 = vmatpush3.bf16.msra.mxu1 %v7414_v19 }
  0x20   :  { %6278 = vmatprep.subr.bf16.mxu0 %v10278_v0  ;;  %6302 = vmatprep.subr.bf16.mxu1 %v10278_v0 }
  0x21   :  { %307 = vperm.xlu0 %6876, %v173_v49   ;;  %312 = vperm.xlu1 %6877, %v174_v52  }
  0x23   :  { %6280 = vmatpush3.bf16.msra.mxu0 %v7426_v22  ;;  %6304 = vmatpush3.bf16.msra.mxu1 %v7426_v22 }
  0x24   :  { %6281 = vmatprep.subr.bf16.mxu0 %v10278_v0  ;;  %6305 = vmatprep.subr.bf16.mxu1 %v10278_v0 }
  0x25   :  { %227 = vperm.xlu0 %6876, %v157_v51   ;;  %232 = vperm.xlu1 %6877, %v158_v55  }
  0x27   :  { %6283 = vmatpush3.bf16.msra.mxu0 %v7438_v25  ;;  %6307 = vmatpush3.bf16.msra.mxu1 %v7438_v25 }
  0x29   :  { %317 = vperm.xlu0 %6876, %v175_v54   ;;  %322 = vperm.xlu1 %6877, %v176_v57  }
  0x2a   :  { %5305 = vmatmul.mubr.f32.vlgmr.msra.gmra.mrb[0].mxu0 %v565_v26 }
  0x2b   :  { %5307 = vmatprep.mubr.msk.f32.mxu0 %vm7222_vm0, %v10276_v4 }
  0x2d   :  { %237 = vperm.xlu0 %6876, %v159_v56   ;;  %242 = vperm.xlu1 %6877, %v160_v59  }
  0x2e   :  { %5308 = vmatmul.mubr.f32.gmra.mrb[2].mxu0 %v566_v27 }
  0x2f   :  { %5310 = vmatprep.mubr.msk.f32.mxu0 %vm7222_vm0, %v10276_v4 }
  0x31   :  { %327 = vperm.xlu0 %6876, %v177_v58   ;;  %332 = vperm.xlu1 %6877, %v178_v61   ;;  %v4577_v58 = vld [vmem:[%s10416_s25] ss:$0 sm:$0xff] }
  0x32   :  { %5311 = vmatmul.mubr.f32.gmra.mrb[4].mxu0 %v567_v28 }
  0x33   :  { %5360 = vmatprep.mubr.msk.f32.mxu0 %vm758_vm1, %v89_v53 }
  0x35   :  { %247 = vperm.xlu0 %6876, %v161_v60   ;;  %252 = vperm.xlu1 %6877, %v162_v63  }
  0x39   :  { %337 = vperm.xlu0 %6876, %v179_v62   ;;  %342 = vperm.xlu1 %6877, %v180_v2   ;;  %v4578_v62 = vld [vmem:[%s10417_s26] ss:$0 sm:$0xff] }
  0x3d   :  { %257 = vperm.xlu0 %6876, %v163_v1   ;;  %262 = vperm.xlu1 %6877, %v164_v6  }
  0x41   :  { %347 = vperm.xlu0 %6876, %v181_v3   ;;  %352 = vperm.xlu1 %6877, %v182_v9  }
  0x45   :  { %267 = vperm.xlu0 %6876, %v165_v8   ;;  %272 = vperm.xlu1 %6877, %v166_v12   ;;  %v93_v12 = vld [vmem:[%s10414_s27 + $0x20] sm:$0xff] }
  0x49   :  { %357 = vperm.xlu0 %6876, %v183_v11   ;;  %362 = vperm.xlu1 %6877, %v184_v15   ;;  %v91_v11 = vld [vmem:[%s10414_s27 + $0x10] sm:$0xff] }
  0x4a   :  { %v95_v15 = vld [vmem:[%s10414_s27 + $0x30] sm:$0xff] }
  0x4d   :  { %277 = vperm.xlu0 %6876, %v167_v14   ;;  %282 = vperm.xlu1 %6877, %v168_v18   ;;  %v94_v14 = vld [vmem:[%s10414_s27 + $0x28] sm:$0xff]  ;;  %v97_v18 = vld [vmem:[%s10414_s27 + $0x40] sm:$0xff] }
  0x51   :  { %367 = vperm.xlu0 %6876, %v185_v17   ;;  %372 = vperm.xlu1 %6877, %v186_v21   ;;  %v96_v17 = vld [vmem:[%s10414_s27 + $0x38] sm:$0xff]  ;;  %v99_v21 = vld [vmem:[%s10414_s27 + $0x50] sm:$0xff] }
  0x55   :  { %377 = vperm.xlu0 %6876, %v187_v20   ;;  %382 = vperm.xlu1 %6877, %v188_v24   ;;  %v98_v20 = vld [vmem:[%s10414_s27 + $0x48] sm:$0xff]  ;;  %v101_v24 = vld [vmem:[%s10414_s27 + $0x60] sm:$0xff] }
  0x59   :  { %387 = vperm.xlu0 %6876, %v189_v23   ;;  %v100_v23 = vld [vmem:[%s10414_s27 + $0x58] sm:$0xff] }
  0xfd   :  { %v634_v29 = vpop.f32.mrb[0].mxu0 }
  0xfe   :  { %v7458_v30 = vsub.f32 %v565_v26, %v634_v29  ;;  %v5306_v31 = vpop.f32.mrb[1].mxu0  ;;  %v191_v26 = vld [vmem:[%s10413_s2 + $0x130] sm:$0xff]  ;;  %v192_v29 = vld [vmem:[%s10413_s2 + $0x138] sm:$0xff] }
  0xff   :  { %397 = vperm.xlu0 %6876, %v191_v26   ;;  %v195_v31 = vld [vmem:[%s10413_s2 + $0x150] sm:$0xff]  ;;  %v102_v26 = vld [vmem:[%s10414_s27 + $0x68] sm:$0xff] }
 0x100   :  { %v651_v32 = vmul.f32 %v7458_v30, %v7458_v30 }
 0x101   :  { %v639_v33 = vpop.f32.mrb[2].mxu0 }
 0x102   :  { %v7462_v34 = vsub.f32 %v566_v27, %v639_v33  ;;  %v5309_v35 = vpop.f32.mrb[3].mxu0  ;;  %5346 = vmatmul.mubr.f32.vlgmr.msra.gmra.mrb[0].mxu1 %v651_v32  ;;  %v190_v27 = vld [vmem:[%s10413_s2 + $0x128] sm:$0xff]  ;;  %v197_v33 = vld [vmem:[%s10413_s2 + $0x160] sm:$0xff] }
 0x103   :  { %5348 = vmatprep.mubr.msk.f32.mxu1 %vm7222_vm0, %v10276_v4  ;;  %392 = vperm.xlu1 %6877, %v190_v27   ;;  %v194_v32 = vld [vmem:[%s10413_s2 + $0x148] sm:$0xff]  ;;  %v196_v35 = vld [vmem:[%s10413_s2 + $0x158] sm:$0xff]  ;;  %v103_v27 = vld [vmem:[%s10414_s27 + $0x70] sm:$0xff] }
 0x104   :  { %v652_v36 = vmul.f32 %v7462_v34, %v7462_v34 }
 0x105   :  { %v644_v37 = vpop.f32.mrb[4].mxu0 }
 0x106   :  { %v7468_v38 = vsub.f32 %v567_v28, %v644_v37  ;;  %5349 = vmatmul.mubr.f32.gmra.mrb[2].mxu1 %v652_v36  ;;  %v5312_v39 = vpop.f32.mrb[5].mxu0  ;;  %v193_v28 = vld [vmem:[%s10413_s2 + $0x140] sm:$0xff]  ;;  %v199_v36 = vld [vmem:[%s10413_s2 + $0x170] sm:$0xff]  ;;  %v198_v37 = vld [vmem:[%s10413_s2 + $0x168] sm:$0xff] }
 0x107   :  { %5351 = vmatprep.mubr.msk.f32.mxu1 %vm7222_vm0, %v10276_v4  ;;  %407 = vperm.xlu0 %6876, %v193_v28   ;;  %v201_v39 = vld [vmem:[%s10413_s2 + $0x180] sm:$0xff]  ;;  %v104_v28 = vld [vmem:[%s10414_s27 + $0x78] sm:$0xff] }
 0x108   :  { %v653_v40 = vmul.f32 %v7468_v38, %v7468_v38  ;;  %402 = vperm.xlu1 %6877, %v192_v29   ;;  %v105_v29 = vld [vmem:[%s10414_s27 + $0x80] sm:$0xff] }
 0x10a   :  { %5352 = vmatmul.mubr.f32.gmra.mrb[4].mxu1 %v653_v40  ;;  %v200_v40 = vld [vmem:[%s10413_s2 + $0x178] sm:$0xff] }
 0x10b   :  { %417 = vperm.xlu0 %6876, %v195_v31   ;;  %v106_v31 = vld [vmem:[%s10414_s27 + $0x88] sm:$0xff] }
 0x10c   :  { %412 = vperm.xlu1 %6877, %v194_v32   ;;  %v107_v32 = vld [vmem:[%s10414_s27 + $0x90] sm:$0xff] }
 0x10f   :  { %427 = vperm.xlu0 %6876, %v197_v33   ;;  %v108_v33 = vld [vmem:[%s10414_s27 + $0x98] sm:$0xff] }
 0x110   :  { %422 = vperm.xlu1 %6877, %v196_v35   ;;  %v109_v35 = vld [vmem:[%s10414_s27 + $0xa0] sm:$0xff] }
 0x113   :  { %437 = vperm.xlu0 %6876, %v199_v36   ;;  %v110_v36 = vld [vmem:[%s10414_s27 + $0xa8] sm:$0xff] }
 0x114   :  { %432 = vperm.xlu1 %6877, %v198_v37   ;;  %v111_v37 = vld [vmem:[%s10414_s27 + $0xb0] sm:$0xff] }
 0x117   :  { %447 = vperm.xlu0 %6876, %v201_v39   ;;  %v112_v39 = vld [vmem:[%s10414_s27 + $0xb8] sm:$0xff] }
 0x118   :  { %442 = vperm.xlu1 %6877, %v200_v40   ;;  %v113_v40 = vld [vmem:[%s10414_s27 + $0xc0] sm:$0xff] }
 0x11b   :  { %457 = vperm.xlu0 %6876, %v203_v41   ;;  %v114_v41 = vld [vmem:[%s10414_s27 + $0xc8] sm:$0xff] }
 0x11c   :  { %452 = vperm.xlu1 %6877, %v202_v42   ;;  %v115_v42 = vld [vmem:[%s10414_s27 + $0xd0] sm:$0xff] }
 0x11f   :  { %470 = vperm.xlu0 %6876, %v465_v43   ;;  %v116_v43 = vld [vmem:[%s10414_s27 + $0xd8] sm:$0xff] }
 0x120   :  { %462 = vperm.xlu1 %6877, %v204_v44   ;;  %v117_v44 = vld [vmem:[%s10414_s27 + $0xe0] sm:$0xff] }
 0x123   :  { %480 = vperm.xlu0 %6876, %v467_v45   ;;  %v118_v45 = vld [vmem:[%s10414_s27 + $0xe8] sm:$0xff] }
 0x124   :  { %475 = vperm.xlu1 %6877, %v466_v46   ;;  %v119_v46 = vld [vmem:[%s10414_s27 + $0xf0] sm:$0xff] }
 0x1d5   :  { %v720_v47 = vpop.f32.mrb[0].mxu1 }
 0x1d6   :  { %v721_v48 = vadd.f32 1e-05, %v720_v47  ;;  %v5347_v49 = vpop.f32.mrb[1].mxu1  ;;  %v120_v47 = vld [vmem:[%s10414_s27 + $0xf8] sm:$0xff] }
 0x1d7   :  { %v122_v49 = vld [vmem:[%s10414_s27 + $0x108] sm:$0xff] }
 0x1d8   :  { %6878 = vrsqrt.f32 %v721_v48  ;;  %v121_v48 = vld [vmem:[%s10414_s27 + $0x100] sm:$0xff] }
 0x1d9   :  { %v725_v50 = vpop.f32.mrb[2].mxu1 }
 0x1da   :  { %v726_v51 = vadd.f32 1e-05, %v725_v50  ;;  %v5350_v52 = vpop.f32.mrb[3].mxu1  ;;  %v123_v50 = vld [vmem:[%s10414_s27 + $0x110] sm:$0xff] }
 0x1db   :  { %v125_v52 = vld [vmem:[%s10414_s27 + $0x120] sm:$0xff] }
 0x1dc   :  { %6880 = vrsqrt.f32 %v726_v51  ;;  %v124_v51 = vld [vmem:[%s10414_s27 + $0x118] sm:$0xff] }
 0x1dd   :  { %v730_v53 = vpop.f32.mrb[4].mxu1 }
 0x1de   :  { %v731_v54 = vadd.f32 1e-05, %v730_v53  ;;  %v5353_v55 = vpop.f32.mrb[5].mxu1  ;;  %v126_v53 = vld [vmem:[%s10414_s27 + $0x128] sm:$0xff] }
 0x1df   :  { %v128_v55 = vld [vmem:[%s10414_s27 + $0x138] sm:$0xff] }
 0x1e0   :  { %6882 = vrsqrt.f32 %v731_v54  ;;  %v127_v54 = vld [vmem:[%s10414_s27 + $0x130] sm:$0xff] }
 0x1e2   :  { %v6879_v56 = vpop.eup %6878 }
 0x1e3   :  { %v737_v57 = vmul.f32 %v6879_v56, %v7458_v30  ;;  %v129_v56 = vld [vmem:[%s10414_s27 + $0x140] sm:$0xff] }
 0x1e5   :  { %v746_v61 = vmul.f32 %v4577_v58, %v737_v57  ;;  %v130_v57 = vld [vmem:[%s10414_s27 + $0x148] sm:$0xff] }
 0x1e6   :  { %v6881_v59 = vpop.eup %6880 }
 0x1e7   :  { %v738_v60 = vmul.f32 %v6881_v59, %v7462_v34  ;;  %v755_v2 = vadd.f32 %v4578_v62, %v746_v61  ;;  %v90_v34 = vld [vmem:[%s10414_s27 + $0x8] sm:$0xff]  ;;  %v132_v59 = vld [vmem:[%s10414_s27 + $0x158] sm:$0xff] }
 0x1e8   :  { %v134_v61 = vld [vmem:[%s10414_s27 + $0x168] sm:$0xff] }
 0x1e9   :  { %v747_v63 = vmul.f32 %v4577_v58, %v738_v60  ;;  %v133_v60 = vld [vmem:[%s10414_s27 + $0x160] sm:$0xff] }
 0x1ea   :  { %v6883_v1 = vpop.eup %6882 }
 0x1eb   :  { %v756_v3 = vadd.f32 %v4578_v62, %v747_v63  ;;  %v739_v6 = vmul.f32 %v6883_v1, %v7468_v38  ;;  %v92_v38 = vld [vmem:[%s10414_s27 + $0x18] sm:$0xff]  ;;  %v137_v1 = vld [vmem:[%s10414_s27 + $0x180] sm:$0xff] }
 0x1ec   :  { %v136_v63 = vld [vmem:[%s10414_s27 + $0x178] sm:$0xff] }
 0x1ed   :  { %v6308_v8 = vpack.c.bf16 %v756_v3, %v755_v2  ;;  %v748_v30 = vmul.f32 %v4577_v58, %v739_v6  ;;  %v131_v58 = vld [vmem:[%s10414_s27 + $0x150] sm:$0xff]  ;;  %v138_v2 = vld [vmem:[%s10414_s27 + $0x188] sm:$0xff]  ;;  %v140_v6 = vld [vmem:[%s10414_s27 + $0x198] sm:$0xff] }
 0x1ee   :  { %v139_v3 = vld [vmem:[%s10414_s27 + $0x190] sm:$0xff] }
 0x1ef   :  { %6309 = vmatprep.subr.bf16.mxu0 %v6308_v8  ;;  %v757_v9 = vadd.f32 %v4578_v62, %v748_v30  ;;  %v135_v62 = vld [vmem:[%s10414_s27 + $0x170] sm:$0xff]  ;;  %v7877_v30 = vpop.permute.xlu0 %287 }
 0x1f0   :  { %6311 = vmatpush3.bf16.msra.mxu0 %v6308_v8  ;;  %v7875_v8 = vpop.permute.xlu1 %207  ;;  %10419 = vst [vmem:[#allocation11_spill] sm:$0xff] %v7877_v30 }
 0x1f1   :  { %5358 = vmatprep.subr.mxu0 %v757_v9  ;;  %10418 = vst [vmem:[#allocation10_spill] sm:$0xff] %v7875_v8 }
 0x1f4   :  { %5359 = vmatpush3.msra.mxu0 %v757_v9  ;;  %v7879_v9 = vpop.permute.xlu1 %212 }
 0x1f5   :  { %5361 = vmatmul.mubr.msk.f32.vlgmr.msra.gmra.mrb[6].mxu0 %vm758_vm1, %v90_v34  ;;  %6398 = vmatprep.subr.bf16.mxu0 %v10278_v0  ;;  %10420 = vst [vmem:[#allocation12_spill] sm:$0xff] %v7879_v9  ;;  %v7881_v34 = vpop.permute.xlu0 %292 }
 0x1f6   :  { %5363 = vmatprep.mubr.msk.f32.mxu0 %vm758_vm1, %v91_v11  ;;  %6400 = vmatpush3.bf16.msra.mxu0 %v7357_v5  ;;  %10421 = vst [vmem:[#allocation13_spill] sm:$0xff] %v7881_v34 }
 0x1f7   :  { %6401 = vmatprep.subr.bf16.mxu0 %v10278_v0 }
 0x1f8   :  { %v7883_v11 = vpop.permute.xlu1 %302 }
 0x1f9   :  { %5364 = vmatmul.mubr.msk.f32.gmra.mrb[8].mxu0 %vm758_vm1, %v92_v38  ;;  %10422 = vst [vmem:[#allocation14_spill] sm:$0xff] %v7883_v11  ;;  %v7885_v38 = vpop.permute.xlu0 %297 }
 0x1fa   :  { %5366 = vmatprep.mubr.msk.f32.mxu0 %vm758_vm1, %v93_v12  ;;  %6403 = vmatpush3.bf16.msra.mxu0 %v7366_v7  ;;  %10423 = vst [vmem:[#allocation15_spill] sm:$0xff] %v7885_v38 }
 0x1fb   :  { %6404 = vmatprep.subr.bf16.mxu0 %v10278_v0 }
 0x1fc   :  { %v7887_v12 = vpop.permute.xlu1 %222 }
 0x1fd   :  { %5367 = vmatmul.mubr.msk.f32.gmra.mrb[10].mxu0 %vm758_vm1, %v94_v14  ;;  %10424 = vst [vmem:[#allocation16_spill] sm:$0xff] %v7887_v12  ;;  %v7889_v14 = vpop.permute.xlu0 %217 }
 0x1fe   :  { %5369 = vmatprep.mubr.msk.f32.mxu0 %vm758_vm1, %v95_v15  ;;  %6406 = vmatpush3.bf16.msra.mxu0 %v7378_v10  ;;  %10425 = vst [vmem:[#allocation17_spill] sm:$0xff] %v7889_v14 }
 0x1ff   :  { %6407 = vmatprep.subr.bf16.mxu0 %v10278_v0 }
 0x200   :  { %v7891_v15 = vpop.permute.xlu1 %312 }
 0x201   :  { %5370 = vmatmul.mubr.msk.f32.gmra.mrb[12].mxu0 %vm758_vm1, %v96_v17  ;;  %10426 = vst [vmem:[#allocation18_spill] sm:$0xff] %v7891_v15  ;;  %v7893_v17 = vpop.permute.xlu0 %307 }
 0x202   :  { %5372 = vmatprep.mubr.msk.f32.mxu0 %vm758_vm1, %v97_v18  ;;  %6409 = vmatpush3.bf16.msra.mxu0 %v7390_v13  ;;  %10427 = vst [vmem:[#allocation19_spill] sm:$0xff] %v7893_v17 }
 0x203   :  { %6410 = vmatprep.subr.bf16.mxu0 %v10278_v0 }
 0x204   :  { %v7895_v18 = vpop.permute.xlu1 %232 }
 0x205   :  { %5373 = vmatmul.mubr.msk.f32.gmra.mrb[14].mxu0 %vm758_vm1, %v98_v20  ;;  %10428 = vst [vmem:[#allocation20_spill] sm:$0xff] %v7895_v18  ;;  %v7897_v20 = vpop.permute.xlu0 %227 }
 0x206   :  { %5375 = vmatprep.mubr.msk.f32.mxu0 %vm758_vm1, %v99_v21  ;;  %6412 = vmatpush3.bf16.msra.mxu0 %v7402_v16  ;;  %10429 = vst [vmem:[#allocation21_spill] sm:$0xff] %v7897_v20 }
 0x207   :  { %6413 = vmatprep.subr.bf16.mxu0 %v10278_v0 }
 0x208   :  { %v7899_v21 = vpop.permute.xlu1 %322 }
 0x209   :  { %5376 = vmatmul.mubr.msk.f32.gmra.mrb[16].mxu0 %vm758_vm1, %v100_v23  ;;  %10430 = vst [vmem:[#allocation22_spill] sm:$0xff] %v7899_v21  ;;  %v7901_v23 = vpop.permute.xlu0 %317 }
 0x20a   :  { %5378 = vmatprep.mubr.msk.f32.mxu0 %vm758_vm1, %v101_v24  ;;  %6415 = vmatpush3.bf16.msra.mxu0 %v7414_v19  ;;  %10431 = vst [vmem:[#allocation23_spill] sm:$0xff] %v7901_v23 }
 0x20b   :  { %6416 = vmatprep.subr.bf16.mxu0 %v10278_v0 }
 0x20c   :  { %v7903_v24 = vpop.permute.xlu1 %242 }
 0x20d   :  { %5379 = vmatmul.mubr.msk.f32.gmra.mrb[18].mxu0 %vm758_vm1, %v102_v26  ;;  %10432 = vst [vmem:[#allocation24_spill] sm:$0xff] %v7903_v24  ;;  %v7905_v26 = vpop.permute.xlu0 %237 }
 0x20e   :  { %5381 = vmatprep.mubr.msk.f32.mxu0 %vm758_vm1, %v103_v27  ;;  %6418 = vmatpush3.bf16.msra.mxu0 %v7426_v22  ;;  %10433 = vst [vmem:[#allocation25_spill] sm:$0xff] %v7905_v26 }
 0x20f   :  { %6419 = vmatprep.subr.bf16.mxu0 %v10278_v0 }
 0x210   :  { %v7907_v27 = vpop.permute.xlu1 %332 }
 0x211   :  { %5382 = vmatmul.mubr.msk.f32.gmra.mrb[20].mxu0 %vm758_vm1, %v104_v28  ;;  %10434 = vst [vmem:[#allocation26_spill] sm:$0xff] %v7907_v27  ;;  %v7909_v28 = vpop.permute.xlu0 %327 }
 0x212   :  { %5384 = vmatprep.mubr.msk.f32.mxu0 %vm758_vm1, %v105_v29  ;;  %6421 = vmatpush3.bf16.msra.mxu0 %v7438_v25  ;;  %10435 = vst [vmem:[#allocation27_spill] sm:$0xff] %v7909_v28 }
 0x213   :  { %6446 = vmatprep.subr.bf16.mxu0 %v10278_v0 }
 0x214   :  { %v7911_v29 = vpop.permute.xlu1 %252 }
 0x215   :  { %5385 = vmatmul.mubr.msk.f32.gmra.mrb[22].mxu0 %vm758_vm1, %v106_v31  ;;  %10436 = vst [vmem:[#allocation28_spill] sm:$0xff] %v7911_v29  ;;  %v7913_v31 = vpop.permute.xlu0 %247 }
 0x216   :  { %5387 = vmatprep.mubr.msk.f32.mxu0 %vm758_vm1, %v107_v32  ;;  %10437 = vst [vmem:[#allocation29_spill] sm:$0xff] %v7913_v31 }
 0x218   :  { %v7915_v32 = vpop.permute.xlu1 %342 }
 0x219   :  { %5388 = vmatmul.mubr.msk.f32.gmra.mrb[24].mxu0 %vm758_vm1, %v108_v33  ;;  %10438 = vst [vmem:[#allocation30_spill] sm:$0xff] %v7915_v32  ;;  %v7917_v33 = vpop.permute.xlu0 %337 }
 0x21a   :  { %5390 = vmatprep.mubr.msk.f32.mxu0 %vm758_vm1, %v109_v35  ;;  %10439 = vst [vmem:[#allocation31_spill] sm:$0xff] %v7917_v33 }
 0x21d   :  { %5391 = vmatmul.mubr.msk.f32.gmra.mrb[26].mxu0 %vm758_vm1, %v110_v36  ;;  %v142_v36 = vld [vmem:[%s10440_s1 + $0x8] sm:$0xff] }
 0x21e   :  { %5393 = vmatprep.mubr.msk.f32.mxu0 %vm758_vm1, %v111_v37  ;;  %1782 = vmatprep.mubr.f32.mxu1 %v142_v36 }
 0x221   :  { %5394 = vmatmul.mubr.msk.f32.gmra.mrb[28].mxu0 %vm758_vm1, %v112_v39 }
 0x222   :  { %5396 = vmatprep.mubr.msk.f32.mxu0 %vm758_vm1, %v113_v40 }
 0x225   :  { %5397 = vmatmul.mubr.msk.f32.gmra.mrb[30].mxu0 %vm758_vm1, %v114_v41 }
 0x226   :  { %5399 = vmatprep.mubr.msk.f32.mxu0 %vm758_vm1, %v115_v42  ;;  %v7924_v42 = vpop.permute.xlu1 %262 }
 0x227   :  { %10441 = vst [vmem:[#allocation32_spill] sm:$0xff] %v7924_v42 }
 0x229   :  { %5400 = vmatmul.mubr.msk.f32.gmra.mrb[32].mxu0 %vm758_vm1, %v116_v43 }
 0x22a   :  { %5402 = vmatprep.mubr.msk.f32.mxu0 %vm758_vm1, %v117_v44 }
 0x22d   :  { %5403 = vmatmul.mubr.msk.f32.gmra.mrb[34].mxu0 %vm758_vm1, %v118_v45  ;;  %v7926_v45 = vpop.permute.xlu0 %257 }
 0x22e   :  { %5405 = vmatprep.mubr.msk.f32.mxu0 %vm758_vm1, %v119_v46  ;;  %10442 = vst [vmem:[#allocation33_spill] sm:$0xff] %v7926_v45 }
 0x231   :  { %5406 = vmatmul.mubr.msk.f32.gmra.mrb[36].mxu0 %vm758_vm1, %v120_v47 }
 0x232   :  { %5408 = vmatprep.mubr.msk.f32.mxu0 %vm758_vm1, %v121_v48 }
 0x235   :  { %5409 = vmatmul.mubr.msk.f32.gmra.mrb[38].mxu0 %vm758_vm1, %v122_v49 }
 0x236   :  { %5411 = vmatprep.mubr.msk.f32.mxu0 %vm758_vm1, %v123_v50 }
 0x239   :  { %5412 = vmatmul.mubr.msk.f32.gmra.mrb[40].mxu0 %vm758_vm1, %v124_v51 }
 0x23a   :  { %5414 = vmatprep.mubr.msk.f32.mxu0 %vm758_vm1, %v125_v52 }
 0x23d   :  { %5415 = vmatmul.mubr.msk.f32.gmra.mrb[42].mxu0 %vm758_vm1, %v126_v53 }
 0x23e   :  { %5417 = vmatprep.mubr.msk.f32.mxu0 %vm758_vm1, %v127_v54 }
 0x241   :  { %5418 = vmatmul.mubr.msk.f32.gmra.mrb[44].mxu0 %vm758_vm1, %v128_v55 }
 0x242   :  { %5420 = vmatprep.mubr.msk.f32.mxu0 %vm758_vm1, %v129_v56 }
 0x245   :  { %5421 = vmatmul.mubr.msk.f32.gmra.mrb[46].mxu0 %vm758_vm1, %v130_v57 }
 0x246   :  { %5423 = vmatprep.mubr.msk.f32.mxu0 %vm758_vm1, %v131_v58 }
 0x249   :  { %5424 = vmatmul.mubr.msk.f32.gmra.mrb[48].mxu0 %vm758_vm1, %v132_v59 }
 0x24a   :  { %5426 = vmatprep.mubr.msk.f32.mxu0 %vm758_vm1, %v133_v60 }
 0x24d   :  { %5427 = vmatmul.mubr.msk.f32.gmra.mrb[50].mxu0 %vm758_vm1, %v134_v61 }
 0x24e   :  { %5429 = vmatprep.mubr.msk.f32.mxu0 %vm758_vm1, %v135_v62 }
 0x251   :  { %5430 = vmatmul.mubr.msk.f32.gmra.mrb[52].mxu0 %vm758_vm1, %v136_v63  ;;  %v7937_v63 = vpop.permute.xlu1 %352 }
 0x252   :  { %5432 = vmatprep.mubr.msk.f32.mxu0 %vm758_vm1, %v137_v1  ;;  %10443 = vst [vmem:[#allocation34_spill] sm:$0xff] %v7937_v63 }
 0x255   :  { %5433 = vmatmul.mubr.msk.f32.gmra.mrb[54].mxu0 %vm758_vm1, %v138_v2 }
 0x256   :  { %5435 = vmatprep.mubr.msk.f32.mxu0 %vm758_vm1, %v139_v3 }
 0x259   :  { %5436 = vmatmul.mubr.msk.f32.gmra.mrb[56].mxu0 %vm758_vm1, %v140_v6 }
 0x25a   :  { %5511 = vmatprep.mubr.msk.f32.mxu0 %vm7222_vm0, %v10276_v4 }
 0x2c8   :  { %v5362_v35 = vpop.f32.mrb[6].mxu0 }
 0x2c9   :  { %v987_v37 = vadd.f32 %v5362_v35, %v7879_v9  ;;  %v981_v39 = vpop.f32.mrb[7].mxu0  ;;  %v7942_v35 = vpop.permute.xlu0 %347 }
 0x2ca   :  { %v982_v40 = vadd.f32 %v981_v39, %v7875_v8  ;;  %10444 = vst [vmem:[#allocation35_spill] sm:$0xff] %v7942_v35 }
 0x2cb   :  { %v1293_v41 = vmul.f32 0.044715, %v987_v37  ;;  %v7932_v57 = vmul.f32 0.5, %v987_v37 }
 0x2cc   :  { %v1292_v43 = vmul.f32 0.044715, %v982_v40  ;;  %v5365_v44 = vpop.f32.mrb[8].mxu0  ;;  %v7930_v56 = vmul.f32 0.5, %v982_v40 }
 0x2cd   :  { %v1345_v46 = vmul.f32 %v1293_v41, %v987_v37  ;;  %v997_v47 = vadd.f32 %v5365_v44, %v7887_v12  ;;  %v991_v48 = vpop.f32.mrb[9].mxu0 }
 0x2ce   :  { %v1344_v49 = vmul.f32 %v1292_v43, %v982_v40  ;;  %v992_v50 = vadd.f32 %v991_v48, %v7889_v14 }
 0x2cf   :  { %v1397_v51 = vmul.f32 %v1345_v46, %v987_v37  ;;  %v1295_v52 = vmul.f32 0.044715, %v997_v47  ;;  %v7935_v62 = vmul.f32 0.5, %v997_v47 }
 0x2d0   :  { %v1396_v53 = vmul.f32 %v1344_v49, %v982_v40  ;;  %v1294_v54 = vmul.f32 0.044715, %v992_v50  ;;  %v5368_v55 = vpop.f32.mrb[10].mxu0  ;;  %v7940_v6 = vmul.f32 0.5, %v992_v50 }
 0x2d1   :  { %v1449_v58 = vadd.f32 %v1397_v51, %v987_v37  ;;  %v1347_v59 = vmul.f32 %v1295_v52, %v997_v47  ;;  %v1007_v60 = vadd.f32 %v5368_v55, %v7895_v18  ;;  %v1001_v61 = vpop.f32.mrb[11].mxu0 }
 0x2d2   :  { %v1448_v1 = vadd.f32 %v1396_v53, %v982_v40  ;;  %v1346_v2 = vmul.f32 %v1294_v54, %v992_v50  ;;  %v1002_v3 = vadd.f32 %v1001_v61, %v7897_v20 }
 0x2d3   :  { %v1501_v36 = vmul.f32 0.7978846, %v1449_v58  ;;  %v1399_v39 = vmul.f32 %v1347_v59, %v997_v47  ;;  %v1297_v41 = vmul.f32 0.044715, %v1007_v60  ;;  %v7944_v37 = vmul.f32 0.5, %v1007_v60 }
 0x2d4   :  { %v1500_v43 = vmul.f32 0.7978846, %v1448_v1  ;;  %v1398_v44 = vmul.f32 %v1346_v2, %v992_v50  ;;  %v1296_v46 = vmul.f32 0.044715, %v1002_v3  ;;  %v5371_v48 = vpop.f32.mrb[12].mxu0  ;;  %v7946_v49 = vmul.f32 0.5, %v1002_v3  ;;  %v7952_v2 = vpop.permute.xlu1 %272 }
 0x2d5   :  { %6884 = vtanh.f32 %v1501_v36  ;;  %v1451_v40 = vadd.f32 %v1399_v39, %v997_v47  ;;  %v1349_v51 = vmul.f32 %v1297_v41, %v1007_v60  ;;  %v1017_v52 = vadd.f32 %v5371_v48, %v7903_v24  ;;  %v1011_v53 = vpop.f32.mrb[13].mxu0  ;;  %10445 = vst [vmem:[#allocation36_spill] sm:$0xff] %v7952_v2  ;;  %v7956_v41 = vpop.permute.xlu0 %267 }
 0x2d6   :  { %6886 = vtanh.f32 %v1500_v43  ;;  %v1450_v54 = vadd.f32 %v1398_v44, %v992_v50  ;;  %v1348_v55 = vmul.f32 %v1296_v46, %v1002_v3  ;;  %v1012_v58 = vadd.f32 %v1011_v53, %v7905_v26  ;;  %10446 = vst [vmem:[#allocation37_spill] sm:$0xff] %v7956_v41 }
 0x2d7   :  { %v1503_v59 = vmul.f32 0.7978846, %v1451_v40  ;;  %v1401_v61 = vmul.f32 %v1349_v51, %v1007_v60  ;;  %v1299_v4 = vmul.f32 0.044715, %v1017_v52  ;;  %v7950_v1 = vmul.f32 0.5, %v1017_v52 }
 0x2d8   :  { %v1502_v0 = vmul.f32 0.7978846, %v1450_v54  ;;  %v1400_v20 = vmul.f32 %v1348_v55, %v1002_v3  ;;  %v1298_v36 = vmul.f32 0.044715, %v1012_v58  ;;  %v5374_v47 = vpop.f32.mrb[14].mxu0  ;;  %v7954_v39 = vmul.f32 0.5, %v1012_v58 }
 0x2d9   :  { %6888 = vtanh.f32 %v1503_v59  ;;  %v1453_v50 = vadd.f32 %v1401_v61, %v1007_v60  ;;  %v1351_v43 = vmul.f32 %v1299_v4, %v1017_v52  ;;  %v1027_v44 = vadd.f32 %v5374_v47, %v7911_v29  ;;  %v1021_v46 = vpop.f32.mrb[15].mxu0 }
 0x2da   :  { %6890 = vtanh.f32 %v1502_v0  ;;  %v1452_v48 = vadd.f32 %v1400_v20, %v1002_v3  ;;  %v1350_v40 = vmul.f32 %v1298_v36, %v1012_v58  ;;  %v1022_v51 = vadd.f32 %v1021_v46, %v7913_v31  ;;  %v7965_v3 = vpop.permute.xlu1 %362 }
 0x2db   :  { %v1505_v53 = vmul.f32 0.7978846, %v1453_v50  ;;  %v1403_v54 = vmul.f32 %v1351_v43, %v1017_v52  ;;  %v1301_v55 = vmul.f32 0.044715, %v1027_v44  ;;  %v7960_v26 = vmul.f32 0.5, %v1027_v44  ;;  %v7970_v43 = vpop.permute.xlu0 %357 }
 0x2dc   :  { %v1504_v24 = vmul.f32 0.7978846, %v1452_v48  ;;  %v1402_v18 = vmul.f32 %v1350_v40, %v1012_v58  ;;  %v1300_v14 = vmul.f32 0.044715, %v1022_v51  ;;  %v5377_v12 = vpop.f32.mrb[16].mxu0  ;;  %v7962_v59 = vmul.f32 0.5, %v1022_v51 }
 0x2dd   :  { %6892 = vtanh.f32 %v1505_v53  ;;  %v1455_v4 = vadd.f32 %v1403_v54, %v1017_v52  ;;  %v1353_v60 = vmul.f32 %v1301_v55, %v1027_v44  ;;  %v1037_v0 = vadd.f32 %v5377_v12, %v7924_v42  ;;  %v1031_v20 = vpop.f32.mrb[17].mxu0 }
 0x2de   :  { %6894 = vtanh.f32 %v1504_v24  ;;  %v1454_v61 = vadd.f32 %v1402_v18, %v1012_v58  ;;  %v1352_v36 = vmul.f32 %v1300_v14, %v1022_v51  ;;  %v7968_v47 = vadd.f32 %v1031_v20, %v7926_v45 }
 0x2df   :  { %v6885_v50 = vpop.eup %6884  ;;  %v1507_v46 = vmul.f32 0.7978846, %v1455_v4  ;;  %v1405_v48 = vmul.f32 %v1353_v60, %v1027_v44  ;;  %v1303_v40 = vmul.f32 0.044715, %v1037_v0  ;;  %v7972_v53 = vmul.f32 0.5, %v1037_v0 }
 0x2e0   :  { %v6887_v52 = vpop.eup %6886  ;;  %v1506_v54 = vmul.f32 0.7978846, %v1454_v61  ;;  %v1404_v12 = vmul.f32 %v1352_v36, %v1022_v51  ;;  %v1302_v55 = vmul.f32 0.044715, %v7968_v47  ;;  %v5380_v42 = vpop.f32.mrb[18].mxu0  ;;  %v1605_v24 = vadd.f32 1.0, %v6885_v50 }
 0x2e1   :  { %6896 = vtanh.f32 %v1507_v46  ;;  %v1457_v14 = vadd.f32 %v1405_v48, %v1027_v44  ;;  %v1355_v18 = vmul.f32 %v1303_v40, %v1037_v0  ;;  %v7976_v58 = vadd.f32 %v5380_v42, %v7952_v2  ;;  %v1041_v20 = vpop.f32.mrb[19].mxu0  ;;  %v7985_v48 = vpop.permute.xlu1 %282 }
 0x2e2   :  { %6898 = vtanh.f32 %v1506_v54  ;;  %v1456_v4 = vadd.f32 %v1404_v12, %v1022_v51  ;;  %v1354_v60 = vmul.f32 %v1302_v55, %v7968_v47  ;;  %v7980_v45 = vadd.f32 %v1041_v20, %v7956_v41  ;;  %10447 = vst [vmem:[#allocation38_spill] sm:$0xff] %v7985_v48  ;;  %v7992_v55 = vpop.permute.xlu0 %277 }
 0x2e3   :  { %v7982_v61 = vpop.eup %6888  ;;  %v1509_v36 = vmul.f32 0.7978846, %v1457_v14  ;;  %v1407_v31 = vmul.f32 %v1355_v18, %v1037_v0  ;;  %v1305_v50 = vmul.f32 0.044715, %v7976_v58  ;;  %v1604_v46 = vadd.f32 1.0, %v6887_v52  ;;  %10448 = vst [vmem:[#allocation39_spill] sm:$0xff] %v7992_v55 }
 0x2e4   :  { %v6891_v44 = vpop.eup %6890  ;;  %v1508_v42 = vmul.f32 0.7978846, %v1456_v4  ;;  %v1406_v40 = vmul.f32 %v1354_v60, %v7968_v47  ;;  %v1304_v51 = vmul.f32 0.044715, %v7980_v45  ;;  %v5383_v54 = vpop.f32.mrb[20].mxu0  ;;  %v7990_v12 = vmul.f32 %v1605_v24, %v7932_v57 }
 0x2e5   :  { %6900 = vtanh.f32 %v1509_v36  ;;  %v1459_v14 = vadd.f32 %v1407_v31, %v1037_v0  ;;  %v1357_v18 = vmul.f32 %v1305_v50, %v7976_v58  ;;  %v7996_v52 = vadd.f32 %v5383_v54, %v7985_v48  ;;  %v1051_v20 = vpop.f32.mrb[21].mxu0 }
 0x2e6   :  { %6902 = vtanh.f32 %v1508_v42  ;;  %v1458_v4 = vadd.f32 %v1406_v40, %v7968_v47  ;;  %v1356_v60 = vmul.f32 %v1304_v51, %v7980_v45  ;;  %v8001_v41 = vadd.f32 %v1051_v20, %v7992_v55 }
 0x2e7   :  { %10449 = vst [vmem:[#allocation40_spill] sm:$0xff] %v7996_v52  ;;  %v8003_v57 = vpop.eup %6892  ;;  %v1511_v24 = vmul.f32 0.7978846, %v1459_v14  ;;  %v1409_v36 = vmul.f32 %v1357_v18, %v7976_v58  ;;  %v1307_v31 = vmul.f32 0.044715, %v7996_v52  ;;  %v8008_v0 = vmul.f32 %v1604_v46, %v7930_v56 }
 0x2e8   :  { %10450 = vst [vmem:[#allocation41_spill] sm:$0xff] %v8001_v41  ;;  %v8010_v50 = vpop.eup %6894  ;;  %v1510_v42 = vmul.f32 0.7978846, %v1458_v4  ;;  %v1408_v40 = vmul.f32 %v1356_v60, %v7980_v45  ;;  %v1306_v51 = vmul.f32 0.044715, %v8001_v41  ;;  %v5386_v54 = vpop.f32.mrb[22].mxu0 }
 0x2e9   :  { %v8014_v20 = vadd.f32 1.0, %v6891_v44  ;;  %6904 = vtanh.f32 %v1511_v24  ;;  %v1461_v14 = vadd.f32 %v1409_v36, %v7976_v58  ;;  %v1359_v18 = vmul.f32 %v1307_v31, %v7996_v52  ;;  %v1061_v48 = vpop.f32.mrb[23].mxu0 }
 0x2ea   :  { %v1067_v55 = vadd.f32 %v5386_v54, %v7881_v34  ;;  %6906 = vtanh.f32 %v1510_v42  ;;  %v1460_v56 = vadd.f32 %v1408_v40, %v7980_v45  ;;  %v1358_v46 = vmul.f32 %v1306_v51, %v8001_v41 }
 0x2eb   :  { %v1062_v4 = vadd.f32 %v1061_v48, %v7877_v30  ;;  %v8022_v60 = vpop.eup %6896  ;;  %v1513_v2 = vmul.f32 0.7978846, %v1461_v14  ;;  %v1411_v44 = vmul.f32 %v1359_v18, %v7996_v52 }
 0x2ec   :  { %v1309_v24 = vmul.f32 0.044715, %v1067_v55  ;;  %v8025_v29 = vmul.f32 0.5, %v1067_v55  ;;  %v8027_v36 = vpop.eup %6898  ;;  %v1512_v31 = vmul.f32 0.7978846, %v1460_v56  ;;  %v1410_v54 = vmul.f32 %v1358_v46, %v8001_v41  ;;  %v5389_v34 = vpop.f32.mrb[24].mxu0 }
 0x2ed   :  { %v1308_v42 = vmul.f32 0.044715, %v1062_v4  ;;  %v8030_v40 = vmul.f32 0.5, %v1062_v4  ;;  %6908 = vtanh.f32 %v1513_v2  ;;  %v1463_v48 = vadd.f32 %v1411_v44, %v7996_v52  ;;  %v1071_v30 = vpop.f32.mrb[25].mxu0 }
 0x2ee   :  { %v1361_v51 = vmul.f32 %v1309_v24, %v1067_v55  ;;  %v1077_v14 = vadd.f32 %v5389_v34, %v7883_v11  ;;  %6910 = vtanh.f32 %v1512_v31  ;;  %v1462_v18 = vadd.f32 %v1410_v54, %v8001_v41 }
 0x2ef   :  { %v1360_v8 = vmul.f32 %v1308_v42, %v1062_v4  ;;  %v1072_v9 = vadd.f32 %v1071_v30, %v7885_v38  ;;  %v8036_v56 = vpop.eup %6900  ;;  %v1515_v46 = vmul.f32 0.7978846, %v1463_v48 }
 0x2f0   :  { %v1413_v25 = vmul.f32 %v1361_v51, %v1067_v55  ;;  %v1311_v22 = vmul.f32 0.044715, %v1077_v14  ;;  %v8040_v19 = vpop.eup %6902  ;;  %v1514_v44 = vmul.f32 0.7978846, %v1462_v18  ;;  %v5392_v11 = vpop.f32.mrb[26].mxu0  ;;  %v8048_v10 = vmul.f32 0.5, %v1077_v14 }
 0x2f1   :  { %v1412_v24 = vmul.f32 %v1360_v8, %v1062_v4  ;;  %v1310_v34 = vmul.f32 0.044715, %v1072_v9  ;;  %v8042_v31 = vmul.f32 0.5, %v1072_v9  ;;  %6912 = vtanh.f32 %v1515_v46  ;;  %v1081_v42 = vpop.f32.mrb[27].mxu0 }
 0x2f2   :  { %v1363_v54 = vmul.f32 %v1311_v22, %v1077_v14  ;;  %v1087_v30 = vadd.f32 %v5392_v11, %v7891_v15  ;;  %v1465_v38 = vadd.f32 %v1413_v25, %v1067_v55  ;;  %6914 = vtanh.f32 %v1514_v44 }
 0x2f3   :  { %v1362_v48 = vmul.f32 %v1310_v34, %v1072_v9  ;;  %v1082_v51 = vadd.f32 %v1081_v42, %v7893_v17  ;;  %v1464_v16 = vadd.f32 %v1412_v24, %v1062_v4  ;;  %v8046_v2 = vpop.eup %6904  ;;  %v1607_v25 = vadd.f32 1.0, %v7982_v61 }
 0x2f4   :  { %v1415_v13 = vmul.f32 %v1363_v54, %v1077_v14  ;;  %v1313_v18 = vmul.f32 0.044715, %v1087_v30  ;;  %v1517_v8 = vmul.f32 0.7978846, %v1465_v38  ;;  %v8050_v7 = vpop.eup %6906  ;;  %v5395_v5 = vpop.f32.mrb[28].mxu0  ;;  %v8064_v61 = vmul.f32 %v8014_v20, %v7940_v6 }
 0x2f5   :  { %v1414_v46 = vmul.f32 %v1362_v48, %v1072_v9  ;;  %v1312_v22 = vmul.f32 0.044715, %v1082_v51  ;;  %v1516_v11 = vmul.f32 0.7978846, %v1464_v16  ;;  %v8054_v44 = vadd.f32 %v5395_v5, %v7899_v21  ;;  %v1091_v4 = vpop.f32.mrb[29].mxu0 }
 0x2f6   :  { %v1365_v55 = vmul.f32 %v1313_v18, %v1087_v30  ;;  %6916 = vtanh.f32 %v1517_v8  ;;  %v1467_v24 = vadd.f32 %v1415_v13, %v1077_v14  ;;  %v8057_v38 = vadd.f32 %v1091_v4, %v7901_v23 }
 0x2f7   :  { %v1364_v34 = vmul.f32 %v1312_v22, %v1082_v51  ;;  %6918 = vtanh.f32 %v1516_v11  ;;  %v1466_v54 = vadd.f32 %v1414_v46, %v1072_v9  ;;  %v8059_v42 = vpop.eup %6908  ;;  %v1315_v16 = vmul.f32 0.044715, %v8054_v44 }
 0x2f8   :  { %v1417_v48 = vmul.f32 %v1365_v55, %v1087_v30  ;;  %v1519_v17 = vmul.f32 0.7978846, %v1467_v24  ;;  %v8066_v5 = vpop.eup %6910  ;;  %v1314_v13 = vmul.f32 0.044715, %v8057_v38  ;;  %v5398_v14 = vpop.f32.mrb[30].mxu0  ;;  %v8070_v22 = vmul.f32 %v1607_v25, %v7935_v62 }
 0x2f9   :  { %v1416_v18 = vmul.f32 %v1364_v34, %v1082_v51  ;;  %v1518_v8 = vmul.f32 0.7978846, %v1466_v54  ;;  %v1367_v9 = vmul.f32 %v1315_v16, %v8054_v44  ;;  %v8074_v46 = vadd.f32 %v5398_v14, %v7907_v27  ;;  %v1101_v11 = vpop.f32.mrb[31].mxu0 }
 0x2fa   :  { %6920 = vtanh.f32 %v1519_v17  ;;  %v8076_v55 = vmul.f32 0.5, %v1082_v51  ;;  %v1366_v6 = vmul.f32 %v1314_v13, %v8057_v38  ;;  %v8080_v20 = vadd.f32 %v1101_v11, %v7909_v28 }
 0x2fb   :  { %6922 = vtanh.f32 %v1518_v8  ;;  %v8084_v62 = vpop.eup %6912  ;;  %v1419_v25 = vmul.f32 %v1367_v9, %v8054_v44  ;;  %v1317_v24 = vmul.f32 0.044715, %v8074_v46  ;;  %v8088_v34 = vmul.f32 0.5, %v1087_v30 }
 0x2fc   :  { %10451 = vst [vmem:[#allocation42_spill] sm:$0xff] %v8084_v62  ;;  %v1468_v17 = vadd.f32 %v1416_v18, %v1082_v51  ;;  %v8090_v54 = vpop.eup %6914  ;;  %v1418_v16 = vmul.f32 %v1366_v6, %v8057_v38  ;;  %v1316_v13 = vmul.f32 0.044715, %v8080_v20  ;;  %v5401_v14 = vpop.f32.mrb[32].mxu0  ;;  %v1469_v8 = vadd.f32 %v1417_v48, %v1087_v30 }
 0x2fd   :  { %10452 = vst [vmem:[#allocation43_spill] sm:$0xff] %v8090_v54  ;;  %v1608_v11 = vadd.f32 1.0, %v8010_v50  ;;  %v1369_v4 = vmul.f32 %v1317_v24, %v8074_v46  ;;  %v8097_v28 = vadd.f32 %v5401_v14, %v7915_v32  ;;  %v1111_v9 = vpop.f32.mrb[33].mxu0  ;;  %v1609_v23 = vadd.f32 1.0, %v8003_v57 }
 0x2fe   :  { %v1520_v27 = vmul.f32 0.7978846, %v1468_v17  ;;  %v1368_v51 = vmul.f32 %v1316_v13, %v8080_v20  ;;  %v8102_v18 = vadd.f32 %v1111_v9, %v7917_v33  ;;  %v1521_v6 = vmul.f32 0.7978846, %v1469_v8 }
 0x2ff   :  { %v8105_v21 = vmul.f32 %v1608_v11, %v7946_v49  ;;  %v8108_v50 = vmul.f32 %v1369_v4, %v8074_v46  ;;  %v1319_v48 = vmul.f32 0.044715, %v8097_v28  ;;  %v8112_v24 = vmul.f32 %v1609_v23, %v7944_v37  ;;  %v8118_v49 = vpop.permute.xlu1 %372 }
 0x300   :  { %v6917_v30 = vpop.eup %6916  ;;  %6924 = vtanh.f32 %v1520_v27  ;;  %v8115_v17 = vmul.f32 %v1368_v51, %v8080_v20  ;;  %v1318_v13 = vmul.f32 0.044715, %v8102_v18  ;;  %v5404_v14 = vpop.f32.mrb[34].mxu0  ;;  %v8140_v23 = vmul.f32 0.5, %v8054_v44 }
 0x301   :  { %v6919_v57 = vpop.eup %6918  ;;  %v1621_v8 = vadd.f32 1.0, %v6917_v30  ;;  %6926 = vtanh.f32 %v1521_v6  ;;  %v1371_v4 = vmul.f32 %v1319_v48, %v8097_v28  ;;  %v8122_v11 = vadd.f32 %v5404_v14, %v7937_v63  ;;  %v1121_v27 = vpop.f32.mrb[35].mxu0 }
 0x302   :  { %v1620_v9 = vadd.f32 1.0, %v6919_v57  ;;  %v1370_v37 = vmul.f32 %v1318_v13, %v8102_v18  ;;  %v8128_v51 = vadd.f32 %v1121_v27, %v7942_v35  ;;  %v8132_v6 = vmul.f32 0.5, %v8057_v38  ;;  %v8142_v63 = vpop.permute.xlu0 %367 }
 0x303   :  { %v1673_v30 = vmul.f32 %v1621_v8, %v8025_v29  ;;  %v8135_v48 = vmul.f32 %v1371_v4, %v8097_v28  ;;  %v1321_v14 = vmul.f32 0.044715, %v8122_v11  ;;  %v1470_v4 = vadd.f32 %v1418_v16, %v8057_v38 }
 0x304   :  { %v6921_v33 = vpop.eup %6920  ;;  %v1672_v57 = vmul.f32 %v1620_v9, %v8030_v40  ;;  %v8145_v27 = vmul.f32 %v1370_v37, %v8102_v18  ;;  %v1320_v29 = vmul.f32 0.044715, %v8128_v51  ;;  %v5407_v8 = vpop.f32.mrb[36].mxu0  ;;  %v1471_v41 = vadd.f32 %v1419_v25, %v8054_v44 }
 0x305   :  { %v6923_v13 = vpop.eup %6922  ;;  %v1623_v35 = vadd.f32 1.0, %v6921_v33  ;;  %v1373_v32 = vmul.f32 %v1321_v14, %v8122_v11  ;;  %v8151_v15 = vadd.f32 %v5407_v8, %v7965_v3  ;;  %v1131_v40 = vpop.f32.mrb[37].mxu0  ;;  %v1522_v14 = vmul.f32 0.7978846, %v1470_v4 }
 0x306   :  { %v6312_v9 = vpack.c.bf16 %v1673_v30, %v1672_v57  ;;  %v1622_v62 = vadd.f32 1.0, %v6923_v13  ;;  %v1372_v54 = vmul.f32 %v1320_v29, %v8128_v51  ;;  %v8155_v52 = vadd.f32 %v1131_v40, %v7970_v43  ;;  %v8159_v33 = vpop.permute.xlu1 %382  ;;  %v8178_v4 = vpop.permute.xlu0 %377 }
 0x307   :  { %v1675_v37 = vmul.f32 %v1623_v35, %v8048_v10  ;;  %v8162_v38 = vmul.f32 %v1373_v32, %v8122_v11  ;;  %v1323_v16 = vmul.f32 0.044715, %v8151_v15  ;;  %v10453_v10 = vpack.c.bf16 %v7990_v12, %v8008_v0  ;;  %10454 = vst [vmem:[#allocation44_spill] sm:$0xff] %v8178_v4 }
 0x308   :  { %6313 = vmatprep.subr.bf16.mxu1 %v6312_v9  ;;  %v1674_v30 = vmul.f32 %v1622_v62, %v8042_v31  ;;  %v8167_v57 = vmul.f32 %v1372_v54, %v8128_v51  ;;  %v1322_v13 = vmul.f32 0.044715, %v8155_v52  ;;  %v5410_v29 = vpop.f32.mrb[38].mxu0  ;;  %v1523_v35 = vmul.f32 0.7978846, %v1471_v41 }
 0x309   :  { %6315 = vmatpush3.bf16.msra.mxu1 %v10453_v10  ;;  %v1610_v32 = vadd.f32 1.0, %v8027_v36  ;;  %v1375_v25 = vmul.f32 %v1323_v16, %v8151_v15  ;;  %v8176_v8 = vadd.f32 %v5410_v29, %v8118_v49  ;;  %v1141_v31 = vpop.f32.mrb[39].mxu0  ;;  %6928 = vtanh.f32 %v1522_v14 }
 0x30a   :  { %v6925_v44 = vpop.eup %6924  ;;  %v6316_v62 = vpack.c.bf16 %v1675_v37, %v1674_v30  ;;  %v1374_v40 = vmul.f32 %v1322_v13, %v8155_v52  ;;  %v8182_v12 = vadd.f32 %v1141_v31, %v8142_v63  ;;  %6930 = vtanh.f32 %v1523_v35  ;;  %v8200_v35 = vpop.permute.xlu1 %392 }
 0x30b   :  { %v6927_v54 = vpop.eup %6926  ;;  %v1624_v41 = vadd.f32 1.0, %v6925_v44  ;;  %v8185_v0 = vmul.f32 %v1375_v25, %v8151_v15  ;;  %v1325_v36 = vmul.f32 0.044715, %v8176_v8  ;;  %v1611_v37 = vadd.f32 1.0, %v8022_v60  ;;  %10456 = vst [vmem:[#allocation45_spill] sm:$0xff] %v8200_v35 }
 0x30c   :  { %6317 = vmatprep.subr.bf16.mxu1 %v6316_v62  ;;  %v1625_v9 = vadd.f32 1.0, %v6927_v54  ;;  %v8190_v16 = vmul.f32 %v1374_v40, %v8155_v52  ;;  %v1324_v30 = vmul.f32 0.044715, %v8182_v12  ;;  %v5413_v14 = vpop.f32.mrb[40].mxu0  ;;  %v10455_v13 = vpack.c.bf16 %v8070_v22, %v8064_v61 }
 0x30d   :  { %v1676_v29 = vmul.f32 %v1624_v41, %v8076_v55  ;;  %v8198_v10 = vmul.f32 %v1610_v32, %v7954_v39  ;;  %v1377_v44 = vmul.f32 %v1325_v36, %v8176_v8  ;;  %v8204_v60 = vadd.f32 %v5413_v14, %v8159_v33  ;;  %v1151_v25 = vpop.f32.mrb[41].mxu0 }
 0x30e   :  { %6319 = vmatpush3.bf16.msra.mxu1 %v10455_v13  ;;  %v1677_v31 = vmul.f32 %v1625_v9, %v8088_v34  ;;  %v8208_v62 = vmul.f32 %v1611_v37, %v7950_v1  ;;  %v1376_v61 = vmul.f32 %v1324_v30, %v8182_v12  ;;  %v8212_v22 = vadd.f32 %v1151_v25, %v8178_v4  ;;  %v8224_v34 = vpop.permute.xlu0 %387 }
 0x30f   :  { %v8215_v39 = vmul.f32 0.5, %v8080_v20  ;;  %v8218_v55 = vmul.f32 0.5, %v8074_v46  ;;  %v1429_v32 = vmul.f32 %v1377_v44, %v8176_v8  ;;  %v1327_v54 = vmul.f32 0.044715, %v8204_v60  ;;  %10457 = vst [vmem:[#allocation46_spill] sm:$0xff] %v8224_v34 }
 0x310   :  { %v6320_v40 = vpack.c.bf16 %v1677_v31, %v1676_v29  ;;  %v1428_v41 = vmul.f32 %v1376_v61, %v8182_v12  ;;  %v1326_v36 = vmul.f32 0.044715, %v8212_v22  ;;  %v5416_v9 = vpop.f32.mrb[42].mxu0  ;;  %v1472_v37 = vadd.f32 %v8115_v17, %v8080_v20 }
 0x311   :  { %v1473_v30 = vadd.f32 %v8108_v50, %v8074_v46  ;;  %v1481_v14 = vadd.f32 %v1429_v32, %v8176_v8  ;;  %v1379_v13 = vmul.f32 %v1327_v54, %v8204_v60  ;;  %v8235_v29 = vadd.f32 %v5416_v9, %v8200_v35  ;;  %v1161_v44 = vpop.f32.mrb[43].mxu0  ;;  %v8246_v32 = vpop.permute.xlu1 %402 }
 0x312   :  { %6321 = vmatprep.subr.bf16.mxu1 %v6320_v40  ;;  %v1612_v25 = vadd.f32 1.0, %v8040_v19  ;;  %v1480_v31 = vadd.f32 %v1428_v41, %v8182_v12  ;;  %v1378_v61 = vmul.f32 %v1326_v36, %v8212_v22  ;;  %v10458_v20 = vpack.c.bf16 %v8112_v24, %v8105_v21  ;;  %10459 = vst [vmem:[#allocation47_spill] sm:$0xff] %v8246_v32  ;;  %v8254_v35 = vpop.permute.xlu0 %397 }
 0x313   :  { %v8244_v46 = vadd.f32 %v1161_v44, %v8224_v34  ;;  %v1524_v50 = vmul.f32 0.7978846, %v1472_v37  ;;  %v6929_v17 = vpop.eup %6928  ;;  %v1533_v54 = vmul.f32 0.7978846, %v1481_v14  ;;  %v1431_v40 = vmul.f32 %v1379_v13, %v8204_v60  ;;  %10460 = vst [vmem:[#allocation48_spill] sm:$0xff] %v8254_v35 }
 0x314   :  { %6323 = vmatpush3.bf16.msra.mxu1 %v10458_v20  ;;  %v1329_v19 = vmul.f32 0.044715, %v8235_v29  ;;  %v1525_v9 = vmul.f32 0.7978846, %v1473_v30  ;;  %v6931_v41 = vpop.eup %6930  ;;  %v1532_v1 = vmul.f32 0.7978846, %v1480_v31  ;;  %v1430_v36 = vmul.f32 %v1378_v61, %v8212_v22 }
 0x315   :  { %v1328_v21 = vmul.f32 0.044715, %v8244_v46  ;;  %v1626_v24 = vadd.f32 1.0, %v6929_v17  ;;  %v5419_v20 = vpop.f32.mrb[44].mxu0  ;;  %6932 = vtanh.f32 %v1533_v54  ;;  %v1483_v37 = vadd.f32 %v1431_v40, %v8204_v60 }
 0x316   :  { %v1381_v44 = vmul.f32 %v1329_v19, %v8235_v29  ;;  %v1627_v34 = vadd.f32 1.0, %v6931_v41  ;;  %v1171_v14 = vpop.f32.mrb[45].mxu0  ;;  %6934 = vtanh.f32 %v1532_v1  ;;  %v1482_v30 = vadd.f32 %v1430_v36, %v8212_v22  ;;  %v8268_v36 = vpop.permute.xlu1 %412 }
 0x317   :  { %v1380_v13 = vmul.f32 %v1328_v21, %v8244_v46  ;;  %v1678_v31 = vmul.f32 %v1626_v24, %v8132_v6  ;;  %v1535_v61 = vmul.f32 0.7978846, %v1483_v37  ;;  %v8262_v40 = vadd.f32 %v5419_v20, %v8246_v32  ;;  %10461 = vst [vmem:[#allocation49_spill] sm:$0xff] %v8268_v36 }
 0x318   :  { %v1433_v17 = vmul.f32 %v1381_v44, %v8235_v29  ;;  %v1679_v54 = vmul.f32 %v1627_v34, %v8140_v23  ;;  %v1534_v19 = vmul.f32 0.7978846, %v1482_v30  ;;  %v8266_v4 = vadd.f32 %v1171_v14, %v8254_v35  ;;  %v5422_v1 = vpop.f32.mrb[46].mxu0  ;;  %v8279_v30 = vpop.permute.xlu0 %407 }
 0x319   :  { %v1432_v41 = vmul.f32 %v1380_v13, %v8244_v46  ;;  %6936 = vtanh.f32 %v1524_v50  ;;  %v1331_v24 = vmul.f32 0.044715, %v8262_v40  ;;  %v1181_v23 = vpop.f32.mrb[47].mxu0  ;;  %v8275_v37 = vadd.f32 %v5422_v1, %v8268_v36  ;;  %10462 = vst [vmem:[#allocation50_spill] sm:$0xff] %v8279_v30 }
 0x31a   :  { %6938 = vtanh.f32 %v1535_v61  ;;  %v1485_v6 = vadd.f32 %v1433_v17, %v8235_v29  ;;  %v6324_v21 = vpack.c.bf16 %v1679_v54, %v1678_v31  ;;  %v1330_v20 = vmul.f32 0.044715, %v8266_v4 }
 0x31b   :  { %6940 = vtanh.f32 %v1534_v19  ;;  %v1484_v34 = vadd.f32 %v1432_v41, %v8244_v46  ;;  %v1383_v50 = vmul.f32 %v1331_v24, %v8262_v40  ;;  %v1613_v14 = vadd.f32 1.0, %v8036_v56 }
 0x31c   :  { %v1537_v44 = vmul.f32 0.7978846, %v1485_v6  ;;  %6325 = vmatprep.subr.bf16.mxu1 %v6324_v21  ;;  %6942 = vtanh.f32 %v1525_v9  ;;  %v10463_v31 = vpack.c.bf16 %v8208_v62, %v8198_v10  ;;  %v1382_v61 = vmul.f32 %v1330_v20, %v8266_v4  ;;  %v5425_v19 = vpop.f32.mrb[48].mxu0 }
 0x31d   :  { %v1536_v13 = vmul.f32 0.7978846, %v1484_v34  ;;  %v1333_v17 = vmul.f32 0.044715, %v8275_v37  ;;  %v8287_v54 = vmul.f32 %v1612_v25, %v7962_v59  ;;  %v1435_v9 = vmul.f32 %v1383_v50, %v8262_v40  ;;  %v1191_v1 = vpop.f32.mrb[49].mxu0  ;;  %v8312_v34 = vpop.permute.xlu1 %422 }
 0x31e   :  { %6327 = vmatpush3.bf16.msra.mxu1 %v10463_v31  ;;  %6944 = vtanh.f32 %v1537_v44  ;;  %v8291_v56 = vmul.f32 %v1613_v14, %v7960_v26  ;;  %v8294_v41 = vadd.f32 %v1181_v23, %v8279_v30  ;;  %v1434_v10 = vmul.f32 %v1382_v61, %v8266_v4  ;;  %10464 = vst [vmem:[#allocation51_spill] sm:$0xff] %v8312_v34 }
 0x31f   :  { %6946 = vtanh.f32 %v1536_v13  ;;  %v1385_v62 = vmul.f32 %v1333_v17, %v8275_v37  ;;  %v8299_v6 = vmul.f32 0.5, %v8102_v18  ;;  %v8301_v59 = vpop.eup %6932  ;;  %v1487_v25 = vadd.f32 %v1435_v9, %v8262_v40 }
 0x320   :  { %v1332_v21 = vmul.f32 0.044715, %v8294_v41  ;;  %v8308_v24 = vmul.f32 0.5, %v8097_v28  ;;  %v8310_v23 = vpop.eup %6934  ;;  %v1486_v20 = vadd.f32 %v1434_v10, %v8266_v4  ;;  %v1474_v50 = vadd.f32 %v8145_v27, %v8102_v18  ;;  %v5428_v13 = vpop.f32.mrb[50].mxu0 }
 0x321   :  { %v1437_v44 = vmul.f32 %v1385_v62, %v8275_v37  ;;  %v1475_v14 = vadd.f32 %v8135_v48, %v8097_v28  ;;  %v1539_v31 = vmul.f32 0.7978846, %v1487_v25  ;;  %v8322_v17 = vadd.f32 %v5425_v19, %v8312_v34  ;;  %v8325_v26 = vpop.f32.mrb[51].mxu0 }
 0x322   :  { %v1384_v61 = vmul.f32 %v1332_v21, %v8294_v41  ;;  %v1250_v9 = vmul.f32 0.5, %v7968_v47  ;;  %v1538_v30 = vmul.f32 0.7978846, %v1486_v20  ;;  %v1526_v36 = vmul.f32 0.7978846, %v1474_v50 }
 0x323   :  { %v6937_v10 = vpop.eup %6936  ;;  %v1489_v62 = vadd.f32 %v1437_v44, %v8275_v37  ;;  %v1527_v18 = vmul.f32 0.7978846, %v1475_v14  ;;  %6948 = vtanh.f32 %v1539_v31  ;;  %v1335_v25 = vmul.f32 0.044715, %v8322_v17 }
 0x324   :  { %v8328_v27 = vpop.eup %6938  ;;  %v1628_v28 = vadd.f32 1.0, %v6937_v10  ;;  %v1436_v48 = vmul.f32 %v1384_v61, %v8294_v41  ;;  %6950 = vtanh.f32 %v1538_v30  ;;  %v1614_v21 = vadd.f32 1.0, %v8050_v7  ;;  %v8336_v34 = vpop.f32.mrb[52].mxu0 }
 0x325   :  { %v8332_v19 = vpop.eup %6940  ;;  %v1541_v47 = vmul.f32 0.7978846, %v1489_v62  ;;  %v1615_v20 = vadd.f32 1.0, %v8046_v2  ;;  %6952 = vtanh.f32 %v1526_v36  ;;  %v1387_v31 = vmul.f32 %v1335_v25, %v8322_v17  ;;  %v8341_v61 = vpop.f32.mrb[53].mxu0 }
 0x326   :  { %v6943_v44 = vpop.eup %6942  ;;  %v1680_v50 = vmul.f32 %v1628_v28, %v8215_v39  ;;  %v1488_v14 = vadd.f32 %v1436_v48, %v8294_v41  ;;  %v8343_v10 = vpop.permute.xlu0 %417  ;;  %v8345_v62 = vmul.f32 %v1614_v21, %v1250_v9  ;;  %v8362_v25 = vmul.f32 0.5, %v8128_v51 }
 0x327   :  { %10465 = vst [vmem:[#allocation52_spill] sm:$0xff] %v8343_v10  ;;  %v1629_v30 = vadd.f32 1.0, %v6943_v44  ;;  %6954 = vtanh.f32 %v1541_v47  ;;  %v8348_v7 = vmul.f32 %v1615_v20, %v7972_v53  ;;  %v1439_v39 = vmul.f32 %v1387_v31, %v8322_v17 }
 0x328   :  { %v8350_v2 = vpop.eup %6944  ;;  %v1540_v35 = vmul.f32 0.7978846, %v1488_v14  ;;  %6956 = vtanh.f32 %v1527_v18  ;;  %v8354_v36 = vadd.f32 %v1191_v1, %v8343_v10  ;;  %v8365_v53 = vmul.f32 0.5, %v8122_v11  ;;  %v8367_v47 = vpop.f32.mrb[54].mxu0 }
 0x329   :  { %v8356_v28 = vpop.eup %6946  ;;  %v1681_v48 = vmul.f32 %v1629_v30, %v8218_v55  ;;  %v8369_v18 = vpop.permute.xlu1 %432  ;;  %v1491_v1 = vadd.f32 %v1439_v39, %v8322_v17  ;;  %v1476_v55 = vadd.f32 %v8167_v57, %v8128_v51  ;;  %v1477_v14 = vadd.f32 %v8162_v38, %v8122_v11 }
 0x32a   :  { %10466 = vst [vmem:[#allocation53_spill] sm:$0xff] %v8369_v18  ;;  %6958 = vtanh.f32 %v1540_v35  ;;  %v1334_v21 = vmul.f32 0.044715, %v8354_v36  ;;  %v8375_v20 = vpop.f32.mrb[55].mxu0  ;;  %v8380_v31 = vadd.f32 %v5428_v13, %v8369_v18  ;;  %v1252_v30 = vmul.f32 0.5, %v7980_v45  ;;  %v8385_v32 = vpop.permute.xlu0 %427 }
 0x32b   :  { %v6328_v44 = vpack.c.bf16 %v1681_v48, %v1680_v50  ;;  %v1543_v9 = vmul.f32 0.7978846, %v1491_v1  ;;  %v1528_v39 = vmul.f32 0.7978846, %v1476_v55  ;;  %v1253_v10 = vmul.f32 0.5, %v7976_v58  ;;  %10467 = vst [vmem:[#allocation54_spill] sm:$0xff] %v8385_v32 }
 0x32c   :  { %v1386_v35 = vmul.f32 %v1334_v21, %v8354_v36  ;;  %v1529_v51 = vmul.f32 0.7978846, %v1477_v14  ;;  %v1337_v57 = vmul.f32 0.044715, %v8380_v31  ;;  %v1616_v50 = vadd.f32 1.0, %v8066_v5  ;;  %v8403_v1 = vpop.f32.mrb[56].mxu0 }
 0x32d   :  { %6329 = vmatprep.subr.bf16.mxu1 %v6328_v44  ;;  %v1617_v11 = vadd.f32 1.0, %v8059_v42  ;;  %v8390_v38 = vpop.eup %6948  ;;  %v10468_v45 = vpack.c.bf16 %v8291_v56, %v8287_v54  ;;  %6960 = vtanh.f32 %v1543_v9  ;;  %v8398_v58 = vadd.f32 %v8325_v26, %v8385_v32  ;;  %v8412_v56 = vpop.f32.mrb[57].mxu0 }
 0x32e   :  { %v1438_v13 = vmul.f32 %v1386_v35, %v8354_v36  ;;  %v8401_v48 = vmul.f32 0.5, %v8155_v52  ;;  %v8405_v5 = vpop.eup %6950  ;;  %6962 = vtanh.f32 %v1528_v39  ;;  %v1389_v42 = vmul.f32 %v1337_v57, %v8380_v31  ;;  %v8421_v35 = vpop.permute.xlu1 %442 }
 0x32f   :  { %6331 = vmatpush3.bf16.msra.mxu1 %v10468_v45  ;;  %v8408_v21 = vmul.f32 %v1616_v50, %v1252_v30  ;;  %v8410_v54 = vmul.f32 %v1617_v11, %v1253_v10  ;;  %v6953_v9 = vpop.eup %6952  ;;  %6964 = vtanh.f32 %v1529_v51  ;;  %v1336_v55 = vmul.f32 0.044715, %v8398_v58  ;;  %10469 = vst [vmem:[#allocation55_spill] sm:$0xff] %v8421_v35 }
 0x330   :  { %v1490_v26 = vadd.f32 %v1438_v13, %v8354_v36  ;;  %v8417_v44 = vmul.f32 0.5, %v8151_v15  ;;  %v1630_v39 = vadd.f32 1.0, %v6953_v9  ;;  %v1441_v30 = vmul.f32 %v1389_v42, %v8380_v31 }
 0x331   :  { %v8419_v14 = vpop.eup %6954  ;;  %v1478_v57 = vadd.f32 %v8190_v16, %v8155_v52  ;;  %v1388_v11 = vmul.f32 %v1336_v55, %v8398_v58  ;;  %v1479_v45 = vadd.f32 %v8185_v0, %v8151_v15  ;;  %v8433_v13 = vadd.f32 %v8336_v34, %v8421_v35  ;;  %v10470_v34 = vld [vmem:[#allocation41_spill] sm:$0xff] }
 0x332   :  { %v6957_v50 = vpop.eup %6956  ;;  %v1542_v51 = vmul.f32 0.7978846, %v1490_v26  ;;  %v1682_v42 = vmul.f32 %v1630_v39, %v8299_v6  ;;  %v1493_v32 = vadd.f32 %v1441_v30, %v8380_v31  ;;  %v1254_v55 = vmul.f32 0.5, %v10470_v34  ;;  %v10472_v30 = vld [vmem:[#allocation40_spill] sm:$0xff] }
 0x333   :  { %v1631_v9 = vadd.f32 1.0, %v6957_v50  ;;  %v1530_v10 = vmul.f32 0.7978846, %v1478_v57  ;;  %v1440_v52 = vmul.f32 %v1388_v11, %v8398_v58  ;;  %v1531_v16 = vmul.f32 0.7978846, %v1479_v45  ;;  %v8443_v50 = vpop.permute.xlu0 %437  ;;  %v10474_v45 = vld [vmem:[#allocation43_spill] sm:$0xff] }
 0x334   :  { %v8437_v18 = vpop.eup %6958  ;;  %6966 = vtanh.f32 %v1542_v51  ;;  %v1339_v26 = vmul.f32 0.044715, %v8433_v13  ;;  %v1545_v0 = vmul.f32 0.7978846, %v1493_v32  ;;  %10471 = vst [vmem:[#allocation41_spill] sm:$0xff] %v8443_v50  ;;  %v1255_v57 = vmul.f32 0.5, %v10472_v30  ;;  %v8448_v51 = vpop.permute.xlu1 %452 }
 0x335   :  { %v1683_v15 = vmul.f32 %v1631_v9, %v8308_v24  ;;  %6968 = vtanh.f32 %v1530_v10  ;;  %v1492_v6 = vadd.f32 %v1440_v52, %v8398_v58  ;;  %10473 = vst [vmem:[#allocation40_spill] sm:$0xff] %v8448_v51  ;;  %v1618_v35 = vadd.f32 1.0, %v10474_v45  ;;  %v10475_v24 = vld [vmem:[#allocation42_spill] sm:$0xff] }
 0x336   :  { %6970 = vtanh.f32 %v1531_v16  ;;  %v1391_v39 = vmul.f32 %v1339_v26, %v8433_v13  ;;  %v1619_v32 = vadd.f32 1.0, %v10475_v24  ;;  %v8457_v52 = vadd.f32 %v8341_v61, %v8443_v50 }
 0x337   :  { %v6332_v11 = vpack.c.bf16 %v1683_v15, %v1682_v42  ;;  %6972 = vtanh.f32 %v1545_v0  ;;  %v8452_v10 = vpop.eup %6960  ;;  %v1544_v9 = vmul.f32 0.7978846, %v1492_v6  ;;  %v8461_v16 = vadd.f32 %v8367_v47, %v8448_v51 }
 0x338   :  { %v1443_v34 = vmul.f32 %v1391_v39, %v8433_v13  ;;  %v6963_v26 = vpop.eup %6962  ;;  %v8463_v42 = vmul.f32 %v1618_v35, %v1254_v55  ;;  %v8465_v15 = vmul.f32 %v1619_v32, %v1255_v57  ;;  %v1272_v0 = vmul.f32 0.5, %v8182_v12  ;;  %v8483_v32 = vpop.permute.xlu1 %462 }
 0x339   :  { %6333 = vmatprep.subr.bf16.mxu1 %v6332_v11  ;;  %v1273_v6 = vmul.f32 0.5, %v8176_v8  ;;  %v6965_v30 = vpop.eup %6964  ;;  %v10476_v39 = vpack.c.bf16 %v8348_v7, %v8345_v62  ;;  %v1632_v61 = vadd.f32 1.0, %v6963_v26  ;;  %6974 = vtanh.f32 %v1544_v9  ;;  %v8478_v8 = vpop.permute.xlu0 %447  ;;  %10478 = vst [vmem:[#allocation42_spill] sm:$0xff] %v8483_v32 }
 0x33a   :  { %v1495_v47 = vadd.f32 %v1443_v34, %v8433_v13  ;;  %v1338_v45 = vmul.f32 0.044715, %v8457_v52  ;;  %v1633_v11 = vadd.f32 1.0, %v6965_v30  ;;  %v6342_v35 = vpack.c.bf16 %v8465_v15, %v8463_v42  ;;  %10477 = vst [vmem:[#allocation43_spill] sm:$0xff] %v8478_v8 }
 0x33b   :  { %6335 = vmatpush3.bf16.msra.mxu1 %v10476_v39  ;;  %v1341_v55 = vmul.f32 0.044715, %v8461_v16  ;;  %v1636_v12 = vadd.f32 1.0, %v8310_v23  ;;  %v1684_v57 = vmul.f32 %v1632_v61, %v8362_v25  ;;  %v1637_v24 = vadd.f32 1.0, %v8301_v59 }
 0x33c   :  { %v1547_v62 = vmul.f32 0.7978846, %v1495_v47  ;;  %v1390_v7 = vmul.f32 %v1338_v45, %v8457_v52  ;;  %v1685_v9 = vmul.f32 %v1633_v11, %v8365_v53  ;;  %v8491_v23 = vadd.f32 %v8375_v20, %v8478_v8 }
 0x33d   :  { %v1393_v34 = vmul.f32 %v1341_v55, %v8461_v16  ;;  %v8487_v26 = vmul.f32 %v1636_v12, %v1272_v0  ;;  %v8496_v15 = vmul.f32 %v1637_v24, %v1273_v6  ;;  %v8500_v59 = vadd.f32 %v8403_v1, %v8483_v32 }
 0x33e   :  { %v8493_v42 = vpop.eup %6966  ;;  %6976 = vtanh.f32 %v1547_v62  ;;  %v1442_v25 = vmul.f32 %v1390_v7, %v8457_v52  ;;  %v6336_v30 = vpack.c.bf16 %v1685_v9, %v1684_v57  ;;  %v1340_v39 = vmul.f32 0.044715, %v8491_v23 }
 0x33f   :  { %v6969_v53 = vpop.eup %6968  ;;  %v1445_v0 = vmul.f32 %v1393_v34, %v8461_v16  ;;  %v1274_v20 = vmul.f32 0.5, %v8212_v22  ;;  %v6345_v6 = vpack.c.bf16 %v8496_v15, %v8487_v26  ;;  %v1343_v11 = vmul.f32 0.044715, %v8500_v59  ;;  %v8520_v26 = vpop.permute.xlu0 %457 }
 0x340   :  { %v6971_v61 = vpop.eup %6970  ;;  %v1634_v47 = vadd.f32 1.0, %v6969_v53  ;;  %v1494_v45 = vadd.f32 %v1442_v25, %v8457_v52  ;;  %6337 = vmatprep.subr.bf16.mxu1 %v6336_v30  ;;  %v1392_v57 = vmul.f32 %v1340_v39, %v8491_v23  ;;  %v1275_v62 = vmul.f32 0.5, %v8204_v60  ;;  %10480 = vst [vmem:[#allocation56_spill] sm:$0xff] %v8520_v26 }
 0x341   :  { %v8509_v55 = vpop.eup %6972  ;;  %v1635_v1 = vadd.f32 1.0, %v6971_v61  ;;  %v1497_v12 = vadd.f32 %v1445_v0, %v8461_v16  ;;  %v10479_v22 = vpack.c.bf16 %v8410_v54, %v8408_v21  ;;  %v1395_v9 = vmul.f32 %v1343_v11, %v8500_v59 }
 0x342   :  { %v1686_v7 = vmul.f32 %v1634_v47, %v8401_v48  ;;  %v1546_v24 = vmul.f32 0.7978846, %v1494_v45  ;;  %v1638_v34 = vadd.f32 1.0, %v8332_v19  ;;  %v1444_v53 = vmul.f32 %v1392_v57, %v8491_v23 }
 0x343   :  { %6339 = vmatpush3.bf16.msra.mxu1 %v10479_v22  ;;  %v1687_v25 = vmul.f32 %v1635_v1, %v8417_v44  ;;  %v1549_v15 = vmul.f32 0.7978846, %v1497_v12  ;;  %v1639_v60 = vadd.f32 1.0, %v8328_v27  ;;  %v6975_v30 = vpop.eup %6974  ;;  %v1447_v21 = vmul.f32 %v1395_v9, %v8500_v59  ;;  %v141_v12 = vld [vmem:[%s10440_s1] sm:$0xff] }
 0x344   :  { %6978 = vtanh.f32 %v1546_v24  ;;  %v1690_v54 = vmul.f32 %v1638_v34, %v1274_v20  ;;  %v8528_v48 = vadd.f32 %v8412_v56, %v8520_v26  ;;  %v1496_v19 = vadd.f32 %v1444_v53, %v8491_v23 }
 0x345   :  { %v6340_v0 = vpack.c.bf16 %v1687_v25, %v1686_v7  ;;  %6980 = vtanh.f32 %v1549_v15  ;;  %v1691_v39 = vmul.f32 %v1639_v60, %v1275_v62  ;;  %v1499_v44 = vadd.f32 %v1447_v21, %v8500_v59 }
 0x346   :  { %v1342_v61 = vmul.f32 0.044715, %v8528_v48  ;;  %v1276_v27 = vmul.f32 0.5, %v8244_v46  ;;  %v1277_v47 = vmul.f32 0.5, %v8235_v29  ;;  %v1548_v45 = vmul.f32 0.7978846, %v1496_v19 }
 0x347   :  { %6341 = vmatprep.subr.bf16.mxu1 %v6340_v0  ;;  %v6348_v20 = vpack.c.bf16 %v1691_v39, %v1690_v54  ;;  %v1640_v11 = vadd.f32 1.0, %v8356_v28  ;;  %v1641_v56 = vadd.f32 1.0, %v8350_v2  ;;  %v1551_v57 = vmul.f32 0.7978846, %v1499_v44 }
 0x348   :  { %v6977_v1 = vpop.eup %6976  ;;  %6343 = vmatpush3.bf16.msra.mxu1 %v6342_v35  ;;  %v1394_v62 = vmul.f32 %v1342_v61, %v8528_v48  ;;  %v1278_v46 = vmul.f32 0.5, %v8266_v4  ;;  %v1279_v29 = vmul.f32 0.5, %v8262_v40  ;;  %v10481_v22 = vmov 0.0|0.0   ;;  %v146_v35 = vld [vmem:[%s10440_s1 + $0x28] sm:$0xff] }
 0x349   :  { %6344 = vmatprep.subr.bf16.mxu1 %v10481_v22  ;;  %6982 = vtanh.f32 %v1548_v45  ;;  %v1692_v7 = vmul.f32 %v1640_v11, %v1276_v27  ;;  %v1693_v28 = vmul.f32 %v1641_v56, %v1277_v47  ;;  %v1642_v2 = vadd.f32 1.0, %v8405_v5  ;;  %v149_v45 = vld [vmem:[%s10440_s1 + $0x40] sm:$0xff] }
 0x34a   :  { %6984 = vtanh.f32 %v1551_v57  ;;  %v1446_v24 = vmul.f32 %v1394_v62, %v8528_v48  ;;  %v1643_v9 = vadd.f32 1.0, %v8390_v38  ;;  %v1280_v4 = vmul.f32 0.5, %v8294_v41  ;;  %v145_v41 = vld [vmem:[%s10440_s1 + $0x20] sm:$0xff] }
 0x34b   :  { %1783 = vmatmul.mubr.f32.vlgmr.msra.gmra.mrb[6].mxu1 %v141_v12  ;;  %v6351_v40 = vpack.c.bf16 %v1693_v28, %v1692_v7  ;;  %v1694_v34 = vmul.f32 %v1642_v2, %v1278_v46  ;;  %v1281_v25 = vmul.f32 0.5, %v8275_v37  ;;  %v1644_v15 = vadd.f32 1.0, %v8437_v18 }
 0x34c   :  { %6346 = vmatpush1.bf16.msra.mxu1 %v6345_v6  ;;  %v1498_v5 = vadd.f32 %v1446_v24, %v8528_v48  ;;  %v1695_v53 = vmul.f32 %v1643_v9, %v1279_v29  ;;  %v1645_v60 = vadd.f32 1.0, %v8419_v14  ;;  %v1282_v21 = vmul.f32 0.5, %v8354_v36  ;;  %1787 = vmatprep.mubr.f32.mxu1 %v146_v35  ;;  %v150_v14 = vld [vmem:[%s10440_s1 + $0x48] sm:$0xff] }
 0x34d   :  { %6347 = vmatprep.subr.bf16.mxu1 %v10481_v22  ;;  %v1696_v38 = vmul.f32 %v1644_v15, %v1280_v4  ;;  %v1283_v37 = vmul.f32 0.5, %v8322_v17  ;;  %v1646_v18 = vadd.f32 1.0, %v8493_v42  ;;  %v1647_v6 = vadd.f32 1.0, %v8452_v10 }
 0x34e   :  { %v6979_v54 = vpop.eup %6978  ;;  %v1550_v36 = vmul.f32 0.7978846, %v1498_v5  ;;  %v6354_v0 = vpack.c.bf16 %v1695_v53, %v1694_v34  ;;  %v1697_v19 = vmul.f32 %v1645_v60, %v1281_v25  ;;  %v1284_v27 = vmul.f32 0.5, %v8398_v58  ;;  %v147_v53 = vld [vmem:[%s10440_s1 + $0x30] sm:$0xff]  ;;  %v10482_v60 = vld [vmem:[#allocation2_spill] sm:$0xff] }
 0x34f   :  { %v6981_v39 = vpop.eup %6980  ;;  %v1698_v44 = vmul.f32 %v1646_v18, %v1282_v21  ;;  %v1699_v61 = vmul.f32 %v1647_v6, %v1283_v37  ;;  %v1648_v47 = vadd.f32 1.0, %v6975_v30  ;;  %1788 = vmatmul.mubr.f32.gmra.mrb[8].mxu1 %v145_v41  ;;  %v1285_v10 = vmul.f32 0.5, %v8380_v31  ;;  %v144_v31 = vld [vmem:[%s10440_s1 + $0x18] sm:$0xff]  ;;  %v151_v41 = vld [vmem:[%s10440_s1 + $0x50] sm:$0xff] }
 0x350   :  { %6349 = vmatpush1.bf16.msra.mxu1 %v6348_v20  ;;  %6986 = vtanh.f32 %v1550_v36  ;;  %v6357_v17 = vpack.c.bf16 %v1697_v19, %v1696_v38  ;;  %v1649_v42 = vadd.f32 1.0, %v8509_v55  ;;  %1792 = vmatprep.mubr.f32.mxu1 %v150_v14  ;;  %v1286_v58 = vmul.f32 0.5, %v8457_v52  ;;  %v152_v21 = vld [vmem:[%s10440_s1 + $0x58] sm:$0xff]  ;;  %v10483_v38 = vld [vmem:[#allocation3_spill] sm:$0xff]  ;;  %v10484_v37 = vld [vmem:[#allocation4_spill] sm:$0xff] }
 0x351   :  { %6350 = vmatprep.subr.bf16.mxu1 %v10481_v22  ;;  %v6360_v11 = vpack.c.bf16 %v1699_v61, %v1698_v44  ;;  %v1700_v56 = vmul.f32 %v1648_v47, %v1284_v27  ;;  %v1650_v30 = vadd.f32 1.0, %v6979_v54  ;;  %v1287_v20 = vmul.f32 0.5, %v8433_v13  ;;  %v10486_v6 = vld [vmem:[#allocation5_spill] sm:$0xff]  ;;  %v10487_v14 = vld [vmem:[#allocation6_spill] sm:$0xff]  ;;  %v10488_v54 = vld [vmem:[#allocation7_spill] sm:$0xff] }
 0x352   :  { %v1701_v12 = vmul.f32 %v1649_v42, %v1285_v10  ;;  %v1651_v57 = vadd.f32 1.0, %v6977_v1  ;;  %v1288_v46 = vmul.f32 0.5, %v8491_v23  ;;  %v1289_v29 = vmul.f32 0.5, %v8461_v16  ;;  %v10489_v36 = vld [vmem:[#allocation8_spill] sm:$0xff] }
 0x353   :  { %v6983_v55 = vpop.eup %6982  ;;  %v1702_v62 = vmul.f32 %v1650_v30, %v1286_v58  ;;  %v1653_v7 = vadd.f32 1.0, %v6981_v39  ;;  %1793 = vmatmul.mubr.f32.gmra.mrb[10].mxu1 %v149_v45  ;;  %v1291_v16 = vmul.f32 0.5, %v8500_v59  ;;  %v143_v59 = vld [vmem:[%s10440_s1 + $0x10] sm:$0xff]  ;;  %v10485_v18 = vmov 0.0   ;;  %v7146_v58 = vld [vmem:[%s10412_s3] sm:$0xff] }
 0x354   :  { %v6985_v28 = vpop.eup %6984  ;;  %6352 = vmatpush1.bf16.msra.mxu1 %v6351_v40  ;;  %v6363_v52 = vpack.c.bf16 %v1701_v12, %v1700_v56  ;;  %v1703_v2 = vmul.f32 %v1651_v57, %v1287_v20  ;;  %v1652_v35 = vadd.f32 1.0, %v6983_v55  ;;  %4631 = vmatprep.mubr.msk.f32.mxu1 %vm1708_vm2, %v144_v31  ;;  %v1290_v40 = vmul.f32 0.5, %v8528_v48  ;;  %v148_v48 = vld [vmem:[%s10440_s1 + $0x38] sm:$0xff]  ;;  %v8629_v12 = vpop.permute.xlu0 %470 }
 0x355   :  { %6353 = vmatprep.subr.bf16.mxu1 %v10481_v22  ;;  %v1705_v13 = vmul.f32 %v1653_v7, %v1289_v29  ;;  %v1655_v9 = vadd.f32 1.0, %v6985_v28  ;;  %10491 = vst [vmem:[#allocation57_spill] sm:$0xff] %v8629_v12  ;;  %v8638_v29 = vpop.permute.xlu1 %475 }
 0x356   :  { %v6366_v1 = vpack.c.bf16 %v1703_v2, %v1702_v62  ;;  %v1704_v24 = vmul.f32 %v1652_v35, %v1288_v46  ;;  %v7147_v62 = vld [vmem:[%s10412_s3 + $0x8] sm:$0xff]  ;;  %10492 = vst [vmem:[#allocation58_spill] sm:$0xff] %v8638_v29  ;;  %v7148_v35 = vld [vmem:[%s10412_s3 + $0x10] sm:$0xff] }
 0x357   :  { %v1707_v25 = vmul.f32 %v1655_v9, %v1291_v16  ;;  %v483_v9 = vld [vmem:[%s10252_s6] sm:$0xff]  ;;  %v485_v16 = vld [vmem:[%s10252_s6 + $0x10] sm:$0xff] }
 0x358   :  { %6355 = vmatpush1.bf16.msra.mxu1 %v6354_v0  ;;  %v6369_v23 = vpack.c.bf16 %v1705_v13, %v1704_v24  ;;  %v10490_v0 = vld [vmem:[#allocation9_spill] sm:$0xff] }
 0x359   :  { %6356 = vmatprep.subr.bf16.mxu1 %v10481_v22 }
 0x35a   :  { %v6987_v4 = vpop.eup %6986 }
 0x35b   :  { %v1654_v34 = vadd.f32 1.0, %v6987_v4 }
 0x35c   :  { %6358 = vmatpush1.bf16.msra.mxu1 %v6357_v17 }
 0x35d   :  { %6359 = vmatprep.subr.bf16.mxu1 %v10481_v22  ;;  %v1706_v15 = vmul.f32 %v1654_v34, %v1290_v40  ;;  %v486_v40 = vld [vmem:[%s10252_s6 + $0x18] sm:$0xff] }
 0x35e   :  { %v8674_v34 = vpack.c.bf16 %v486_v40, %v485_v16 }
 0x35f   :  { %v6372_v5 = vpack.c.bf16 %v1707_v25, %v1706_v15  ;;  %v487_v25 = vld [vmem:[%s10252_s6 + $0x20] sm:$0xff]  ;;  %v488_v15 = vld [vmem:[%s10252_s6 + $0x28] sm:$0xff] }
 0x360   :  { %6361 = vmatpush1.bf16.msra.mxu1 %v6360_v11  ;;  %10495 = vst [vmem:[#allocation61_spill] sm:$0xff] %v8674_v34 }
 0x361   :  { %6362 = vmatprep.subr.bf16.mxu1 %v10481_v22 }
 0x364   :  { %6364 = vmatpush1.bf16.msra.mxu1 %v6363_v52 }
 0x365   :  { %6365 = vmatprep.subr.bf16.mxu1 %v10481_v22 }
 0x368   :  { %6367 = vmatpush1.bf16.msra.mxu1 %v6366_v1  ;;  %v8649_v1 = vpop.permute.xlu0 %480 }
 0x369   :  { %6368 = vmatprep.subr.bf16.mxu1 %v10481_v22  ;;  %10493 = vst [vmem:[#allocation59_spill] sm:$0xff] %v8649_v1 }
 0x36c   :  { %6370 = vmatpush1.bf16.msra.mxu1 %v6369_v23  ;;  %v484_v23 = vld [vmem:[%s10252_s6 + $0x8] sm:$0xff] }
 0x36d   :  { %6371 = vmatprep.subr.bf16.mxu1 %v10481_v22  ;;  %v8668_v4 = vpack.c.bf16 %v484_v23, %v483_v9 }
 0x36f   :  { %10494 = vst [vmem:[#allocation60_spill] sm:$0xff] %v8668_v4 }
 0x370   :  { %6373 = vmatpush1.bf16.msra.mxu1 %v6372_v5  ;;  %v8684_v5 = vpack.c.bf16 %v488_v15, %v487_v25 }
 0x371   :  { %6374 = vmatprep.subr.bf16.mxu1 %v10481_v22 }
 0x372   :  { %10496 = vst [vmem:[#allocation62_spill] sm:$0xff] %v8684_v5 }
 0x373   :  { %1863 = vmatmul.mubr.f32.vlgmr.msra.gmra.mrb[12].mxu1 %v143_v59 }
 0x374   :  { %4632 = vmatprep.mubr.msk.f32.mxu1 %vm1708_vm2, %v148_v48  ;;  %6376 = vmatpush3.bf16.msra.mxu1 %v10482_v60 }
 0x375   :  { %6377 = vmatprep.subr.bf16.mxu1 %v10481_v22 }
 0x377   :  { %1868 = vmatmul.mubr.f32.gmra.mrb[14].mxu1 %v147_v53 }
 0x378   :  { %4633 = vmatprep.mubr.msk.f32.mxu1 %vm1708_vm2, %v152_v21  ;;  %6379 = vmatpush3.bf16.msra.mxu1 %v10483_v38 }
 0x379   :  { %6380 = vmatprep.subr.bf16.mxu1 %v10481_v22 }
 0x37b   :  { %1873 = vmatmul.mubr.f32.gmra.mrb[16].mxu1 %v151_v41 }
 0x37c   :  { %6382 = vmatpush3.bf16.msra.mxu1 %v10484_v37  ;;  %5470 = vmatprep.mubr.msk.f32.mxu1 %vm7222_vm0, %v10485_v18 }
 0x37d   :  { %6383 = vmatprep.subr.bf16.mxu1 %v10481_v22 }
 0x380   :  { %6385 = vmatpush3.bf16.msra.mxu1 %v10486_v6 }
 0x381   :  { %6386 = vmatprep.subr.bf16.mxu1 %v10481_v22 }
 0x384   :  { %6388 = vmatpush3.bf16.msra.mxu1 %v10487_v14 }
 0x385   :  { %6389 = vmatprep.subr.bf16.mxu1 %v10481_v22 }
 0x388   :  { %6391 = vmatpush3.bf16.msra.mxu1 %v10488_v54 }
 0x389   :  { %6392 = vmatprep.subr.bf16.mxu1 %v10481_v22 }
 0x38c   :  { %6394 = vmatpush3.bf16.msra.mxu1 %v10489_v36 }
 0x38d   :  { %6395 = vmatprep.subr.bf16.mxu1 %v10481_v22 }
 0x390   :  { %6397 = vmatpush3.bf16.msra.mxu1 %v10490_v0 }
 0x391   :  { %6422 = vmatprep.subr.bf16.mxu1 %v10481_v22 }
 0x41e   :  { %v4825_v19 = vpop.f32.mrb[6].mxu1 }
 0x41f   :  { %v4826_v39 = vpop.f32.mrb[7].mxu1 }
 0x420   :  { %v4827_v44 = vadd.f32 %v4826_v39, %v4825_v19 }
 0x422   :  { %v4828_v61 = vpop.f32.mrb[8].mxu1 }
 0x423   :  { %v4829_v27 = vpop.f32.mrb[9].mxu1 }
 0x424   :  { %v4830_v47 = vadd.f32 %v4829_v27, %v4828_v61 }
 0x426   :  { %v4831_v17 = vpop.f32.mrb[10].mxu1 }
 0x427   :  { %v4832_v10 = vpop.f32.mrb[11].mxu1 }
 0x428   :  { %v4833_v42 = vadd.f32 %v4832_v10, %v4831_v17  ;;  %v489_v10 = vld [vmem:[%s10252_s6 + $0x30] sm:$0xff] }
 0x446   :  { %v1864_v45 = vpop.f32.mrb[12].mxu1 }
 0x447   :  { %v1865_v11 = vadd.f32 %v4827_v44, %v1864_v45  ;;  %v1866_v56 = vpop.f32.mrb[13].mxu1  ;;  %v491_v45 = vld [vmem:[%s10252_s6 + $0x40] sm:$0xff] }
 0x448   :  { %v492_v56 = vld [vmem:[%s10252_s6 + $0x48] sm:$0xff] }
 0x449   :  { %v1878_v30 = vadd.f32 %v7146_v58, %v1865_v11  ;;  %v8725_v58 = vpack.c.bf16 %v492_v56, %v491_v45 }
 0x44a   :  { %v1869_v20 = vpop.f32.mrb[14].mxu1 }
 0x44b   :  { %v8632_v57 = vadd.f32 %v1878_v30, %v8629_v12  ;;  %v1870_v31 = vadd.f32 %v4830_v47, %v1869_v20  ;;  %v1871_v55 = vpop.f32.mrb[15].mxu1  ;;  %10498 = vst [vmem:[#allocation64_spill] sm:$0xff] %v8725_v58  ;;  %v493_v30 = vld [vmem:[%s10252_s6 + $0x50] sm:$0xff]  ;;  %v494_v20 = vld [vmem:[%s10252_s6 + $0x58] sm:$0xff]  ;;  %v10550_v12 = vld [vmem:[#allocation15_spill] sm:$0xff] }
 0x44c   :  { %v495_v55 = vld [vmem:[%s10252_s6 + $0x60] sm:$0xff] }
 0x44d   :  { %v1879_v46 = vadd.f32 %v7147_v62, %v1870_v31  ;;  %5471 = vmatmul.mubr.f32.vlgmr.msra.gmra.mrb[18].mxu1 %v8632_v57  ;;  %v8735_v31 = vpack.c.bf16 %v494_v20, %v493_v30  ;;  %v496_v62 = vld [vmem:[%s10252_s6 + $0x68] sm:$0xff] }
 0x44e   :  { %v1874_v7 = vpop.f32.mrb[16].mxu1  ;;  %5473 = vmatprep.mubr.msk.f32.mxu1 %vm7222_vm0, %v10485_v18  ;;  %6424 = vmatpush3.bf16.msra.mxu1 %v8668_v4 }
 0x44f   :  { %v1875_v28 = vadd.f32 %v4833_v42, %v1874_v7  ;;  %v1876_v52 = vpop.f32.mrb[17].mxu1  ;;  %v8643_v2 = vadd.f32 %v1879_v46, %v8638_v29  ;;  %6425 = vmatprep.subr.bf16.mxu1 %v10481_v22  ;;  %v490_v42 = vld [vmem:[%s10252_s6 + $0x38] sm:$0xff]  ;;  %10499 = vst [vmem:[#allocation65_spill] sm:$0xff] %v8735_v31  ;;  %v8745_v46 = vpack.c.bf16 %v496_v62, %v495_v55  ;;  %v497_v7 = vld [vmem:[%s10252_s6 + $0x70] sm:$0xff] }
 0x450   :  { %v8719_v11 = vpack.c.bf16 %v490_v42, %v489_v10 }
 0x451   :  { %v1880_v13 = vadd.f32 %v7148_v35, %v1875_v28  ;;  %5474 = vmatmul.mubr.f32.gmra.mrb[20].mxu1 %v8643_v2  ;;  %10500 = vst [vmem:[#allocation66_spill] sm:$0xff] %v8745_v46  ;;  %v498_v28 = vld [vmem:[%s10252_s6 + $0x78] sm:$0xff]  ;;  %v500_v35 = vld [vmem:[%s10253_s8] sm:$0xff] }
 0x452   :  { %5476 = vmatprep.mubr.msk.f32.mxu1 %vm7222_vm0, %v10485_v18  ;;  %6427 = vmatpush3.bf16.msra.mxu1 %v8674_v34  ;;  %10497 = vst [vmem:[#allocation63_spill] sm:$0xff] %v8719_v11  ;;  %v8755_v52 = vpack.c.bf16 %v498_v28, %v497_v7  ;;  %v503_v7 = vld [vmem:[%s10253_s8 + $0x18] sm:$0xff] }
 0x453   :  { %v8654_v24 = vadd.f32 %v1880_v13, %v8649_v1  ;;  %6428 = vmatprep.subr.bf16.mxu1 %v10481_v22  ;;  %v501_v13 = vld [vmem:[%s10253_s8 + $0x8] sm:$0xff] }
 0x454   :  { %10501 = vst [vmem:[#allocation67_spill] sm:$0xff] %v8755_v52  ;;  %v8764_v9 = vpack.c.bf16 %v501_v13, %v500_v35  ;;  %v505_v35 = vld [vmem:[%s10253_s8 + $0x28] sm:$0xff] }
 0x455   :  { %5477 = vmatmul.mubr.f32.gmra.mrb[22].mxu1 %v8654_v24 }
 0x456   :  { %5552 = vmatprep.mubr.msk.f32.mxu1 %vm7222_vm0, %v10485_v18  ;;  %6430 = vmatpush3.bf16.msra.mxu1 %v8684_v5  ;;  %10502 = vst [vmem:[#allocation68_spill] sm:$0xff] %v8764_v9 }
 0x457   :  { %6431 = vmatprep.subr.bf16.mxu1 %v10481_v22 }
 0x45a   :  { %6433 = vmatpush3.bf16.msra.mxu1 %v8719_v11 }
 0x45b   :  { %6434 = vmatprep.subr.bf16.mxu1 %v10481_v22 }
 0x45e   :  { %6436 = vmatpush3.bf16.msra.mxu1 %v8725_v58 }
 0x45f   :  { %6437 = vmatprep.subr.bf16.mxu1 %v10481_v22 }
 0x462   :  { %6439 = vmatpush3.bf16.msra.mxu1 %v8735_v31 }
 0x463   :  { %6440 = vmatprep.subr.bf16.mxu1 %v10481_v22 }
 0x466   :  { %6442 = vmatpush3.bf16.msra.mxu1 %v8745_v46 }
 0x467   :  { %6443 = vmatprep.subr.bf16.mxu1 %v10481_v22 }
 0x46a   :  { %6445 = vmatpush3.bf16.msra.mxu1 %v8755_v52 }
 0x46b   :  { %6470 = vmatprep.subr.bf16.mxu1 %v10481_v22 }
 0x520   :  { %v1950_v59 = vpop.f32.mrb[18].mxu1 }
 0x521   :  { %v8690_v48 = vsub.f32 %v8632_v57, %v1950_v59  ;;  %v5472_v53 = vpop.f32.mrb[19].mxu1 }
 0x523   :  { %v1967_v21 = vmul.f32 %v8690_v48, %v8690_v48 }
 0x524   :  { %v1955_v41 = vpop.f32.mrb[20].mxu1 }
 0x525   :  { %v8695_v19 = vsub.f32 %v8643_v2, %v1955_v41  ;;  %v5475_v39 = vpop.f32.mrb[21].mxu1  ;;  %5512 = vmatmul.mubr.f32.vlgmr.msra.gmra.mrb[58].mxu0 %v1967_v21 }
 0x526   :  { %5514 = vmatprep.mubr.msk.f32.mxu0 %vm7222_vm0, %v10485_v18  ;;  %6448 = vmatpush3.bf16.msra.mxu0 %v8764_v9 }
 0x527   :  { %v1968_v44 = vmul.f32 %v8695_v19, %v8695_v19  ;;  %6449 = vmatprep.subr.bf16.mxu0 %v10481_v22 }
 0x528   :  { %v1960_v61 = vpop.f32.mrb[22].mxu1 }
 0x529   :  { %v8702_v27 = vsub.f32 %v8654_v24, %v1960_v61  ;;  %v5478_v47 = vpop.f32.mrb[23].mxu1  ;;  %5515 = vmatmul.mubr.f32.gmra.mrb[60].mxu0 %v1968_v44  ;;  %v4634_v44 = vld [vmem:[%s10254_s12] ss:$0 sm:$0xff] }
 0x52a   :  { %5517 = vmatprep.mubr.msk.f32.mxu0 %vm7222_vm0, %v10485_v18  ;;  %v4635_v47 = vld [vmem:[%s10255_s13] ss:$0 sm:$0xff] }
 0x52b   :  { %v1969_v17 = vmul.f32 %v8702_v27, %v8702_v27 }
 0x52d   :  { %5518 = vmatmul.mubr.f32.gmra.mrb[62].mxu0 %v1969_v17 }
 0x52e   :  { %5593 = vmatprep.mubr.msk.f32.mxu0 %vm7222_vm0, %v10485_v18 }
 0x5f8   :  { %v2036_v23 = vpop.f32.mrb[58].mxu0 }
 0x5f9   :  { %v2037_v16 = vadd.f32 1e-05, %v2036_v23  ;;  %v5513_v40 = vpop.f32.mrb[59].mxu0  ;;  %v506_v23 = vld [vmem:[%s10253_s8 + $0x30] sm:$0xff] }
 0x5fb   :  { %6988 = vrsqrt.f32 %v2037_v16  ;;  %v507_v16 = vld [vmem:[%s10253_s8 + $0x38] sm:$0xff] }
 0x5fc   :  { %v2041_v25 = vpop.f32.mrb[60].mxu0  ;;  %v8810_v40 = vpack.c.bf16 %v507_v16, %v506_v23  ;;  %v525_v23 = vld [vmem:[%s10256_s14 + $0x40] sm:$0xff]  ;;  %v526_v16 = vld [vmem:[%s10256_s14 + $0x48] sm:$0xff] }
 0x5fd   :  { %v2042_v15 = vadd.f32 1e-05, %v2041_v25  ;;  %v5516_v59 = vpop.f32.mrb[61].mxu0  ;;  %v508_v25 = vld [vmem:[%s10253_s8 + $0x40] sm:$0xff] }
 0x5fe   :  { %10505 = vst [vmem:[#allocation71_spill] sm:$0xff] %v8810_v40 }
 0x5ff   :  { %6990 = vrsqrt.f32 %v2042_v15  ;;  %v509_v15 = vld [vmem:[%s10253_s8 + $0x48] sm:$0xff] }
 0x600   :  { %v2046_v53 = vpop.f32.mrb[62].mxu0  ;;  %v8820_v59 = vpack.c.bf16 %v509_v15, %v508_v25  ;;  %v8900_v25 = vpack.c.bf16 %v526_v16, %v525_v23  ;;  %v527_v15 = vld [vmem:[%s10256_s14 + $0x50] sm:$0xff] }
 0x601   :  { %v2047_v21 = vadd.f32 1e-05, %v2046_v53  ;;  %v5519_v41 = vpop.f32.mrb[63].mxu0  ;;  %v510_v53 = vld [vmem:[%s10253_s8 + $0x50] sm:$0xff] }
 0x602   :  { %10506 = vst [vmem:[#allocation72_spill] sm:$0xff] %v8820_v59  ;;  %10514 = vst [vmem:[#allocation80_spill] sm:$0xff] %v8900_v25 }
 0x603   :  { %6992 = vrsqrt.f32 %v2047_v21  ;;  %v511_v21 = vld [vmem:[%s10253_s8 + $0x58] sm:$0xff] }
 0x604   :  { %v8830_v41 = vpack.c.bf16 %v511_v21, %v510_v53  ;;  %v528_v53 = vld [vmem:[%s10256_s14 + $0x58] sm:$0xff] }
 0x605   :  { %v6989_v39 = vpop.eup %6988  ;;  %v8910_v21 = vpack.c.bf16 %v528_v53, %v527_v15 }
 0x606   :  { %v2053_v61 = vmul.f32 %v6989_v39, %v8690_v48  ;;  %10507 = vst [vmem:[#allocation73_spill] sm:$0xff] %v8830_v41  ;;  %v512_v39 = vld [vmem:[%s10253_s8 + $0x60] sm:$0xff] }
 0x607   :  { %10515 = vst [vmem:[#allocation81_spill] sm:$0xff] %v8910_v21 }
 0x608   :  { %v2062_v17 = vmul.f32 %v4634_v44, %v2053_v61 }
 0x609   :  { %v6991_v10 = vpop.eup %6990 }
 0x60a   :  { %v2071_v42 = vadd.f32 %v4635_v47, %v2062_v17  ;;  %v2054_v45 = vmul.f32 %v6991_v10, %v8695_v19  ;;  %v502_v19 = vld [vmem:[%s10253_s8 + $0x10] sm:$0xff]  ;;  %v515_v17 = vld [vmem:[%s10253_s8 + $0x78] sm:$0xff] }
 0x60b   :  { %v8794_v28 = vpack.c.bf16 %v503_v7, %v502_v19  ;;  %v523_v7 = vld [vmem:[%s10256_s14 + $0x30] sm:$0xff] }
 0x60c   :  { %5553 = vmatmul.mubr.f32.vlgmr.msra.gmra.mrb[24].mxu1 %v2071_v42  ;;  %v2063_v56 = vmul.f32 %v4634_v44, %v2054_v45  ;;  %v517_v42 = vld [vmem:[%s10256_s14] sm:$0xff]  ;;  %v518_v45 = vld [vmem:[%s10256_s14 + $0x8] sm:$0xff] }
 0x60d   :  { %v6993_v30 = vpop.eup %6992  ;;  %5555 = vmatprep.mubr.msk.f32.mxu1 %vm7222_vm0, %v10485_v18  ;;  %10503 = vst [vmem:[#allocation69_spill] sm:$0xff] %v8794_v28  ;;  %6451 = vmatpush3.bf16.msra.mxu0 %v8794_v28 }
 0x60e   :  { %v2072_v20 = vadd.f32 %v4635_v47, %v2063_v56  ;;  %v2055_v55 = vmul.f32 %v6993_v30, %v8702_v27  ;;  %v504_v27 = vld [vmem:[%s10253_s8 + $0x20] sm:$0xff]  ;;  %6452 = vmatprep.subr.bf16.mxu0 %v10481_v22  ;;  %v519_v56 = vld [vmem:[%s10256_s14 + $0x10] sm:$0xff]  ;;  %v8862_v30 = vpack.c.bf16 %v518_v45, %v517_v42 }
 0x60f   :  { %v8800_v13 = vpack.c.bf16 %v505_v35, %v504_v27  ;;  %v524_v27 = vld [vmem:[%s10256_s14 + $0x38] sm:$0xff] }
 0x610   :  { %5556 = vmatmul.mubr.f32.gmra.mrb[26].mxu1 %v2072_v20  ;;  %v2064_v48 = vmul.f32 %v4634_v44, %v2055_v55  ;;  %v513_v44 = vld [vmem:[%s10253_s8 + $0x68] sm:$0xff]  ;;  %10510 = vst [vmem:[#allocation76_spill] sm:$0xff] %v8862_v30  ;;  %v520_v20 = vld [vmem:[%s10256_s14 + $0x18] sm:$0xff]  ;;  %v8890_v35 = vpack.c.bf16 %v524_v27, %v523_v7 }
 0x611   :  { %5558 = vmatprep.mubr.msk.f32.mxu1 %vm7222_vm0, %v10485_v18  ;;  %10504 = vst [vmem:[#allocation70_spill] sm:$0xff] %v8800_v13  ;;  %6454 = vmatpush3.bf16.msra.mxu0 %v8800_v13  ;;  %v8840_v61 = vpack.c.bf16 %v513_v44, %v512_v39  ;;  %v8869_v55 = vpack.c.bf16 %v520_v20, %v519_v56  ;;  %v529_v39 = vld [vmem:[%s10256_s14 + $0x60] sm:$0xff]  ;;  %v530_v44 = vld [vmem:[%s10256_s14 + $0x68] sm:$0xff] }
 0x612   :  { %v2073_v62 = vadd.f32 %v4635_v47, %v2064_v48  ;;  %6455 = vmatprep.subr.bf16.mxu0 %v10481_v22  ;;  %v514_v47 = vld [vmem:[%s10253_s8 + $0x70] sm:$0xff]  ;;  %6472 = vmatpush3.bf16.msra.mxu1 %v8862_v30  ;;  %v521_v48 = vld [vmem:[%s10256_s14 + $0x20] sm:$0xff]  ;;  %10513 = vst [vmem:[#allocation79_spill] sm:$0xff] %v8890_v35 }
 0x613   :  { %10508 = vst [vmem:[#allocation74_spill] sm:$0xff] %v8840_v61  ;;  %v8850_v10 = vpack.c.bf16 %v515_v17, %v514_v47  ;;  %10511 = vst [vmem:[#allocation77_spill] sm:$0xff] %v8869_v55  ;;  %6473 = vmatprep.subr.bf16.mxu1 %v10481_v22  ;;  %v8920_v47 = vpack.c.bf16 %v530_v44, %v529_v39  ;;  %v4636_v17 = vld [vmem:[%s10257_s7] ss:$0 sm:$0xff] }
 0x614   :  { %5559 = vmatmul.mubr.f32.gmra.mrb[28].mxu1 %v2073_v62  ;;  %v522_v62 = vld [vmem:[%s10256_s14 + $0x28] sm:$0xff] }
 0x615   :  { %5634 = vmatprep.mubr.msk.f32.mxu1 %vm7222_vm0, %v10485_v18  ;;  %6457 = vmatpush3.bf16.msra.mxu0 %v8810_v40  ;;  %10509 = vst [vmem:[#allocation75_spill] sm:$0xff] %v8850_v10  ;;  %v8880_v19 = vpack.c.bf16 %v522_v62, %v521_v48  ;;  %10516 = vst [vmem:[#allocation82_spill] sm:$0xff] %v8920_v47 }
 0x616   :  { %6458 = vmatprep.subr.bf16.mxu0 %v10481_v22  ;;  %6475 = vmatpush3.bf16.msra.mxu1 %v8869_v55 }
 0x617   :  { %10512 = vst [vmem:[#allocation78_spill] sm:$0xff] %v8880_v19  ;;  %6476 = vmatprep.subr.bf16.mxu1 %v10481_v22 }
 0x619   :  { %6460 = vmatpush3.bf16.msra.mxu0 %v8820_v59 }
 0x61a   :  { %6461 = vmatprep.subr.bf16.mxu0 %v10481_v22  ;;  %6478 = vmatpush3.bf16.msra.mxu1 %v8880_v19 }
 0x61b   :  { %6479 = vmatprep.subr.bf16.mxu1 %v10481_v22 }
 0x61d   :  { %6463 = vmatpush3.bf16.msra.mxu0 %v8830_v41 }
 0x61e   :  { %6464 = vmatprep.subr.bf16.mxu0 %v10481_v22  ;;  %6481 = vmatpush3.bf16.msra.mxu1 %v8890_v35 }
 0x61f   :  { %6482 = vmatprep.subr.bf16.mxu1 %v10481_v22 }
 0x621   :  { %6466 = vmatpush3.bf16.msra.mxu0 %v8840_v61 }
 0x622   :  { %6467 = vmatprep.subr.bf16.mxu0 %v10481_v22  ;;  %6484 = vmatpush3.bf16.msra.mxu1 %v8900_v25 }
 0x623   :  { %6485 = vmatprep.subr.bf16.mxu1 %v10481_v22 }
 0x625   :  { %6469 = vmatpush3.bf16.msra.mxu0 %v8850_v10 }
 0x626   :  { %6494 = vmatprep.subr.bf16.mxu0 %v10481_v22  ;;  %6487 = vmatpush3.bf16.msra.mxu1 %v8910_v21 }
 0x627   :  { %6488 = vmatprep.subr.bf16.mxu1 %v10481_v22 }
 0x62a   :  { %6490 = vmatpush3.bf16.msra.mxu1 %v8920_v47 }
 0x62b   :  { %6491 = vmatprep.subr.bf16.mxu1 %v10481_v22 }
 0x6df   :  { %v2146_v42 = vpop.f32.mrb[24].mxu1 }
 0x6e0   :  { %v2147_v45 = vadd.f32 %v4636_v17, %v2146_v42  ;;  %v5554_v56 = vpop.f32.mrb[25].mxu1 }
 0x6e2   :  { %v2163_v20 = vmul.f32 0.044715, %v2147_v45 }
 0x6e3   :  { %v2151_v48 = vpop.f32.mrb[26].mxu1 }
 0x6e4   :  { %v2166_v62 = vmul.f32 %v2163_v20, %v2147_v45  ;;  %v2152_v7 = vadd.f32 %v4636_v17, %v2151_v48  ;;  %v5557_v27 = vpop.f32.mrb[27].mxu1 }
 0x6e6   :  { %v2169_v23 = vmul.f32 %v2166_v62, %v2147_v45  ;;  %v2164_v16 = vmul.f32 0.044715, %v2152_v7  ;;  %v2160_v62 = vmul.f32 0.5, %v2147_v45 }
 0x6e7   :  { %v2156_v15 = vpop.f32.mrb[28].mxu1 }
 0x6e8   :  { %v2172_v53 = vadd.f32 %v2169_v23, %v2147_v45  ;;  %v2167_v39 = vmul.f32 %v2164_v16, %v2152_v7  ;;  %v2157_v44 = vadd.f32 %v4636_v17, %v2156_v15  ;;  %v5560_v47 = vpop.f32.mrb[29].mxu1  ;;  %v2161_v17 = vmul.f32 0.5, %v2152_v7  ;;  %v535_v16 = vld [vmem:[%s10258_s16 + $0x8] sm:$0xff] }
 0x6ea   :  { %v2175_v21 = vmul.f32 0.7978846, %v2172_v53  ;;  %v2165_v25 = vmul.f32 0.044715, %v2157_v44  ;;  %v2170_v35 = vmul.f32 %v2167_v39, %v2152_v7  ;;  %v4637_v53 = vld [vmem:[%s10259_s9] ss:$0 sm:$0xff] }
 0x6ec   :  { %6994 = vtanh.f32 %v2175_v21  ;;  %v2168_v19 = vmul.f32 %v2165_v25, %v2157_v44  ;;  %v2173_v55 = vadd.f32 %v2170_v35, %v2152_v7  ;;  %v532_v35 = vld [vmem:[%s10256_s14 + $0x78] sm:$0xff]  ;;  %v534_v7 = vld [vmem:[%s10258_s16] sm:$0xff] }
 0x6ed   :  { %v8950_v15 = vpack.c.bf16 %v535_v16, %v534_v7  ;;  %v542_v7 = vld [vmem:[%s10258_s16 + $0x40] sm:$0xff]  ;;  %v543_v16 = vld [vmem:[%s10258_s16 + $0x48] sm:$0xff] }
 0x6ee   :  { %v2176_v42 = vmul.f32 0.7978846, %v2173_v55  ;;  %v2171_v56 = vmul.f32 %v2168_v19, %v2157_v44  ;;  %v2162_v55 = vmul.f32 0.5, %v2157_v44 }
 0x6ef   :  { %10518 = vst [vmem:[#allocation84_spill] sm:$0xff] %v8950_v15 }
 0x6f0   :  { %6996 = vtanh.f32 %v2176_v42  ;;  %v2174_v30 = vadd.f32 %v2171_v56, %v2157_v44 }
 0x6f2   :  { %v2177_v20 = vmul.f32 0.7978846, %v2174_v30 }
 0x6f4   :  { %6998 = vtanh.f32 %v2177_v20 }
 0x6f6   :  { %v6995_v48 = vpop.eup %6994 }
 0x6f7   :  { %v2181_v27 = vadd.f32 1.0, %v6995_v48 }
 0x6f9   :  { %v2184_v10 = vmul.f32 %v2181_v27, %v2160_v62 }
 0x6fa   :  { %v6997_v23 = vpop.eup %6996 }
 0x6fb   :  { %5594 = vmatmul.mubr.f32.vlgmr.msra.gmra.mrb[64].mxu0 %v2184_v10  ;;  %v2182_v47 = vadd.f32 1.0, %v6997_v23  ;;  %v531_v10 = vld [vmem:[%s10256_s14 + $0x70] sm:$0xff] }
 0x6fc   :  { %5596 = vmatprep.mubr.msk.f32.mxu0 %vm7222_vm0, %v10485_v18  ;;  %v8940_v45 = vpack.c.bf16 %v532_v35, %v531_v10  ;;  %6496 = vmatpush3.bf16.msra.mxu0 %v8950_v15  ;;  %v541_v10 = vld [vmem:[%s10258_s16 + $0x38] sm:$0xff] }
 0x6fd   :  { %v2185_v21 = vmul.f32 %v2182_v47, %v2161_v17  ;;  %6497 = vmatprep.subr.bf16.mxu0 %v10481_v22  ;;  %v537_v47 = vld [vmem:[%s10258_s16 + $0x18] sm:$0xff] }
 0x6fe   :  { %v6999_v25 = vpop.eup %6998  ;;  %10517 = vst [vmem:[#allocation83_spill] sm:$0xff] %v8940_v45  ;;  %6493 = vmatpush3.bf16.msra.mxu1 %v8940_v45 }
 0x6ff   :  { %5597 = vmatmul.mubr.f32.gmra.mrb[66].mxu0 %v2185_v21  ;;  %v2183_v19 = vadd.f32 1.0, %v6999_v25  ;;  %6518 = vmatprep.subr.bf16.mxu1 %v10481_v22  ;;  %v538_v21 = vld [vmem:[%s10258_s16 + $0x20] sm:$0xff] }
 0x700   :  { %5599 = vmatprep.mubr.msk.f32.mxu0 %vm7222_vm0, %v10485_v18 }
 0x701   :  { %v2186_v30 = vmul.f32 %v2183_v19, %v2162_v55  ;;  %v539_v55 = vld [vmem:[%s10258_s16 + $0x28] sm:$0xff] }
 0x702   :  { %v9008_v19 = vpack.c.bf16 %v539_v55, %v538_v21 }
 0x703   :  { %5600 = vmatmul.mubr.f32.gmra.mrb[68].mxu0 %v2186_v30  ;;  %v540_v30 = vld [vmem:[%s10258_s16 + $0x30] sm:$0xff] }
 0x704   :  { %5675 = vmatprep.mubr.msk.f32.mxu0 %vm7222_vm0, %v10485_v18  ;;  %10522 = vst [vmem:[#allocation88_spill] sm:$0xff] %v9008_v19  ;;  %v9018_v35 = vpack.c.bf16 %v541_v10, %v540_v30 }
 0x706   :  { %10523 = vst [vmem:[#allocation89_spill] sm:$0xff] %v9018_v35 }
 0x7ce   :  { %v2253_v39 = vpop.f32.mrb[64].mxu0 }
 0x7cf   :  { %v2267_v44 = vadd.f32 %v2253_v39, %v8632_v57  ;;  %v5595_v42 = vpop.f32.mrb[65].mxu0  ;;  %v544_v39 = vld [vmem:[%s10258_s16 + $0x50] sm:$0xff] }
 0x7d1   :  { %v8958_v56 = vadd.f32 %v4637_v53, %v2267_v44  ;;  %v545_v44 = vld [vmem:[%s10258_s16 + $0x58] sm:$0xff] }
 0x7d2   :  { %v2258_v20 = vpop.f32.mrb[66].mxu0  ;;  %v9038_v42 = vpack.c.bf16 %v545_v44, %v544_v39 }
 0x7d3   :  { %10519 = vst [vmem:[#allocation85_spill] sm:$0xff] %v8958_v56  ;;  %v2268_v48 = vadd.f32 %v2258_v20, %v8643_v2  ;;  %v5598_v62 = vpop.f32.mrb[67].mxu0  ;;  %5635 = vmatmul.mubr.f32.vlgmr.msra.gmra.mrb[30].mxu1 %v8958_v56  ;;  %v546_v20 = vld [vmem:[%s10258_s16 + $0x60] sm:$0xff] }
 0x7d4   :  { %6520 = vmatpush3.bf16.msra.mxu1 %v10482_v60  ;;  %5637 = vmatprep.mubr.msk.f32.mxu1 %vm7222_vm0, %v10485_v18  ;;  %10525 = vst [vmem:[#allocation91_spill] sm:$0xff] %v9038_v42 }
 0x7d5   :  { %v8965_v27 = vadd.f32 %v4637_v53, %v2268_v48  ;;  %6521 = vmatprep.subr.bf16.mxu1 %v10481_v22  ;;  %v547_v48 = vld [vmem:[%s10258_s16 + $0x68] sm:$0xff] }
 0x7d6   :  { %v2263_v23 = vpop.f32.mrb[68].mxu0  ;;  %v9048_v62 = vpack.c.bf16 %v547_v48, %v546_v20 }
 0x7d7   :  { %10520 = vst [vmem:[#allocation86_spill] sm:$0xff] %v8965_v27  ;;  %v2269_v57 = vadd.f32 %v2263_v23, %v8654_v24  ;;  %v5601_v17 = vpop.f32.mrb[69].mxu0  ;;  %5638 = vmatmul.mubr.f32.gmra.mrb[32].mxu1 %v8965_v27  ;;  %v536_v24 = vld [vmem:[%s10258_s16 + $0x10] sm:$0xff] }
 0x7d8   :  { %6523 = vmatpush3.bf16.msra.mxu1 %v10483_v38  ;;  %5640 = vmatprep.mubr.msk.f32.mxu1 %vm7222_vm0, %v10485_v18  ;;  %v9002_v25 = vpack.c.bf16 %v537_v47, %v536_v24  ;;  %10526 = vst [vmem:[#allocation92_spill] sm:$0xff] %v9048_v62  ;;  %v548_v23 = vld [vmem:[%s10258_s16 + $0x70] sm:$0xff] }
 0x7d9   :  { %v2278_v2 = vadd.f32 %v4637_v53, %v2269_v57  ;;  %6524 = vmatprep.subr.bf16.mxu1 %v10481_v22  ;;  %v9028_v53 = vpack.c.bf16 %v543_v16, %v542_v7  ;;  %v549_v57 = vld [vmem:[%s10258_s16 + $0x78] sm:$0xff] }
 0x7da   :  { %10521 = vst [vmem:[#allocation87_spill] sm:$0xff] %v9002_v25  ;;  %6499 = vmatpush3.bf16.msra.mxu0 %v9002_v25  ;;  %v9058_v17 = vpack.c.bf16 %v549_v57, %v548_v23 }
 0x7db   :  { %5641 = vmatmul.mubr.f32.gmra.mrb[34].mxu1 %v2278_v2  ;;  %6500 = vmatprep.subr.bf16.mxu0 %v10481_v22  ;;  %10524 = vst [vmem:[#allocation90_spill] sm:$0xff] %v9028_v53  ;;  %v4638_v2 = vld [vmem:[%s10260_s15] ss:$0 sm:$0xff] }
 0x7dc   :  { %6526 = vmatpush3.bf16.msra.mxu1 %v10484_v37  ;;  %5716 = vmatprep.mubr.msk.f32.mxu1 %vm7222_vm0, %v10485_v18  ;;  %10527 = vst [vmem:[#allocation93_spill] sm:$0xff] %v9058_v17 }
 0x7dd   :  { %6527 = vmatprep.subr.bf16.mxu1 %v10481_v22 }
 0x7de   :  { %6502 = vmatpush3.bf16.msra.mxu0 %v9008_v19 }
 0x7df   :  { %6503 = vmatprep.subr.bf16.mxu0 %v10481_v22 }
 0x7e0   :  { %6529 = vmatpush3.bf16.msra.mxu1 %v10486_v6 }
 0x7e1   :  { %6530 = vmatprep.subr.bf16.mxu1 %v10481_v22 }
 0x7e2   :  { %6505 = vmatpush3.bf16.msra.mxu0 %v9018_v35 }
 0x7e3   :  { %6506 = vmatprep.subr.bf16.mxu0 %v10481_v22 }
 0x7e4   :  { %6532 = vmatpush3.bf16.msra.mxu1 %v10487_v14 }
 0x7e5   :  { %6533 = vmatprep.subr.bf16.mxu1 %v10481_v22 }
 0x7e6   :  { %6508 = vmatpush3.bf16.msra.mxu0 %v9028_v53 }
 0x7e7   :  { %6509 = vmatprep.subr.bf16.mxu0 %v10481_v22 }
 0x7e8   :  { %6535 = vmatpush3.bf16.msra.mxu1 %v10488_v54 }
 0x7e9   :  { %6536 = vmatprep.subr.bf16.mxu1 %v10481_v22 }
 0x7ea   :  { %6511 = vmatpush3.bf16.msra.mxu0 %v9038_v42 }
 0x7eb   :  { %6512 = vmatprep.subr.bf16.mxu0 %v10481_v22 }
 0x7ec   :  { %6538 = vmatpush3.bf16.msra.mxu1 %v10489_v36 }
 0x7ed   :  { %6539 = vmatprep.subr.bf16.mxu1 %v10481_v22 }
 0x7ee   :  { %6514 = vmatpush3.bf16.msra.mxu0 %v9048_v62 }
 0x7ef   :  { %6515 = vmatprep.subr.bf16.mxu0 %v10481_v22 }
 0x7f0   :  { %6541 = vmatpush3.bf16.msra.mxu1 %v10490_v0 }
 0x7f2   :  { %6517 = vmatpush3.bf16.msra.mxu0 %v9058_v17 }
 0x7f3   :  { %5717 = vmatmul.mubr.f32.vlgmr.msra.gmra.mrb[36].mxu1 %v8958_v56  ;;  %6542 = vmatprep.subr.bf16.mxu0 %v10481_v22 }
 0x7f4   :  { %5719 = vmatprep.mubr.msk.f32.mxu1 %vm7222_vm0, %v10485_v18 }
 0x7f7   :  { %5720 = vmatmul.mubr.f32.gmra.mrb[38].mxu1 %v8965_v27 }
 0x7f8   :  { %5722 = vmatprep.mubr.msk.f32.mxu1 %vm7222_vm0, %v10485_v18 }
 0x8a6   :  { %v2351_v24 = vpop.f32.mrb[30].mxu1 }
 0x8a7   :  { %v2352_v47 = vadd.f32 %v4638_v2, %v2351_v24  ;;  %v5636_v21 = vpop.f32.mrb[31].mxu1 }
 0x8a9   :  { %v2368_v55 = vmul.f32 0.044715, %v2352_v47 }
 0x8aa   :  { %v2356_v30 = vpop.f32.mrb[32].mxu1 }
 0x8ab   :  { %v2371_v10 = vmul.f32 %v2368_v55, %v2352_v47  ;;  %v2357_v7 = vadd.f32 %v4638_v2, %v2356_v30  ;;  %v5639_v16 = vpop.f32.mrb[33].mxu1 }
 0x8ad   :  { %v2374_v39 = vmul.f32 %v2371_v10, %v2352_v47  ;;  %v2369_v44 = vmul.f32 0.044715, %v2357_v7  ;;  %v2365_v10 = vmul.f32 0.5, %v2352_v47 }
 0x8ae   :  { %v2361_v20 = vpop.f32.mrb[34].mxu1 }
 0x8af   :  { %v2377_v48 = vadd.f32 %v2374_v39, %v2352_v47  ;;  %v2372_v23 = vmul.f32 %v2369_v44, %v2357_v7  ;;  %v2362_v57 = vadd.f32 %v4638_v2, %v2361_v20  ;;  %v5642_v17 = vpop.f32.mrb[35].mxu1  ;;  %v2366_v2 = vmul.f32 0.5, %v2357_v7 }
 0x8b1   :  { %v2380_v62 = vmul.f32 0.7978846, %v2377_v48  ;;  %v2370_v42 = vmul.f32 0.044715, %v2362_v57  ;;  %v2375_v53 = vmul.f32 %v2372_v23, %v2357_v7 }
 0x8b3   :  { %7000 = vtanh.f32 %v2380_v62  ;;  %v2373_v35 = vmul.f32 %v2370_v42, %v2362_v57  ;;  %v2378_v19 = vadd.f32 %v2375_v53, %v2357_v7 }
 0x8b5   :  { %v2381_v24 = vmul.f32 0.7978846, %v2378_v19  ;;  %v2376_v21 = vmul.f32 %v2373_v35, %v2362_v57 }
 0x8b7   :  { %7002 = vtanh.f32 %v2381_v24  ;;  %v2379_v25 = vadd.f32 %v2376_v21, %v2362_v57 }
 0x8b9   :  { %v2382_v55 = vmul.f32 0.7978846, %v2379_v25  ;;  %v2367_v25 = vmul.f32 0.5, %v2362_v57  ;;  %v555_v57 = vlaneseq }
 0x8bb   :  { %7004 = vtanh.f32 %v2382_v55  ;;  %v556_v21 = vshrl.u32 %v555_v57, 7 }
 0x8bd   :  { %v7001_v30 = vpop.eup %7000 }
 0x8be   :  { %v2386_v16 = vadd.f32 1.0, %v7001_v30 }
 0x8c0   :  { %v2389_v15 = vmul.f32 %v2386_v16, %v2365_v10  ;;  %v558_v10 = vadd.s32 16, %v556_v21  ;;  %v7150_v21 = vld [vmem:[%s10416_s25] ss:$0 sm:$0xff] }
 0x8c1   :  { %v7003_v39 = vpop.eup %7002 }
 0x8c2   :  { %5676 = vmatmul.mubr.f32.vlgmr.msra.gmra.mrb[70].mxu0 %v2389_v15  ;;  %v2387_v17 = vadd.f32 1.0, %v7003_v39  ;;  %v4639_v39 = vld [vmem:[%s10261_s17] ss:$0 sm:$0xff]  ;;  %vm564_vm3 = vcmp.ge.s32.totalorder %v558_v10, 20 }
 0x8c3   :  { %6544 = vmatpush3.bf16.msra.mxu0 %v10482_v60  ;;  %5678 = vmatprep.mubr.msk.f32.mxu0 %vm7222_vm0, %v10485_v18  ;;  %v7151_v10 = vld [vmem:[%s10417_s26] ss:$0 sm:$0xff] }
 0x8c4   :  { %6545 = vmatprep.subr.bf16.mxu0 %v10481_v22  ;;  %v2390_v19 = vmul.f32 %v2387_v17, %v2366_v2 }
 0x8c5   :  { %v7005_v35 = vpop.eup %7004 }
 0x8c6   :  { %v2550_v53 = vpop.f32.mrb[36].mxu1  ;;  %5679 = vmatmul.mubr.f32.gmra.mrb[72].mxu0 %v2390_v19  ;;  %v2388_v42 = vadd.f32 1.0, %v7005_v35 }
 0x8c7   :  { %v5718_v62 = vpop.f32.mrb[37].mxu1  ;;  %6547 = vmatpush3.bf16.msra.mxu0 %v10483_v38  ;;  %5681 = vmatprep.mubr.msk.f32.mxu0 %vm7222_vm0, %v10485_v18  ;;  %v2564_v44 = vsub.f32 %v8958_v56, %v2550_v53  ;;  %v7149_v53 = vld [vmem:[%s10414_s27] sm:$0xff] }
 0x8c8   :  { %6548 = vmatprep.subr.bf16.mxu0 %v10481_v22  ;;  %v2391_v15 = vmul.f32 %v2388_v42, %v2367_v25 }
 0x8c9   :  { %v2567_v20 = vmul.f32 %v2564_v44, %v2564_v44 }
 0x8ca   :  { %v2555_v47 = vpop.f32.mrb[38].mxu1  ;;  %5682 = vmatmul.mubr.f32.gmra.mrb[74].mxu0 %v2391_v15 }
 0x8cb   :  { %v5721_v7 = vpop.f32.mrb[39].mxu1  ;;  %6550 = vmatpush3.bf16.msra.mxu0 %v10484_v37  ;;  %5757 = vmatprep.mubr.msk.f32.mxu0 %vm7222_vm0, %v10485_v18  ;;  %v2565_v48 = vsub.f32 %v8965_v27, %v2555_v47 }
 0x8cc   :  { %6551 = vmatprep.subr.bf16.mxu0 %v10481_v22 }
 0x8cd   :  { %v2568_v23 = vmul.f32 %v2565_v48, %v2565_v48 }
 0x8cf   :  { %6553 = vmatpush3.bf16.msra.mxu0 %v10486_v6 }
 0x8d0   :  { %6554 = vmatprep.subr.bf16.mxu0 %v10481_v22 }
 0x8d3   :  { %6556 = vmatpush3.bf16.msra.mxu0 %v10487_v14 }
 0x8d4   :  { %6557 = vmatprep.subr.bf16.mxu0 %v10481_v22 }
 0x8d7   :  { %6559 = vmatpush3.bf16.msra.mxu0 %v10488_v54 }
 0x8d8   :  { %6560 = vmatprep.subr.bf16.mxu0 %v10481_v22 }
 0x8db   :  { %6562 = vmatpush3.bf16.msra.mxu0 %v10489_v36 }
 0x8dc   :  { %6563 = vmatprep.subr.bf16.mxu0 %v10481_v22 }
 0x8df   :  { %6565 = vmatpush3.bf16.msra.mxu0 %v10490_v0 }
 0x8e2   :  { %5758 = vmatmul.mubr.f32.vlgmr.msra.gmra.mrb[76].mxu0 %v2567_v20 }
 0x8e3   :  { %5760 = vmatprep.mubr.msk.f32.mxu0 %vm7222_vm0, %v10485_v18 }
 0x8e6   :  { %5761 = vmatmul.mubr.f32.gmra.mrb[78].mxu0 %v2568_v23 }
 0x8e7   :  { %5763 = vmatprep.mubr.msk.f32.mxu0 %vm7222_vm0, %v10485_v18 }
 0x995   :  { %v2464_v24 = vpop.f32.mrb[70].mxu0 }
 0x996   :  { %v5677_v55 = vpop.f32.mrb[71].mxu0 }
 0x999   :  { %v2469_v30 = vpop.f32.mrb[72].mxu0 }
 0x99a   :  { %v5680_v16 = vpop.f32.mrb[73].mxu0 }
 0x99d   :  { %v2474_v2 = vpop.f32.mrb[74].mxu0 }
 0x99e   :  { %v2475_v17 = vadd.f32 %v4639_v39, %v2474_v2  ;;  %v5683_v19 = vpop.f32.mrb[75].mxu0 }
 0x9a0   :  { %5723 = vmatmul.mubr.msk.f32.gmra.mrb[40].mxu1 %vm564_vm3, %v2475_v17  ;;  %v9096_v35 = vsel %vm564_vm3, %v2475_v17, 0.0 }
 0x9a1   :  { %10528 = vst [vmem:[#allocation94_spill] sm:$0xff] %v9096_v35  ;;  %5772 = vmatprep.mubr.msk.f32.mxu1 %vm758_vm1, %v7149_v53  ;;  %v7152_v53 = vld [vmem:[%s10440_s1 + $0x8] sm:$0xff] }
 0x9b5   :  { %v2636_v25 = vpop.f32.mrb[76].mxu0 }
 0x9b6   :  { %v2637_v42 = vadd.f32 1e-05, %v2636_v25  ;;  %v5759_v62 = vpop.f32.mrb[77].mxu0 }
 0x9b8   :  { %7006 = vrsqrt.f32 %v2637_v42 }
 0x9b9   :  { %v2641_v15 = vpop.f32.mrb[78].mxu0 }
 0x9ba   :  { %v2642_v47 = vadd.f32 1e-05, %v2641_v15  ;;  %v5762_v7 = vpop.f32.mrb[79].mxu0 }
 0x9bc   :  { %7008 = vrsqrt.f32 %v2642_v47 }
 0x9c2   :  { %v7007_v20 = vpop.eup %7006 }
 0x9c3   :  { %v2653_v23 = vmul.f32 %v7007_v20, %v2564_v44 }
 0x9c5   :  { %v2656_v55 = vmul.f32 %v7150_v21, %v2653_v23  ;;  %v7153_v23 = vld [vmem:[%s10414_s27 + $0x8] sm:$0xff] }
 0x9c6   :  { %v7009_v57 = vpop.eup %7008 }
 0x9c7   :  { %v2654_v24 = vmul.f32 %v7009_v57, %v2565_v48  ;;  %v2659_v16 = vadd.f32 %v7151_v10, %v2656_v55  ;;  %v7154_v57 = vld [vmem:[%s10414_s27 + $0x10] sm:$0xff]  ;;  %v7157_v55 = vld [vmem:[%s10414_s27 + $0x28] sm:$0xff] }
 0x9c9   :  { %v2657_v30 = vmul.f32 %v7150_v21, %v2654_v24  ;;  %v7155_v24 = vld [vmem:[%s10414_s27 + $0x18] sm:$0xff] }
 0x9cb   :  { %v2660_v39 = vadd.f32 %v7151_v10, %v2657_v30  ;;  %v7158_v30 = vld [vmem:[%s10414_s27 + $0x30] sm:$0xff] }
 0x9cd   :  { %v6566_v2 = vpack.c.bf16 %v2660_v39, %v2659_v16  ;;  %v7160_v16 = vld [vmem:[%s10414_s27 + $0x40] sm:$0xff]  ;;  %v7161_v39 = vld [vmem:[%s10414_s27 + $0x48] sm:$0xff] }
 0x9cf   :  { %6567 = vmatprep.subr.bf16.mxu1 %v6566_v2 }
 0x9d0   :  { %6569 = vmatpush3.bf16.msra.mxu1 %v6566_v2  ;;  %v7162_v2 = vld [vmem:[%s10414_s27 + $0x50] sm:$0xff] }
 0xa73   :  { %v2560_v17 = vpop.f32.mrb[40].mxu1 }
 0xa74   :  { %v2566_v44 = vsub.f32 %v9096_v35, %v2560_v17  ;;  %v5724_v19 = vpop.f32.mrb[41].mxu1  ;;  %v7163_v17 = vld [vmem:[%s10414_s27 + $0x58] sm:$0xff] }
 0xa75   :  { %v7165_v19 = vld [vmem:[%s10414_s27 + $0x68] sm:$0xff] }
 0xa76   :  { %v2569_v48 = vmul.f32 %v2566_v44, %v2566_v44 }
 0xa78   :  { %5764 = vmatmul.mubr.f32.gmra.mrb[80].mxu0 %v2569_v48  ;;  %v7166_v48 = vld [vmem:[%s10414_s27 + $0x70] sm:$0xff] }
 0xa79   :  { %3519 = vmatprep.mubr.f32.mxu0 %v7152_v53  ;;  %v7167_v53 = vld [vmem:[%s10414_s27 + $0x78] sm:$0xff] }
 0xb4b   :  { %v2646_v25 = vpop.f32.mrb[80].mxu0 }
 0xb4c   :  { %v2647_v42 = vadd.f32 1e-05, %v2646_v25  ;;  %v5765_v62 = vpop.f32.mrb[81].mxu0  ;;  %v7168_v25 = vld [vmem:[%s10414_s27 + $0x80] sm:$0xff] }
 0xb4d   :  { %v7170_v62 = vld [vmem:[%s10414_s27 + $0x90] sm:$0xff] }
 0xb4e   :  { %7010 = vrsqrt.f32 %v2647_v42  ;;  %v7169_v42 = vld [vmem:[%s10414_s27 + $0x88] sm:$0xff] }
 0xb58   :  { %v7011_v15 = vpop.eup %7010 }
 0xb59   :  { %v2655_v47 = vmul.f32 %v7011_v15, %v2566_v44  ;;  %v7164_v44 = vld [vmem:[%s10414_s27 + $0x60] sm:$0xff]  ;;  %v7171_v15 = vld [vmem:[%s10414_s27 + $0x98] sm:$0xff] }
 0xb5b   :  { %v2658_v7 = vmul.f32 %v7150_v21, %v2655_v47  ;;  %v7156_v21 = vld [vmem:[%s10414_s27 + $0x20] sm:$0xff] }
 0xb5c   :  { %v7172_v47 = vld [vmem:[%s10414_s27 + $0xa0] sm:$0xff] }
 0xb5d   :  { %v2661_v20 = vadd.f32 %v7151_v10, %v2658_v7  ;;  %v7159_v10 = vld [vmem:[%s10414_s27 + $0x38] sm:$0xff]  ;;  %v7173_v7 = vld [vmem:[%s10414_s27 + $0xa8] sm:$0xff] }
 0xb5f   :  { %5770 = vmatprep.subr.mxu1 %v2661_v20 }
 0xb60   :  { %5771 = vmatpush3.msra.mxu1 %v2661_v20  ;;  %v7174_v20 = vld [vmem:[%s10414_s27 + $0xb0] sm:$0xff] }
 0xb61   :  { %5773 = vmatmul.mubr.msk.f32.vlgmr.msra.gmra.mrb[42].mxu1 %vm758_vm1, %v7153_v23  ;;  %6656 = vmatprep.subr.bf16.mxu1 %v10481_v22  ;;  %v7175_v23 = vld [vmem:[%s10414_s27 + $0xb8] sm:$0xff] }
 0xb62   :  { %5775 = vmatprep.mubr.msk.f32.mxu1 %vm758_vm1, %v7154_v57  ;;  %6658 = vmatpush3.bf16.msra.mxu1 %v10482_v60  ;;  %v7176_v57 = vld [vmem:[%s10414_s27 + $0xc0] sm:$0xff] }
 0xb63   :  { %6659 = vmatprep.subr.bf16.mxu1 %v10481_v22 }
 0xb65   :  { %5776 = vmatmul.mubr.msk.f32.gmra.mrb[44].mxu1 %vm758_vm1, %v7155_v24  ;;  %v7177_v24 = vld [vmem:[%s10414_s27 + $0xc8] sm:$0xff] }
 0xb66   :  { %5778 = vmatprep.mubr.msk.f32.mxu1 %vm758_vm1, %v7156_v21  ;;  %6661 = vmatpush3.bf16.msra.mxu1 %v10483_v38  ;;  %v7178_v21 = vld [vmem:[%s10414_s27 + $0xd0] sm:$0xff] }
 0xb67   :  { %6662 = vmatprep.subr.bf16.mxu1 %v10481_v22 }
 0xb69   :  { %5779 = vmatmul.mubr.msk.f32.gmra.mrb[46].mxu1 %vm758_vm1, %v7157_v55  ;;  %v7179_v55 = vld [vmem:[%s10414_s27 + $0xd8] sm:$0xff] }
 0xb6a   :  { %5781 = vmatprep.mubr.msk.f32.mxu1 %vm758_vm1, %v7158_v30  ;;  %6664 = vmatpush3.bf16.msra.mxu1 %v10484_v37  ;;  %v7180_v30 = vld [vmem:[%s10414_s27 + $0xe0] sm:$0xff] }
 0xb6b   :  { %6665 = vmatprep.subr.bf16.mxu1 %v10481_v22 }
 0xb6d   :  { %5782 = vmatmul.mubr.msk.f32.gmra.mrb[48].mxu1 %vm758_vm1, %v7159_v10  ;;  %v7181_v10 = vld [vmem:[%s10414_s27 + $0xe8] sm:$0xff] }
 0xb6e   :  { %5784 = vmatprep.mubr.msk.f32.mxu1 %vm758_vm1, %v7160_v16  ;;  %6667 = vmatpush3.bf16.msra.mxu1 %v10486_v6  ;;  %v7182_v16 = vld [vmem:[%s10414_s27 + $0xf0] sm:$0xff] }
 0xb6f   :  { %6668 = vmatprep.subr.bf16.mxu1 %v10481_v22 }
 0xb71   :  { %5785 = vmatmul.mubr.msk.f32.gmra.mrb[50].mxu1 %vm758_vm1, %v7161_v39  ;;  %v7183_v39 = vld [vmem:[%s10414_s27 + $0xf8] sm:$0xff] }
 0xb72   :  { %5787 = vmatprep.mubr.msk.f32.mxu1 %vm758_vm1, %v7162_v2  ;;  %6670 = vmatpush3.bf16.msra.mxu1 %v10487_v14  ;;  %v7184_v2 = vld [vmem:[%s10414_s27 + $0x100] sm:$0xff] }
 0xb73   :  { %6671 = vmatprep.subr.bf16.mxu1 %v10481_v22 }
 0xb75   :  { %5788 = vmatmul.mubr.msk.f32.gmra.mrb[52].mxu1 %vm758_vm1, %v7163_v17  ;;  %v7185_v17 = vld [vmem:[%s10414_s27 + $0x108] sm:$0xff] }
 0xb76   :  { %5790 = vmatprep.mubr.msk.f32.mxu1 %vm758_vm1, %v7164_v44  ;;  %6673 = vmatpush3.bf16.msra.mxu1 %v10488_v54  ;;  %v7186_v44 = vld [vmem:[%s10414_s27 + $0x110] sm:$0xff] }
 0xb77   :  { %6674 = vmatprep.subr.bf16.mxu1 %v10481_v22 }
 0xb79   :  { %5791 = vmatmul.mubr.msk.f32.gmra.mrb[54].mxu1 %vm758_vm1, %v7165_v19  ;;  %v7187_v19 = vld [vmem:[%s10414_s27 + $0x118] sm:$0xff] }
 0xb7a   :  { %5793 = vmatprep.mubr.msk.f32.mxu1 %vm758_vm1, %v7166_v48  ;;  %6676 = vmatpush3.bf16.msra.mxu1 %v10489_v36  ;;  %v7188_v48 = vld [vmem:[%s10414_s27 + $0x120] sm:$0xff] }
 0xb7b   :  { %6677 = vmatprep.subr.bf16.mxu1 %v10481_v22 }
 0xb7d   :  { %5794 = vmatmul.mubr.msk.f32.gmra.mrb[56].mxu1 %vm758_vm1, %v7167_v53  ;;  %v7189_v53 = vld [vmem:[%s10414_s27 + $0x128] sm:$0xff] }
 0xb7e   :  { %5796 = vmatprep.mubr.msk.f32.mxu1 %vm758_vm1, %v7168_v25  ;;  %6679 = vmatpush3.bf16.msra.mxu1 %v10490_v0  ;;  %v7190_v25 = vld [vmem:[%s10414_s27 + $0x130] sm:$0xff] }
 0xb7f   :  { %6704 = vmatprep.subr.bf16.mxu1 %v10481_v22 }
 0xb81   :  { %5797 = vmatmul.mubr.msk.f32.gmra.mrb[58].mxu1 %vm758_vm1, %v7169_v42  ;;  %v7191_v42 = vld [vmem:[%s10414_s27 + $0x138] sm:$0xff] }
 0xb82   :  { %5799 = vmatprep.mubr.msk.f32.mxu1 %vm758_vm1, %v7170_v62  ;;  %v7192_v62 = vld [vmem:[%s10414_s27 + $0x140] sm:$0xff] }
 0xb85   :  { %5800 = vmatmul.mubr.msk.f32.gmra.mrb[60].mxu1 %vm758_vm1, %v7171_v15  ;;  %v7193_v15 = vld [vmem:[%s10414_s27 + $0x148] sm:$0xff] }
 0xb86   :  { %5802 = vmatprep.mubr.msk.f32.mxu1 %vm758_vm1, %v7172_v47  ;;  %v7194_v47 = vld [vmem:[%s10414_s27 + $0x150] sm:$0xff] }
 0xb89   :  { %5803 = vmatmul.mubr.msk.f32.gmra.mrb[62].mxu1 %vm758_vm1, %v7173_v7  ;;  %v7195_v7 = vld [vmem:[%s10414_s27 + $0x158] sm:$0xff] }
 0xb8a   :  { %5805 = vmatprep.mubr.msk.f32.mxu1 %vm758_vm1, %v7174_v20  ;;  %v7196_v20 = vld [vmem:[%s10414_s27 + $0x160] sm:$0xff] }
 0xb8d   :  { %5806 = vmatmul.mubr.msk.f32.gmra.mrb[64].mxu1 %vm758_vm1, %v7175_v23  ;;  %v7197_v23 = vld [vmem:[%s10414_s27 + $0x168] sm:$0xff] }
 0xb8e   :  { %5808 = vmatprep.mubr.msk.f32.mxu1 %vm758_vm1, %v7176_v57  ;;  %v7198_v57 = vld [vmem:[%s10414_s27 + $0x170] sm:$0xff] }
 0xb91   :  { %5809 = vmatmul.mubr.msk.f32.gmra.mrb[66].mxu1 %vm758_vm1, %v7177_v24  ;;  %v7199_v24 = vld [vmem:[%s10414_s27 + $0x178] sm:$0xff] }
 0xb92   :  { %5811 = vmatprep.mubr.msk.f32.mxu1 %vm758_vm1, %v7178_v21  ;;  %v7200_v21 = vld [vmem:[%s10414_s27 + $0x180] sm:$0xff] }
 0xb95   :  { %5812 = vmatmul.mubr.msk.f32.gmra.mrb[68].mxu1 %vm758_vm1, %v7179_v55  ;;  %v7201_v55 = vld [vmem:[%s10414_s27 + $0x188] sm:$0xff] }
 0xb96   :  { %5814 = vmatprep.mubr.msk.f32.mxu1 %vm758_vm1, %v7180_v30  ;;  %v7202_v30 = vld [vmem:[%s10414_s27 + $0x190] sm:$0xff] }
 0xb99   :  { %5815 = vmatmul.mubr.msk.f32.gmra.mrb[70].mxu1 %vm758_vm1, %v7181_v10  ;;  %v7203_v10 = vld [vmem:[%s10414_s27 + $0x198] sm:$0xff] }
 0xb9a   :  { %5817 = vmatprep.mubr.msk.f32.mxu1 %vm758_vm1, %v7182_v16 }
 0xb9d   :  { %5818 = vmatmul.mubr.msk.f32.gmra.mrb[72].mxu1 %vm758_vm1, %v7183_v39  ;;  %v10529_v39 = vld [vmem:[#allocation12_spill] sm:$0xff] }
 0xb9e   :  { %5820 = vmatprep.mubr.msk.f32.mxu1 %vm758_vm1, %v7184_v2 }
 0xba1   :  { %5821 = vmatmul.mubr.msk.f32.gmra.mrb[74].mxu1 %vm758_vm1, %v7185_v17 }
 0xba2   :  { %5823 = vmatprep.mubr.msk.f32.mxu1 %vm758_vm1, %v7186_v44  ;;  %v10530_v44 = vld [vmem:[#allocation10_spill] sm:$0xff] }
 0xba5   :  { %5824 = vmatmul.mubr.msk.f32.gmra.mrb[76].mxu1 %vm758_vm1, %v7187_v19 }
 0xba6   :  { %5826 = vmatprep.mubr.msk.f32.mxu1 %vm758_vm1, %v7188_v48 }
 0xba9   :  { %5827 = vmatmul.mubr.msk.f32.gmra.mrb[78].mxu1 %vm758_vm1, %v7189_v53 }
 0xbaa   :  { %5829 = vmatprep.mubr.msk.f32.mxu1 %vm758_vm1, %v7190_v25 }
 0xbad   :  { %5830 = vmatmul.mubr.msk.f32.gmra.mrb[80].mxu1 %vm758_vm1, %v7191_v42 }
 0xbae   :  { %5832 = vmatprep.mubr.msk.f32.mxu1 %vm758_vm1, %v7192_v62  ;;  %v10531_v62 = vld [vmem:[#allocation16_spill] sm:$0xff] }
 0xbb1   :  { %5833 = vmatmul.mubr.msk.f32.gmra.mrb[82].mxu1 %vm758_vm1, %v7193_v15 }
 0xbb2   :  { %5835 = vmatprep.mubr.msk.f32.mxu1 %vm758_vm1, %v7194_v47 }
 0xbb5   :  { %5836 = vmatmul.mubr.msk.f32.gmra.mrb[84].mxu1 %vm758_vm1, %v7195_v7 }
 0xbb6   :  { %5838 = vmatprep.mubr.msk.f32.mxu1 %vm758_vm1, %v7196_v20  ;;  %v10532_v20 = vld [vmem:[#allocation17_spill] sm:$0xff] }
 0xbb9   :  { %5839 = vmatmul.mubr.msk.f32.gmra.mrb[86].mxu1 %vm758_vm1, %v7197_v23 }
 0xbba   :  { %5841 = vmatprep.mubr.msk.f32.mxu1 %vm758_vm1, %v7198_v57 }
 0xbbd   :  { %5842 = vmatmul.mubr.msk.f32.gmra.mrb[88].mxu1 %vm758_vm1, %v7199_v24 }
 0xbbe   :  { %5844 = vmatprep.mubr.msk.f32.mxu1 %vm758_vm1, %v7200_v21 }
 0xbc1   :  { %5845 = vmatmul.mubr.msk.f32.gmra.mrb[90].mxu1 %vm758_vm1, %v7201_v55 }
 0xbc2   :  { %5847 = vmatprep.mubr.msk.f32.mxu1 %vm758_vm1, %v7202_v30 }
 0xbc5   :  { %5848 = vmatmul.mubr.msk.f32.gmra.mrb[92].mxu1 %vm758_vm1, %v7203_v10 }
 0xbc6   :  { %5923 = vmatprep.mubr.msk.f32.mxu1 %vm7222_vm0, %v10485_v18 }
 0xc34   :  { %v5774_v16 = vpop.f32.mrb[42].mxu1 }
 0xc35   :  { %v2734_v2 = vadd.f32 %v5774_v16, %v10529_v39  ;;  %v2728_v17 = vpop.f32.mrb[43].mxu1 }
 0xc36   :  { %v2729_v19 = vadd.f32 %v2728_v17, %v10530_v44  ;;  %v10533_v44 = vld [vmem:[#allocation20_spill] sm:$0xff] }
 0xc37   :  { %v3040_v48 = vmul.f32 0.044715, %v2734_v2  ;;  %v9341_v16 = vmul.f32 0.5, %v2734_v2 }
 0xc38   :  { %v3039_v53 = vmul.f32 0.044715, %v2729_v19  ;;  %v5777_v25 = vpop.f32.mrb[44].mxu1  ;;  %v9339_v10 = vmul.f32 0.5, %v2729_v19 }
 0xc39   :  { %v3092_v42 = vmul.f32 %v3040_v48, %v2734_v2  ;;  %v2744_v15 = vadd.f32 %v5777_v25, %v10531_v62  ;;  %v2738_v47 = vpop.f32.mrb[45].mxu1  ;;  %v10534_v62 = vld [vmem:[#allocation21_spill] sm:$0xff] }
 0xc3a   :  { %v3091_v7 = vmul.f32 %v3039_v53, %v2729_v19  ;;  %v2739_v23 = vadd.f32 %v2738_v47, %v10532_v20 }
 0xc3b   :  { %v3144_v57 = vmul.f32 %v3092_v42, %v2734_v2  ;;  %v3042_v24 = vmul.f32 0.044715, %v2744_v15  ;;  %v9344_v61 = vmul.f32 0.5, %v2744_v15 }
 0xc3c   :  { %v3143_v21 = vmul.f32 %v3091_v7, %v2729_v19  ;;  %v3041_v55 = vmul.f32 0.044715, %v2739_v23  ;;  %v5780_v30 = vpop.f32.mrb[46].mxu1  ;;  %v9347_v42 = vmul.f32 0.5, %v2739_v23 }
 0xc3d   :  { %v3196_v39 = vadd.f32 %v3144_v57, %v2734_v2  ;;  %v3094_v17 = vmul.f32 %v3042_v24, %v2744_v15  ;;  %v2754_v45 = vadd.f32 %v5780_v30, %v10533_v44  ;;  %v2748_v48 = vpop.f32.mrb[47].mxu1 }
 0xc3e   :  { %v3195_v25 = vadd.f32 %v3143_v21, %v2729_v19  ;;  %v3093_v53 = vmul.f32 %v3041_v55, %v2739_v23  ;;  %v2749_v47 = vadd.f32 %v2748_v48, %v10534_v62  ;;  %v10535_v19 = vld [vmem:[#allocation24_spill] sm:$0xff] }
 0xc3f   :  { %v3248_v7 = vmul.f32 0.7978846, %v3196_v39  ;;  %v3146_v20 = vmul.f32 %v3094_v17, %v2744_v15  ;;  %v3044_v41 = vmul.f32 0.044715, %v2754_v45  ;;  %v9349_v59 = vmul.f32 0.5, %v2754_v45  ;;  %v10536_v39 = vld [vmem:[#allocation25_spill] sm:$0xff] }
 0xc40   :  { %v3247_v40 = vmul.f32 0.7978846, %v3195_v25  ;;  %v3145_v13 = vmul.f32 %v3093_v53, %v2739_v23  ;;  %v3043_v2 = vmul.f32 0.044715, %v2749_v47  ;;  %v5783_v57 = vpop.f32.mrb[48].mxu1  ;;  %v9351_v24 = vmul.f32 0.5, %v2749_v47 }
 0xc41   :  { %7012 = vtanh.f32 %v3248_v7  ;;  %v3198_v30 = vadd.f32 %v3146_v20, %v2744_v15  ;;  %v3096_v44 = vmul.f32 %v3044_v41, %v2754_v45  ;;  %v2764_v21 = vadd.f32 %v5783_v57, %v10535_v19  ;;  %v2758_v55 = vpop.f32.mrb[49].mxu1  ;;  %v10537_v20 = vld [vmem:[#allocation28_spill] sm:$0xff]  ;;  %v10538_v57 = vld [vmem:[#allocation29_spill] sm:$0xff] }
 0xc42   :  { %7014 = vtanh.f32 %v3247_v40  ;;  %v3197_v48 = vadd.f32 %v3145_v13, %v2739_v23  ;;  %v3095_v62 = vmul.f32 %v3043_v2, %v2749_v47  ;;  %v2759_v17 = vadd.f32 %v2758_v55, %v10536_v39 }
 0xc43   :  { %v3250_v28 = vmul.f32 0.7978846, %v3198_v30  ;;  %v3148_v9 = vmul.f32 %v3096_v44, %v2754_v45  ;;  %v3046_v52 = vmul.f32 0.044715, %v2764_v21  ;;  %v9355_v25 = vmul.f32 0.5, %v2764_v21 }
 0xc44   :  { %v3249_v53 = vmul.f32 0.7978846, %v3197_v48  ;;  %v3147_v46 = vmul.f32 %v3095_v62, %v2749_v47  ;;  %v3045_v31 = vmul.f32 0.044715, %v2759_v17  ;;  %v5786_v58 = vpop.f32.mrb[50].mxu1  ;;  %v9357_v7 = vmul.f32 0.5, %v2759_v17 }
 0xc45   :  { %7016 = vtanh.f32 %v3250_v28  ;;  %v3200_v41 = vadd.f32 %v3148_v9, %v2754_v45  ;;  %v3098_v15 = vmul.f32 %v3046_v52, %v2764_v21  ;;  %v2774_v40 = vadd.f32 %v5786_v58, %v10537_v20  ;;  %v2768_v13 = vpop.f32.mrb[51].mxu1  ;;  %v10539_v9 = vld [vmem:[#allocation32_spill] sm:$0xff] }
 0xc46   :  { %7018 = vtanh.f32 %v3249_v53  ;;  %v3199_v23 = vadd.f32 %v3147_v46, %v2749_v47  ;;  %v3097_v2 = vmul.f32 %v3045_v31, %v2759_v17  ;;  %v2769_v30 = vadd.f32 %v2768_v13, %v10538_v57  ;;  %v10540_v53 = vld [vmem:[#allocation33_spill] sm:$0xff] }
 0xc47   :  { %v3252_v44 = vmul.f32 0.7978846, %v3200_v41  ;;  %v3150_v19 = vmul.f32 %v3098_v15, %v2764_v21  ;;  %v3048_v55 = vmul.f32 0.044715, %v2774_v40  ;;  %v9361_v48 = vmul.f32 0.5, %v2774_v40 }
 0xc48   :  { %v3251_v62 = vmul.f32 0.7978846, %v3199_v23  ;;  %v3149_v39 = vmul.f32 %v3097_v2, %v2759_v17  ;;  %v3047_v11 = vmul.f32 0.044715, %v2769_v30  ;;  %v5789_v5 = vpop.f32.mrb[52].mxu1  ;;  %v9363_v28 = vmul.f32 0.5, %v2769_v30 }
 0xc49   :  { %7020 = vtanh.f32 %v3252_v44  ;;  %v3202_v52 = vadd.f32 %v3150_v19, %v2764_v21  ;;  %v3100_v58 = vmul.f32 %v3048_v55, %v2774_v40  ;;  %v2784_v45 = vadd.f32 %v5789_v5, %v10539_v9  ;;  %v2778_v46 = vpop.f32.mrb[53].mxu1  ;;  %v10542_v9 = vld [vmem:[#allocation37_spill] sm:$0xff] }
 0xc4a   :  { %7022 = vtanh.f32 %v3251_v62  ;;  %v3201_v31 = vadd.f32 %v3149_v39, %v2759_v17  ;;  %v3099_v47 = vmul.f32 %v3047_v11, %v2769_v30  ;;  %v9367_v41 = vadd.f32 %v2778_v46, %v10540_v53  ;;  %v10541_v11 = vld [vmem:[#allocation36_spill] sm:$0xff] }
 0xc4b   :  { %v7013_v15 = vpop.eup %7012  ;;  %v3254_v20 = vmul.f32 0.7978846, %v3202_v52  ;;  %v3152_v13 = vmul.f32 %v3100_v58, %v2774_v40  ;;  %v3050_v23 = vmul.f32 0.044715, %v2784_v45  ;;  %v9369_v2 = vmul.f32 0.5, %v2784_v45 }
 0xc4c   :  { %v7015_v57 = vpop.eup %7014  ;;  %v3253_v1 = vmul.f32 0.7978846, %v3201_v31  ;;  %v3151_v44 = vmul.f32 %v3099_v47, %v2769_v30  ;;  %v3049_v21 = vmul.f32 0.044715, %v9367_v41  ;;  %v5792_v19 = vpop.f32.mrb[54].mxu1  ;;  %v3352_v5 = vadd.f32 1.0, %v7013_v15 }
 0xc4d   :  { %7024 = vtanh.f32 %v3254_v20  ;;  %v3204_v55 = vadd.f32 %v3152_v13, %v2774_v40  ;;  %v3102_v17 = vmul.f32 %v3050_v23, %v2784_v45  ;;  %v9373_v62 = vadd.f32 %v5792_v19, %v10541_v11  ;;  %v2788_v39 = vpop.f32.mrb[55].mxu1  ;;  %v10543_v11 = vld [vmem:[#allocation38_spill] sm:$0xff] }
 0xc4e   :  { %7026 = vtanh.f32 %v3253_v1  ;;  %v3203_v52 = vadd.f32 %v3151_v44, %v2769_v30  ;;  %v3101_v58 = vmul.f32 %v3049_v21, %v9367_v41  ;;  %v9377_v46 = vadd.f32 %v2788_v39, %v10542_v9 }
 0xc4f   :  { %v9379_v31 = vpop.eup %7016  ;;  %v3256_v47 = vmul.f32 0.7978846, %v3204_v55  ;;  %v3154_v53 = vmul.f32 %v3102_v17, %v2784_v45  ;;  %v3052_v15 = vmul.f32 0.044715, %v9373_v62  ;;  %v3351_v20 = vadd.f32 1.0, %v7015_v57 }
 0xc50   :  { %v7019_v40 = vpop.eup %7018  ;;  %v3255_v13 = vmul.f32 0.7978846, %v3203_v52  ;;  %v3153_v23 = vmul.f32 %v3101_v58, %v9367_v41  ;;  %v3051_v19 = vmul.f32 0.044715, %v9377_v46  ;;  %v5795_v1 = vpop.f32.mrb[56].mxu1  ;;  %v9385_v30 = vmul.f32 %v3352_v5, %v9341_v16  ;;  %v10545_v52 = vld [vmem:[#allocation39_spill] sm:$0xff] }
 0xc51   :  { %7028 = vtanh.f32 %v3256_v47  ;;  %v3206_v44 = vadd.f32 %v3154_v53, %v2784_v45  ;;  %v3104_v21 = vmul.f32 %v3052_v15, %v9373_v62  ;;  %v9389_v55 = vadd.f32 %v5795_v1, %v10543_v11  ;;  %v2798_v17 = vpop.f32.mrb[57].mxu1  ;;  %v10547_v11 = vld [vmem:[#allocation13_spill] sm:$0xff] }
 0xc52   :  { %7030 = vtanh.f32 %v3255_v13  ;;  %v3205_v57 = vadd.f32 %v3153_v23, %v9367_v41  ;;  %v3103_v39 = vmul.f32 %v3051_v19, %v9377_v46  ;;  %v9394_v58 = vadd.f32 %v2798_v17, %v10545_v52 }
 0xc53   :  { %10544 = vst [vmem:[#allocation12_spill] sm:$0xff] %v9389_v55  ;;  %v9396_v9 = vpop.eup %7020  ;;  %v3258_v16 = vmul.f32 0.7978846, %v3206_v44  ;;  %v3156_v5 = vmul.f32 %v3104_v21, %v9373_v62  ;;  %v3054_v45 = vmul.f32 0.044715, %v9389_v55  ;;  %v9401_v47 = vmul.f32 %v3351_v20, %v9339_v10 }
 0xc54   :  { %10546 = vst [vmem:[#allocation10_spill] sm:$0xff] %v9394_v58  ;;  %v9403_v53 = vpop.eup %7022  ;;  %v3257_v15 = vmul.f32 0.7978846, %v3205_v57  ;;  %v3155_v13 = vmul.f32 %v3103_v39, %v9377_v46  ;;  %v3053_v23 = vmul.f32 0.044715, %v9394_v58  ;;  %v5798_v19 = vpop.f32.mrb[58].mxu1 }
 0xc55   :  { %v9407_v1 = vadd.f32 1.0, %v7019_v40  ;;  %7032 = vtanh.f32 %v3258_v16  ;;  %v3208_v44 = vadd.f32 %v3156_v5, %v9373_v62  ;;  %v3106_v21 = vmul.f32 %v3054_v45, %v9389_v55  ;;  %v2808_v52 = vpop.f32.mrb[59].mxu1  ;;  %v10548_v57 = vld [vmem:[#allocation11_spill] sm:$0xff] }
 0xc56   :  { %v2814_v17 = vadd.f32 %v5798_v19, %v10547_v11  ;;  %7034 = vtanh.f32 %v3257_v15  ;;  %v3207_v10 = vadd.f32 %v3155_v13, %v9377_v46  ;;  %v3105_v20 = vmul.f32 %v3053_v23, %v9394_v58 }
 0xc57   :  { %v2809_v39 = vadd.f32 %v2808_v52, %v10548_v57  ;;  %v9415_v34 = vpop.eup %7024  ;;  %v3260_v35 = vmul.f32 0.7978846, %v3208_v44  ;;  %v3158_v40 = vmul.f32 %v3106_v21, %v9389_v55  ;;  %v10549_v57 = vld [vmem:[#allocation14_spill] sm:$0xff]  ;;  %v3356_v8 = vadd.f32 1.0, %v9396_v9 }
 0xc58   :  { %v3056_v16 = vmul.f32 0.044715, %v2814_v17  ;;  %v9418_v29 = vmul.f32 0.5, %v2814_v17  ;;  %v9420_v5 = vpop.eup %7026  ;;  %v3259_v45 = vmul.f32 0.7978846, %v3207_v10  ;;  %v3157_v19 = vmul.f32 %v3105_v20, %v9394_v58  ;;  %v5801_v11 = vpop.f32.mrb[60].mxu1 }
 0xc59   :  { %v3055_v15 = vmul.f32 0.044715, %v2809_v39  ;;  %v9423_v13 = vmul.f32 0.5, %v2809_v39  ;;  %7036 = vtanh.f32 %v3260_v35  ;;  %v3210_v23 = vadd.f32 %v3158_v40, %v9389_v55  ;;  %v2818_v4 = vpop.f32.mrb[61].mxu1 }
 0xc5a   :  { %v3108_v52 = vmul.f32 %v3056_v16, %v2814_v17  ;;  %v2824_v44 = vadd.f32 %v5801_v11, %v10549_v57  ;;  %7038 = vtanh.f32 %v3259_v45  ;;  %v3209_v21 = vadd.f32 %v3157_v19, %v9394_v58 }
 0xc5b   :  { %v3107_v27 = vmul.f32 %v3055_v15, %v2809_v39  ;;  %v2819_v56 = vadd.f32 %v2818_v4, %v10550_v12  ;;  %v9429_v10 = vpop.eup %7028  ;;  %v3262_v20 = vmul.f32 0.7978846, %v3210_v23  ;;  %v10551_v15 = vld [vmem:[#allocation18_spill] sm:$0xff] }
 0xc5c   :  { %v3160_v0 = vmul.f32 %v3108_v52, %v2814_v17  ;;  %v3058_v36 = vmul.f32 0.044715, %v2824_v44  ;;  %v9433_v54 = vpop.eup %7030  ;;  %v3261_v40 = vmul.f32 0.7978846, %v3209_v21  ;;  %v5804_v57 = vpop.f32.mrb[62].mxu1  ;;  %v10552_v52 = vld [vmem:[#allocation19_spill] sm:$0xff] }
 0xc5d   :  { %v3159_v16 = vmul.f32 %v3107_v27, %v2809_v39  ;;  %v3057_v11 = vmul.f32 0.044715, %v2819_v56  ;;  %v9435_v45 = vmul.f32 0.5, %v2819_v56  ;;  %7040 = vtanh.f32 %v3262_v20  ;;  %v2828_v4 = vpop.f32.mrb[63].mxu1 }
 0xc5e   :  { %v3110_v19 = vmul.f32 %v3058_v36, %v2824_v44  ;;  %v2834_v12 = vadd.f32 %v5804_v57, %v10551_v15  ;;  %v3212_v14 = vadd.f32 %v3160_v0, %v2814_v17  ;;  %7042 = vtanh.f32 %v3261_v40  ;;  %v10553_v40 = vld [vmem:[#allocation22_spill] sm:$0xff]  ;;  %v10554_v15 = vld [vmem:[#allocation23_spill] sm:$0xff] }
 0xc5f   :  { %v3109_v23 = vmul.f32 %v3057_v11, %v2819_v56  ;;  %v2829_v6 = vadd.f32 %v2828_v4, %v10552_v52  ;;  %v3211_v18 = vadd.f32 %v3159_v16, %v2809_v39  ;;  %v9439_v35 = vpop.eup %7032  ;;  %v9441_v38 = vmul.f32 0.5, %v2824_v44 }
 0xc60   :  { %v3162_v37 = vmul.f32 %v3110_v19, %v2824_v44  ;;  %v3060_v21 = vmul.f32 0.044715, %v2834_v12  ;;  %v3264_v27 = vmul.f32 0.7978846, %v3212_v14  ;;  %v9443_v60 = vpop.eup %7034  ;;  %v5807_v22 = vpop.f32.mrb[64].mxu1  ;;  %v3354_v0 = vadd.f32 1.0, %v9379_v31 }
 0xc61   :  { %v3161_v20 = vmul.f32 %v3109_v23, %v2819_v56  ;;  %v3059_v36 = vmul.f32 0.044715, %v2829_v6  ;;  %v3263_v57 = vmul.f32 0.7978846, %v3211_v18  ;;  %v9447_v11 = vadd.f32 %v5807_v22, %v10553_v40  ;;  %v2838_v39 = vpop.f32.mrb[65].mxu1 }
 0xc62   :  { %v3112_v17 = vmul.f32 %v3060_v21, %v2834_v12  ;;  %7044 = vtanh.f32 %v3264_v27  ;;  %v3214_v16 = vadd.f32 %v3162_v37, %v2824_v44  ;;  %v9450_v14 = vadd.f32 %v2838_v39, %v10554_v15 }
 0xc63   :  { %v3111_v19 = vmul.f32 %v3059_v36, %v2829_v6  ;;  %7046 = vtanh.f32 %v3263_v57  ;;  %v3213_v4 = vadd.f32 %v3161_v20, %v2819_v56  ;;  %v9452_v52 = vpop.eup %7036  ;;  %v3062_v18 = vmul.f32 0.044715, %v9447_v11  ;;  %v10556_v20 = vld [vmem:[#allocation26_spill] sm:$0xff] }
 0xc64   :  { %10555 = vst [vmem:[#allocation16_spill] sm:$0xff] %v9452_v52  ;;  %v3164_v23 = vmul.f32 %v3112_v17, %v2834_v12  ;;  %v3266_v26 = vmul.f32 0.7978846, %v3214_v16  ;;  %v9457_v31 = vmul.f32 %v9407_v1, %v9347_v42  ;;  %v9459_v22 = vpop.eup %7038  ;;  %v3061_v37 = vmul.f32 0.044715, %v9450_v14  ;;  %v5810_v44 = vpop.f32.mrb[66].mxu1 }
 0xc65   :  { %v3163_v21 = vmul.f32 %v3111_v19, %v2829_v6  ;;  %v3265_v27 = vmul.f32 0.7978846, %v3213_v4  ;;  %v9463_v36 = vmul.f32 %v3354_v0, %v9344_v61  ;;  %v3114_v56 = vmul.f32 %v3062_v18, %v9447_v11  ;;  %v2848_v17 = vpop.f32.mrb[67].mxu1  ;;  %v10557_v1 = vld [vmem:[#allocation27_spill] sm:$0xff] }
 0xc66   :  { %v9467_v57 = vadd.f32 %v5810_v44, %v10556_v20  ;;  %7048 = vtanh.f32 %v3266_v26  ;;  %v9469_v40 = vmul.f32 0.5, %v2829_v6  ;;  %v3113_v42 = vmul.f32 %v3061_v37, %v9450_v14 }
 0xc67   :  { %v9473_v39 = vadd.f32 %v2848_v17, %v10557_v1  ;;  %7050 = vtanh.f32 %v3265_v27  ;;  %v9477_v61 = vpop.eup %7040  ;;  %v3166_v0 = vmul.f32 %v3114_v56, %v9447_v11  ;;  %v9481_v15 = vmul.f32 0.5, %v2834_v12  ;;  %v10560_v1 = vld [vmem:[#allocation30_spill] sm:$0xff] }
 0xc68   :  { %10558 = vst [vmem:[#allocation17_spill] sm:$0xff] %v9477_v61  ;;  %v3064_v19 = vmul.f32 0.044715, %v9467_v57  ;;  %v3215_v26 = vadd.f32 %v3163_v21, %v2829_v6  ;;  %v9483_v4 = vpop.eup %7042  ;;  %v3165_v18 = vmul.f32 %v3113_v42, %v9450_v14  ;;  %v5813_v44 = vpop.f32.mrb[68].mxu1  ;;  %v3216_v27 = vadd.f32 %v3164_v23, %v2834_v12  ;;  %v10561_v21 = vld [vmem:[#allocation31_spill] sm:$0xff] }
 0xc69   :  { %10559 = vst [vmem:[#allocation20_spill] sm:$0xff] %v9483_v4  ;;  %v3063_v37 = vmul.f32 0.044715, %v9473_v39  ;;  %v3355_v20 = vadd.f32 1.0, %v9403_v53  ;;  %v9490_v16 = vadd.f32 %v5813_v44, %v10560_v1  ;;  %v2858_v56 = vpop.f32.mrb[69].mxu1  ;;  %v3218_v52 = vadd.f32 %v3166_v0, %v9447_v11 }
 0xc6a   :  { %v3116_v17 = vmul.f32 %v3064_v19, %v9467_v57  ;;  %v3267_v32 = vmul.f32 0.7978846, %v3215_v26  ;;  %v9495_v51 = vadd.f32 %v2858_v56, %v10561_v21  ;;  %v3268_v42 = vmul.f32 0.7978846, %v3216_v27 }
 0xc6b   :  { %v3115_v6 = vmul.f32 %v3063_v37, %v9473_v39  ;;  %v9498_v50 = vmul.f32 %v3355_v20, %v9351_v24  ;;  %v3066_v23 = vmul.f32 0.044715, %v9490_v16  ;;  %v9505_v19 = vmul.f32 %v3356_v8, %v9349_v59  ;;  %v10562_v20 = vld [vmem:[#allocation34_spill] sm:$0xff]  ;;  %v10563_v59 = vld [vmem:[#allocation35_spill] sm:$0xff] }
 0xc6c   :  { %v7045_v12 = vpop.eup %7044  ;;  %v9501_v53 = vmul.f32 %v3116_v17, %v9467_v57  ;;  %7052 = vtanh.f32 %v3267_v32  ;;  %v3065_v37 = vmul.f32 0.044715, %v9495_v51  ;;  %v5816_v44 = vpop.f32.mrb[70].mxu1  ;;  %v3217_v8 = vadd.f32 %v3165_v18, %v9450_v14 }
 0xc6d   :  { %v7047_v9 = vpop.eup %7046  ;;  %v9508_v26 = vmul.f32 %v3115_v6, %v9473_v39  ;;  %v3368_v27 = vadd.f32 1.0, %v7045_v12  ;;  %7054 = vtanh.f32 %v3268_v42  ;;  %v3118_v24 = vmul.f32 %v3066_v23, %v9490_v16  ;;  %v2868_v1 = vpop.f32.mrb[71].mxu1 }
 0xc6e   :  { %v9513_v17 = vadd.f32 %v5816_v44, %v10562_v20  ;;  %v3367_v56 = vadd.f32 1.0, %v7047_v9  ;;  %v3117_v32 = vmul.f32 %v3065_v37, %v9495_v51  ;;  %v9519_v6 = vadd.f32 %v2868_v1, %v10563_v59 }
 0xc6f   :  { %v3420_v21 = vmul.f32 %v3368_v27, %v9418_v29  ;;  %v9523_v12 = vmul.f32 0.5, %v9450_v14  ;;  %v9526_v23 = vmul.f32 %v3118_v24, %v9490_v16  ;;  %v9531_v20 = vmul.f32 0.5, %v9447_v11 }
 0xc70   :  { %v7049_v42 = vpop.eup %7048  ;;  %v3068_v44 = vmul.f32 0.044715, %v9513_v17  ;;  %v3419_v9 = vmul.f32 %v3367_v56, %v9423_v13  ;;  %v9534_v1 = vmul.f32 %v3117_v32, %v9495_v51  ;;  %v3067_v29 = vmul.f32 0.044715, %v9519_v6  ;;  %v5819_v27 = vpop.f32.mrb[72].mxu1 }
 0xc71   :  { %v7051_v37 = vpop.eup %7050  ;;  %v3370_v59 = vadd.f32 1.0, %v7049_v42  ;;  %v9540_v61 = vadd.f32 %v5819_v27, %v7965_v3  ;;  %v2878_v4 = vpop.f32.mrb[73].mxu1  ;;  %v3269_v18 = vmul.f32 0.7978846, %v3217_v8  ;;  %v3270_v11 = vmul.f32 0.7978846, %v3218_v52 }
 0xc72   :  { %v3120_v24 = vmul.f32 %v3068_v44, %v9513_v17  ;;  %v6570_v13 = vpack.c.bf16 %v3420_v21, %v3419_v9  ;;  %v3369_v56 = vadd.f32 1.0, %v7051_v37  ;;  %v3119_v55 = vmul.f32 %v3067_v29, %v9519_v6 }
 0xc73   :  { %v9544_v58 = vadd.f32 %v2878_v4, %v7970_v43  ;;  %v3422_v32 = vmul.f32 %v3370_v59, %v9441_v38  ;;  %v3070_v14 = vmul.f32 0.044715, %v9540_v61  ;;  %v10564_v38 = vpack.c.bf16 %v9385_v30, %v9401_v47 }
 0xc74   :  { %v9549_v42 = vmul.f32 %v3120_v24, %v9513_v17  ;;  %6571 = vmatprep.subr.bf16.mxu0 %v6570_v13  ;;  %v3421_v3 = vmul.f32 %v3369_v56, %v9435_v45  ;;  %v9554_v21 = vmul.f32 %v3119_v55, %v9519_v6  ;;  %v5822_v43 = vpop.f32.mrb[74].mxu1  ;;  %v3357_v0 = vadd.f32 1.0, %v9420_v5 }
 0xc75   :  { %v3069_v44 = vmul.f32 0.044715, %v9544_v58  ;;  %6573 = vmatpush3.bf16.msra.mxu0 %v10564_v38  ;;  %v3122_v9 = vmul.f32 %v3070_v14, %v9540_v61  ;;  %v9563_v37 = vadd.f32 %v5822_v43, %v8118_v49  ;;  %v2888_v45 = vpop.f32.mrb[75].mxu1  ;;  %7056 = vtanh.f32 %v3269_v18 }
 0xc76   :  { %v7053_v4 = vpop.eup %7052  ;;  %v6574_v8 = vpack.c.bf16 %v3422_v32, %v3421_v3  ;;  %v9567_v27 = vadd.f32 %v2888_v45, %v8142_v63  ;;  %7058 = vtanh.f32 %v3270_v11  ;;  %v3358_v49 = vadd.f32 1.0, %v9415_v34 }
 0xc77   :  { %v7055_v55 = vpop.eup %7054  ;;  %v3121_v29 = vmul.f32 %v3069_v44, %v9544_v58  ;;  %v3371_v30 = vadd.f32 1.0, %v7053_v4  ;;  %v9570_v47 = vmul.f32 %v3122_v9, %v9540_v61  ;;  %v3072_v5 = vmul.f32 0.044715, %v9563_v37 }
 0xc78   :  { %6575 = vmatprep.subr.bf16.mxu0 %v6574_v8  ;;  %v3372_v52 = vadd.f32 1.0, %v7055_v55  ;;  %v3071_v24 = vmul.f32 0.044715, %v9567_v27  ;;  %v5825_v13 = vpop.f32.mrb[76].mxu1  ;;  %v10565_v63 = vpack.c.bf16 %v9463_v36, %v9457_v31  ;;  %v9583_v32 = vmul.f32 %v3357_v0, %v9357_v7  ;;  %v10566_v31 = vld [vmem:[#allocation44_spill] sm:$0xff] }
 0xc79   :  { %v9575_v59 = vmul.f32 %v3121_v29, %v9544_v58  ;;  %v3423_v56 = vmul.f32 %v3371_v30, %v9469_v40  ;;  %v3124_v14 = vmul.f32 %v3072_v5, %v9563_v37  ;;  %v9587_v3 = vadd.f32 %v5825_v13, %v8159_v33  ;;  %v2898_v34 = vpop.f32.mrb[77].mxu1  ;;  %v10567_v29 = vld [vmem:[#allocation45_spill] sm:$0xff] }
 0xc7a   :  { %6577 = vmatpush3.bf16.msra.mxu0 %v10565_v63  ;;  %v3424_v18 = vmul.f32 %v3372_v52, %v9481_v15  ;;  %v9591_v44 = vmul.f32 %v3358_v49, %v9355_v25  ;;  %v3123_v43 = vmul.f32 %v3071_v24, %v9567_v27  ;;  %v9595_v36 = vadd.f32 %v2898_v34, %v10566_v31 }
 0xc7b   :  { %v9598_v40 = vmul.f32 0.5, %v9473_v39  ;;  %v9601_v7 = vmul.f32 0.5, %v9467_v57  ;;  %v3176_v33 = vmul.f32 %v3124_v14, %v9563_v37  ;;  %v3074_v38 = vmul.f32 0.044715, %v9587_v3 }
 0xc7c   :  { %v6578_v11 = vpack.c.bf16 %v3424_v18, %v3423_v56  ;;  %v6584_v25 = vpack.c.bf16 %v9591_v44, %v9583_v32  ;;  %v3175_v15 = vmul.f32 %v3123_v43, %v9567_v27  ;;  %v3073_v0 = vmul.f32 0.044715, %v9595_v36  ;;  %v5828_v4 = vpop.f32.mrb[78].mxu1 }
 0xc7d   :  { %v3219_v9 = vadd.f32 %v9508_v26, %v9473_v39  ;;  %v3220_v45 = vadd.f32 %v9501_v53, %v9467_v57  ;;  %v3228_v8 = vadd.f32 %v3176_v33, %v9563_v37  ;;  %v3126_v55 = vmul.f32 %v3074_v38, %v9587_v3  ;;  %v2908_v5 = vpop.f32.mrb[79].mxu1  ;;  %v10569_v57 = vld [vmem:[#allocation46_spill] sm:$0xff] }
 0xc7e   :  { %6579 = vmatprep.subr.bf16.mxu0 %v6578_v11  ;;  %v9616_v30 = vadd.f32 %v5828_v4, %v10567_v29  ;;  %v3359_v52 = vadd.f32 1.0, %v9433_v54  ;;  %v3227_v49 = vadd.f32 %v3175_v15, %v9567_v27  ;;  %v3125_v24 = vmul.f32 %v3073_v0, %v9595_v36 }
 0xc7f   :  { %v10568_v39 = vpack.c.bf16 %v9505_v19, %v9498_v50  ;;  %v9625_v53 = vadd.f32 %v2908_v5, %v10569_v57  ;;  %v3271_v26 = vmul.f32 0.7978846, %v3219_v9  ;;  %v7057_v13 = vpop.eup %7056  ;;  %v3280_v63 = vmul.f32 0.7978846, %v3228_v8  ;;  %v10570_v8 = vld [vmem:[#allocation47_spill] sm:$0xff] }
 0xc80   :  { %v3178_v56 = vmul.f32 %v3126_v55, %v9587_v3  ;;  %v3076_v32 = vmul.f32 0.044715, %v9616_v30  ;;  %v3272_v14 = vmul.f32 0.7978846, %v3220_v45  ;;  %v7059_v54 = vpop.eup %7058  ;;  %v3279_v34 = vmul.f32 0.7978846, %v3227_v49 }
 0xc81   :  { %6581 = vmatpush3.bf16.msra.mxu0 %v10568_v39  ;;  %v3177_v18 = vmul.f32 %v3125_v24, %v9595_v36  ;;  %v3075_v44 = vmul.f32 0.044715, %v9625_v53  ;;  %v3373_v43 = vadd.f32 1.0, %v7057_v13  ;;  %v5831_v50 = vpop.f32.mrb[80].mxu1  ;;  %7060 = vtanh.f32 %v3280_v63  ;;  %v10571_v49 = vld [vmem:[#allocation48_spill] sm:$0xff] }
 0xc82   :  { %v3230_v19 = vadd.f32 %v3178_v56, %v9587_v3  ;;  %v3128_v31 = vmul.f32 %v3076_v32, %v9616_v30  ;;  %v3374_v33 = vadd.f32 1.0, %v7059_v54  ;;  %v2918_v38 = vpop.f32.mrb[81].mxu1  ;;  %7062 = vtanh.f32 %v3279_v34  ;;  %v10572_v32 = vld [vmem:[#allocation49_spill] sm:$0xff] }
 0xc83   :  { %v3229_v11 = vadd.f32 %v3177_v18, %v9595_v36  ;;  %v3127_v15 = vmul.f32 %v3075_v44, %v9625_v53  ;;  %v3425_v0 = vmul.f32 %v3373_v43, %v9523_v12  ;;  %v9639_v55 = vadd.f32 %v5831_v50, %v10570_v8 }
 0xc84   :  { %v3282_v4 = vmul.f32 0.7978846, %v3230_v19  ;;  %v3180_v9 = vmul.f32 %v3128_v31, %v9616_v30  ;;  %v3426_v45 = vmul.f32 %v3374_v33, %v9531_v20  ;;  %v9643_v24 = vadd.f32 %v2918_v38, %v10571_v49  ;;  %v5834_v39 = vpop.f32.mrb[82].mxu1 }
 0xc85   :  { %v3281_v29 = vmul.f32 0.7978846, %v3229_v11  ;;  %v3179_v5 = vmul.f32 %v3127_v15, %v9625_v53  ;;  %7064 = vtanh.f32 %v3271_v26  ;;  %v3078_v13 = vmul.f32 0.044715, %v9639_v55  ;;  %v2928_v63 = vpop.f32.mrb[83].mxu1  ;;  %v10573_v11 = vld [vmem:[#allocation50_spill] sm:$0xff] }
 0xc86   :  { %7066 = vtanh.f32 %v3282_v4  ;;  %v3232_v57 = vadd.f32 %v3180_v9, %v9616_v30  ;;  %v6582_v12 = vpack.c.bf16 %v3426_v45, %v3425_v0  ;;  %v3077_v56 = vmul.f32 0.044715, %v9643_v24 }
 0xc87   :  { %7068 = vtanh.f32 %v3281_v29  ;;  %v3231_v20 = vadd.f32 %v3179_v5, %v9625_v53  ;;  %v9650_v54 = vadd.f32 %v5834_v39, %v10572_v32  ;;  %v3130_v26 = vmul.f32 %v3078_v13, %v9639_v55  ;;  %v10574_v13 = vld [vmem:[#allocation51_spill] sm:$0xff] }
 0xc88   :  { %v3284_v34 = vmul.f32 0.7978846, %v3232_v57  ;;  %6583 = vmatprep.subr.bf16.mxu0 %v6582_v12  ;;  %7070 = vtanh.f32 %v3272_v14  ;;  %v3360_v18 = vadd.f32 1.0, %v9429_v10  ;;  %v3129_v43 = vmul.f32 %v3077_v56, %v9643_v24  ;;  %v5837_v31 = vpop.f32.mrb[84].mxu1 }
 0xc89   :  { %v3283_v44 = vmul.f32 0.7978846, %v3231_v20  ;;  %6585 = vmatpush3.bf16.msra.mxu0 %v6584_v25  ;;  %v3080_v50 = vmul.f32 0.044715, %v9650_v54  ;;  %v9657_v19 = vmul.f32 %v3359_v52, %v9363_v28  ;;  %v3182_v33 = vmul.f32 %v3130_v26, %v9639_v55  ;;  %v2938_v10 = vpop.f32.mrb[85].mxu1 }
 0xc8a   :  { %7072 = vtanh.f32 %v3284_v34  ;;  %v9661_v38 = vmul.f32 %v3360_v18, %v9361_v48  ;;  %v9664_v14 = vadd.f32 %v2928_v63, %v10573_v11  ;;  %v3181_v25 = vmul.f32 %v3129_v43, %v9643_v24 }
 0xc8b   :  { %7074 = vtanh.f32 %v3283_v44  ;;  %v3132_v15 = vmul.f32 %v3080_v50, %v9650_v54  ;;  %v9669_v0 = vmul.f32 0.5, %v9495_v51  ;;  %v9671_v28 = vpop.eup %7060  ;;  %v3234_v52 = vadd.f32 %v3182_v33, %v9639_v55 }
 0xc8c   :  { %v6588_v48 = vpack.c.bf16 %v9661_v38, %v9657_v19  ;;  %v3079_v4 = vmul.f32 0.044715, %v9664_v14  ;;  %v9678_v9 = vmul.f32 0.5, %v9490_v16  ;;  %v9680_v45 = vpop.eup %7062  ;;  %v3233_v8 = vadd.f32 %v3181_v25, %v9643_v24  ;;  %v5840_v39 = vpop.f32.mrb[86].mxu1 }
 0xc8d   :  { %v3184_v29 = vmul.f32 %v3132_v15, %v9650_v54  ;;  %v3221_v5 = vadd.f32 %v9534_v1, %v9495_v51  ;;  %v3222_v49 = vadd.f32 %v9526_v23, %v9490_v16  ;;  %v3286_v57 = vmul.f32 0.7978846, %v3234_v52  ;;  %v2948_v56 = vpop.f32.mrb[87].mxu1 }
 0xc8e   :  { %v3131_v12 = vmul.f32 %v3079_v4, %v9664_v14  ;;  %v9690_v63 = vadd.f32 %v5837_v31, %v10574_v13  ;;  %v2997_v20 = vmul.f32 0.5, %v9367_v41  ;;  %v3285_v34 = vmul.f32 0.7978846, %v3233_v8 }
 0xc8f   :  { %v7065_v32 = vpop.eup %7064  ;;  %v3236_v26 = vadd.f32 %v3184_v29, %v9650_v54  ;;  %v3273_v18 = vmul.f32 0.7978846, %v3221_v5  ;;  %v3274_v44 = vmul.f32 0.7978846, %v3222_v49  ;;  %7076 = vtanh.f32 %v3286_v57  ;;  %v10575_v49 = vld [vmem:[#allocation52_spill] sm:$0xff] }
 0xc90   :  { %v9694_v51 = vpop.eup %7066  ;;  %v3375_v16 = vadd.f32 1.0, %v7065_v32  ;;  %v3183_v23 = vmul.f32 %v3131_v12, %v9664_v14  ;;  %v3082_v1 = vmul.f32 0.044715, %v9690_v63  ;;  %7078 = vtanh.f32 %v3285_v34  ;;  %v9702_v33 = vpop.f32.mrb[88].mxu1 }
 0xc91   :  { %v9698_v43 = vpop.eup %7068  ;;  %v3288_v50 = vmul.f32 0.7978846, %v3236_v26  ;;  %v3361_v41 = vadd.f32 1.0, %v9443_v60  ;;  %v3362_v31 = vadd.f32 1.0, %v9439_v35  ;;  %7080 = vtanh.f32 %v3273_v18  ;;  %v9707_v4 = vpop.f32.mrb[89].mxu1 }
 0xc92   :  { %v7071_v11 = vpop.eup %7070  ;;  %v3427_v25 = vmul.f32 %v3375_v16, %v9598_v40  ;;  %v3235_v15 = vadd.f32 %v3183_v23, %v9664_v14  ;;  %v3134_v52 = vmul.f32 %v3082_v1, %v9690_v63  ;;  %v9718_v57 = vadd.f32 %v2938_v10, %v10575_v49  ;;  %v10576_v23 = vld [vmem:[#allocation53_spill] sm:$0xff] }
 0xc93   :  { %v3376_v8 = vadd.f32 1.0, %v7071_v11  ;;  %7082 = vtanh.f32 %v3288_v50  ;;  %v9709_v29 = vmul.f32 %v3361_v41, %v2997_v20  ;;  %v9712_v60 = vmul.f32 %v3362_v31, %v9369_v2 }
 0xc94   :  { %v9714_v35 = vpop.eup %7072  ;;  %v3287_v5 = vmul.f32 0.7978846, %v3235_v15  ;;  %7084 = vtanh.f32 %v3274_v44  ;;  %v3186_v40 = vmul.f32 %v3134_v52, %v9690_v63  ;;  %v9726_v32 = vmul.f32 0.5, %v9519_v6  ;;  %v9731_v34 = vpop.f32.mrb[90].mxu1 }
 0xc95   :  { %v9720_v12 = vpop.eup %7074  ;;  %v3428_v13 = vmul.f32 %v3376_v8, %v9601_v7  ;;  %v6592_v20 = vpack.c.bf16 %v9712_v60, %v9709_v29  ;;  %v9729_v2 = vmul.f32 0.5, %v9513_v17  ;;  %v3081_v10 = vmul.f32 0.044715, %v9718_v57  ;;  %v9737_v7 = vpop.f32.mrb[91].mxu1 }
 0xc96   :  { %7086 = vtanh.f32 %v3287_v5  ;;  %v3238_v26 = vadd.f32 %v3186_v40, %v9690_v63  ;;  %v3223_v18 = vadd.f32 %v9554_v21, %v9519_v6  ;;  %v3224_v16 = vadd.f32 %v9549_v42, %v9513_v17  ;;  %v10578_v42 = vld [vmem:[#allocation54_spill] sm:$0xff] }
 0xc97   :  { %v6586_v44 = vpack.c.bf16 %v3428_v13, %v3427_v25  ;;  %v9742_v1 = vadd.f32 %v5840_v39, %v10576_v23  ;;  %v2999_v50 = vmul.f32 0.5, %v9377_v46  ;;  %v3133_v31 = vmul.f32 %v3081_v10, %v9718_v57  ;;  %v10577_v25 = vld [vmem:[#allocation16_spill] sm:$0xff] }
 0xc98   :  { %v3290_v41 = vmul.f32 0.7978846, %v3238_v26  ;;  %v3275_v11 = vmul.f32 0.7978846, %v3223_v18  ;;  %v3000_v15 = vmul.f32 0.5, %v9373_v62  ;;  %v3363_v21 = vadd.f32 1.0, %v9459_v22 }
 0xc99   :  { %6587 = vmatprep.subr.bf16.mxu0 %v6586_v44  ;;  %v3276_v52 = vmul.f32 0.7978846, %v3224_v16  ;;  %v3084_v6 = vmul.f32 0.044715, %v9742_v1  ;;  %v3364_v8 = vadd.f32 1.0, %v10577_v25  ;;  %v9750_v17 = vpop.eup %7076  ;;  %v3185_v46 = vmul.f32 %v3133_v31, %v9718_v57  ;;  %v9762_v5 = vpop.f32.mrb[92].mxu1 }
 0xc9a   :  { %6589 = vmatpush3.bf16.msra.mxu0 %v6588_v48  ;;  %7088 = vtanh.f32 %v3290_v41  ;;  %v9757_v39 = vadd.f32 %v2948_v56, %v10578_v42  ;;  %v9760_v62 = vmul.f32 0.5, %v9544_v58  ;;  %v9764_v22 = vpop.eup %7078  ;;  %v9767_v49 = vmul.f32 %v3363_v21, %v2999_v50  ;;  %v9771_v38 = vpop.f32.mrb[93].mxu1 }
 0xc9b   :  { %7090 = vtanh.f32 %v3275_v11  ;;  %v3136_v40 = vmul.f32 %v3084_v6, %v9742_v1  ;;  %v9769_v19 = vmul.f32 %v3364_v8, %v3000_v15  ;;  %v7081_v48 = vpop.eup %7080  ;;  %v3237_v56 = vadd.f32 %v3185_v46, %v9718_v57  ;;  %v10579_v15 = vld [vmem:[#allocation55_spill] sm:$0xff] }
 0xc9c   :  { %7092 = vtanh.f32 %v3276_v52  ;;  %v3083_v13 = vmul.f32 0.044715, %v9757_v39  ;;  %v9776_v26 = vmul.f32 0.5, %v9540_v61  ;;  %v3377_v18 = vadd.f32 1.0, %v7081_v48 }
 0xc9d   :  { %v9778_v10 = vpop.eup %7082  ;;  %v3188_v44 = vmul.f32 %v3136_v40, %v9742_v1  ;;  %v6596_v16 = vpack.c.bf16 %v9769_v19, %v9767_v49  ;;  %v3225_v23 = vadd.f32 %v9575_v59, %v9544_v58  ;;  %v3289_v41 = vmul.f32 0.7978846, %v3237_v56  ;;  %v10581_v56 = vld [vmem:[#allocation12_spill] sm:$0xff] }
 0xc9e   :  { %v7085_v50 = vpop.eup %7084  ;;  %v3135_v31 = vmul.f32 %v3083_v13, %v9757_v39  ;;  %v3226_v11 = vadd.f32 %v9570_v47, %v9540_v61  ;;  %v9790_v52 = vadd.f32 %v9702_v33, %v10579_v15  ;;  %v3429_v21 = vmul.f32 %v3377_v18, %v9669_v0  ;;  %v10580_v33 = vld [vmem:[#allocation10_spill] sm:$0xff]  ;;  %v10584_v15 = vld [vmem:[#allocation41_spill] sm:$0xff]  ;;  %v10588_v19 = vld [vmem:[#allocation56_spill] sm:$0xff] }
 0xc9f   :  { %v3378_v6 = vadd.f32 1.0, %v7085_v50  ;;  %v3240_v25 = vadd.f32 %v3188_v44, %v9742_v1  ;;  %v3277_v8 = vmul.f32 0.7978846, %v3225_v23  ;;  %7094 = vtanh.f32 %v3289_v41  ;;  %v10582_v44 = vld [vmem:[#allocation20_spill] sm:$0xff]  ;;  %v10583_v50 = vld [vmem:[#allocation17_spill] sm:$0xff] }
 0xca0   :  { %v9794_v46 = vpop.eup %7086  ;;  %v3187_v58 = vmul.f32 %v3135_v31, %v9757_v39  ;;  %v3278_v59 = vmul.f32 0.7978846, %v3226_v11  ;;  %v3086_v42 = vmul.f32 0.044715, %v9790_v52  ;;  %v3001_v40 = vmul.f32 0.5, %v10580_v33 }
 0xca1   :  { %v3430_v61 = vmul.f32 %v3378_v6, %v9678_v9  ;;  %v3292_v47 = vmul.f32 0.7978846, %v3240_v25  ;;  %7096 = vtanh.f32 %v3277_v8  ;;  %v3002_v13 = vmul.f32 0.5, %v10581_v56  ;;  %v10585_v25 = vld [vmem:[#allocation40_spill] sm:$0xff] }
 0xca2   :  { %v3239_v48 = vadd.f32 %v3187_v58, %v9757_v39  ;;  %7098 = vtanh.f32 %v3278_v59  ;;  %v3138_v0 = vmul.f32 %v3086_v42, %v9790_v52  ;;  %v3365_v23 = vadd.f32 1.0, %v10582_v44  ;;  %v10586_v44 = vld [vmem:[#allocation43_spill] sm:$0xff] }
 0xca3   :  { %v6590_v18 = vpack.c.bf16 %v3430_v61, %v3429_v21  ;;  %7100 = vtanh.f32 %v3292_v47  ;;  %v3366_v41 = vadd.f32 1.0, %v10583_v50  ;;  %v9810_v6 = vadd.f32 %v9707_v4, %v10584_v15 }
 0xca4   :  { %v9805_v31 = vpop.eup %7088  ;;  %v3291_v9 = vmul.f32 0.7978846, %v3239_v48  ;;  %v3190_v11 = vmul.f32 %v3138_v0, %v9790_v52  ;;  %v9814_v8 = vadd.f32 %v9731_v34, %v10585_v25  ;;  %v9816_v21 = vmul.f32 %v3365_v23, %v3001_v40 }
 0xca5   :  { %v7091_v58 = vpop.eup %7090  ;;  %6591 = vmatprep.subr.bf16.mxu0 %v6590_v18  ;;  %v9818_v59 = vmul.f32 %v3366_v41, %v3002_v13  ;;  %v3019_v42 = vmul.f32 0.5, %v9567_v27  ;;  %v3020_v61 = vmul.f32 0.5, %v9563_v37  ;;  %v3085_v33 = vmul.f32 0.044715, %v9810_v6  ;;  %v10587_v41 = vld [vmem:[#allocation42_spill] sm:$0xff] }
 0xca6   :  { %v7093_v47 = vpop.eup %7092  ;;  %6593 = vmatpush3.bf16.msra.mxu0 %v6592_v20  ;;  %v3379_v4 = vadd.f32 1.0, %v7091_v58  ;;  %7102 = vtanh.f32 %v3291_v9  ;;  %v3242_v34 = vadd.f32 %v3190_v11, %v9790_v52  ;;  %v3088_v0 = vmul.f32 0.044715, %v9814_v8 }
 0xca7   :  { %v3380_v48 = vadd.f32 1.0, %v7093_v47  ;;  %v6600_v40 = vpack.c.bf16 %v9818_v59, %v9816_v21  ;;  %v3383_v27 = vadd.f32 1.0, %v9680_v45  ;;  %v3137_v29 = vmul.f32 %v3085_v33, %v9810_v6 }
 0xca8   :  { %v3431_v37 = vmul.f32 %v3379_v4, %v9726_v32  ;;  %v3294_v56 = vmul.f32 0.7978846, %v3242_v34  ;;  %v3384_v60 = vadd.f32 1.0, %v9671_v28  ;;  %v3140_v13 = vmul.f32 %v3088_v0, %v9814_v8 }
 0xca9   :  { %v3432_v20 = vmul.f32 %v3380_v48, %v9729_v2  ;;  %v9836_v18 = vmul.f32 %v3383_v27, %v3019_v42  ;;  %v9840_v23 = vadd.f32 %v9737_v7, %v10586_v44  ;;  %v9842_v50 = vpop.eup %7094  ;;  %v3189_v45 = vmul.f32 %v3137_v29, %v9810_v6 }
 0xcaa   :  { %7104 = vtanh.f32 %v3294_v56  ;;  %v9845_v32 = vmul.f32 %v3384_v60, %v3020_v61  ;;  %v9849_v28 = vadd.f32 %v9762_v5, %v10587_v41  ;;  %v3192_v11 = vmul.f32 %v3140_v13, %v9814_v8 }
 0xcab   :  { %v7097_v2 = vpop.eup %7096  ;;  %v6594_v9 = vpack.c.bf16 %v3432_v20, %v3431_v37  ;;  %v3087_v15 = vmul.f32 0.044715, %v9840_v23  ;;  %v3021_v7 = vmul.f32 0.5, %v9595_v36  ;;  %v3241_v21 = vadd.f32 %v3189_v45, %v9810_v6 }
 0xcac   :  { %v7099_v25 = vpop.eup %7098  ;;  %v3381_v58 = vadd.f32 1.0, %v7097_v2  ;;  %v6603_v59 = vpack.c.bf16 %v9845_v32, %v9836_v18  ;;  %v3090_v42 = vmul.f32 0.044715, %v9849_v28  ;;  %v3244_v47 = vadd.f32 %v3192_v11, %v9814_v8 }
 0xcad   :  { %v9858_v61 = vpop.eup %7100  ;;  %6595 = vmatprep.subr.bf16.mxu0 %v6594_v9  ;;  %v3382_v5 = vadd.f32 1.0, %v7099_v25  ;;  %v3139_v4 = vmul.f32 %v3087_v15, %v9840_v23  ;;  %v3022_v34 = vmul.f32 0.5, %v9587_v3  ;;  %v3293_v33 = vmul.f32 0.7978846, %v3241_v21 }
 0xcae   :  { %6597 = vmatpush3.bf16.msra.mxu0 %v6596_v16  ;;  %v3433_v36 = vmul.f32 %v3381_v58, %v9760_v62  ;;  %v3142_v48 = vmul.f32 %v3090_v42, %v9849_v28  ;;  %v3385_v0 = vadd.f32 1.0, %v9698_v43  ;;  %v3296_v37 = vmul.f32 0.7978846, %v3244_v47 }
 0xcaf   :  { %v3434_v27 = vmul.f32 %v3382_v5, %v9776_v26  ;;  %v3191_v56 = vmul.f32 %v3139_v4, %v9840_v23  ;;  %v3386_v29 = vadd.f32 1.0, %v9694_v51  ;;  %7106 = vtanh.f32 %v3293_v33 }
 0xcb0   :  { %v7103_v60 = vpop.eup %7102  ;;  %v3194_v3 = vmul.f32 %v3142_v48, %v9849_v28  ;;  %v3437_v49 = vmul.f32 %v3385_v0, %v3021_v7  ;;  %v9875_v62 = vadd.f32 %v9771_v38, %v10588_v19  ;;  %7108 = vtanh.f32 %v3296_v37 }
 0xcb1   :  { %v6598_v16 = vpack.c.bf16 %v3434_v27, %v3433_v36  ;;  %v3243_v43 = vadd.f32 %v3191_v56, %v9840_v23  ;;  %v3438_v20 = vmul.f32 %v3386_v29, %v3022_v34  ;;  %v3023_v51 = vmul.f32 0.5, %v9625_v53  ;;  %v7206_v56 = vld [vmem:[%s10440_s1 + $0x20] sm:$0xff]  ;;  %v7207_v29 = vld [vmem:[%s10440_s1 + $0x48] sm:$0xff] }
 0xcb2   :  { %v3246_v26 = vadd.f32 %v3194_v3, %v9849_v28  ;;  %v3089_v13 = vmul.f32 0.044715, %v9875_v62  ;;  %v3024_v18 = vmul.f32 0.5, %v9616_v30  ;;  %v3387_v32 = vadd.f32 1.0, %v9720_v12 }
 0xcb3   :  { %6599 = vmatprep.subr.bf16.mxu0 %v6598_v16  ;;  %v3295_v44 = vmul.f32 0.7978846, %v3243_v43  ;;  %v6606_v45 = vpack.c.bf16 %v3438_v20, %v3437_v49  ;;  %v3388_v38 = vadd.f32 1.0, %v9714_v35  ;;  %v3025_v11 = vmul.f32 0.5, %v9643_v24  ;;  %v7204_v24 = vld [vmem:[%s10440_s1] sm:$0xff] }
 0xcb4   :  { %v7105_v41 = vpop.eup %7104  ;;  %6601 = vmatpush3.bf16.msra.mxu0 %v6600_v40  ;;  %v3298_v2 = vmul.f32 0.7978846, %v3246_v26  ;;  %v3141_v9 = vmul.f32 %v3089_v13, %v9875_v62  ;;  %v3026_v15 = vmul.f32 0.5, %v9639_v55  ;;  %v10589_v7 = vmov 0.0|0.0   ;;  %v7208_v13 = vld [vmem:[%s10440_s1 + $0x40] sm:$0xff] }
 0xcb5   :  { %6602 = vmatprep.subr.bf16.mxu0 %v10589_v7  ;;  %7110 = vtanh.f32 %v3295_v44  ;;  %v3439_v30 = vmul.f32 %v3387_v32, %v3023_v51  ;;  %v3440_v53 = vmul.f32 %v3388_v38, %v3024_v18  ;;  %v3389_v25 = vadd.f32 1.0, %v9764_v22 }
 0xcb6   :  { %7112 = vtanh.f32 %v3298_v2  ;;  %v3193_v12 = vmul.f32 %v3141_v9, %v9875_v62  ;;  %v3390_v35 = vadd.f32 1.0, %v9750_v17  ;;  %v3027_v40 = vmul.f32 0.5, %v9664_v14  ;;  %v7205_v14 = vld [vmem:[%s10440_s1 + $0x28] sm:$0xff] }
 0xcb7   :  { %3520 = vmatmul.mubr.f32.vlgmr.msra.gmra.mrb[82].mxu0 %v7204_v24  ;;  %v6609_v55 = vpack.c.bf16 %v3440_v53, %v3439_v30  ;;  %v3441_v58 = vmul.f32 %v3389_v25, %v3025_v11  ;;  %v3028_v21 = vmul.f32 0.5, %v9650_v54  ;;  %v3391_v42 = vadd.f32 1.0, %v9794_v46  ;;  %v10591_v24 = vld [vmem:[#allocation3_spill] sm:$0xff] }
 0xcb8   :  { %6604 = vmatpush1.bf16.msra.mxu0 %v6603_v59  ;;  %v3245_v22 = vadd.f32 %v3193_v12, %v9875_v62  ;;  %v3442_v5 = vmul.f32 %v3390_v35, %v3026_v15  ;;  %v3392_v47 = vadd.f32 1.0, %v9778_v10  ;;  %v3029_v17 = vmul.f32 0.5, %v9718_v57  ;;  %3524 = vmatprep.mubr.f32.mxu0 %v7205_v14  ;;  %v10590_v12 = vld [vmem:[#allocation2_spill] sm:$0xff]  ;;  %v7212_v35 = vld [vmem:[%s10440_s1 + $0x30] sm:$0xff] }
 0xcb9   :  { %6605 = vmatprep.subr.bf16.mxu0 %v10589_v7  ;;  %v3443_v4 = vmul.f32 %v3391_v42, %v3027_v40  ;;  %v3030_v54 = vmul.f32 0.5, %v9690_v63  ;;  %v3393_v46 = vadd.f32 1.0, %v9842_v50  ;;  %v3394_v59 = vadd.f32 1.0, %v9805_v31  ;;  %v7107_v34 = vpop.eup %7106  ;;  %v7213_v40 = vld [vmem:[%s10440_s1 + $0x58] sm:$0xff] }
 0xcba   :  { %v3297_v36 = vmul.f32 0.7978846, %v3245_v22  ;;  %v6612_v33 = vpack.c.bf16 %v3442_v5, %v3441_v58  ;;  %v3444_v10 = vmul.f32 %v3392_v47, %v3028_v21  ;;  %v7109_v48 = vpop.eup %7108  ;;  %v3031_v27 = vmul.f32 0.5, %v9757_v39  ;;  %v10592_v58 = vld [vmem:[#allocation4_spill] sm:$0xff]  ;;  %v10594_v42 = vld [vmem:[#allocation5_spill] sm:$0xff]  ;;  %v10595_v22 = vld [vmem:[#allocation6_spill] sm:$0xff] }
 0xcbb   :  { %v3445_v57 = vmul.f32 %v3393_v46, %v3029_v17  ;;  %v3446_v0 = vmul.f32 %v3394_v59, %v3030_v54  ;;  %v3395_v37 = vadd.f32 1.0, %v7103_v60  ;;  %3525 = vmatmul.mubr.f32.gmra.mrb[84].mxu0 %v7206_v56  ;;  %v3032_v31 = vmul.f32 0.5, %v9742_v1  ;;  %v10596_v5 = vld [vmem:[#allocation7_spill] sm:$0xff]  ;;  %v10597_v47 = vld [vmem:[#allocation8_spill] sm:$0xff]  ;;  %v10598_v17 = vld [vmem:[#allocation9_spill] sm:$0xff] }
 0xcbc   :  { %6607 = vmatpush1.bf16.msra.mxu0 %v6606_v45  ;;  %7114 = vtanh.f32 %v3297_v36  ;;  %v6615_v63 = vpack.c.bf16 %v3444_v10, %v3443_v4  ;;  %v3396_v50 = vadd.f32 1.0, %v9858_v61  ;;  %3529 = vmatprep.mubr.f32.mxu0 %v7207_v29  ;;  %v3033_v3 = vmul.f32 0.5, %v9810_v6 }
 0xcbd   :  { %6608 = vmatprep.subr.bf16.mxu0 %v10589_v7  ;;  %v6618_v39 = vpack.c.bf16 %v3446_v0, %v3445_v57  ;;  %v3447_v60 = vmul.f32 %v3395_v37, %v3031_v27  ;;  %v3397_v49 = vadd.f32 1.0, %v7107_v34  ;;  %v3034_v16 = vmul.f32 0.5, %v9790_v52  ;;  %v7209_v52 = vld [vmem:[%s10440_s1 + $0x18] sm:$0xff] }
 0xcbe   :  { %v3448_v19 = vmul.f32 %v3396_v50, %v3032_v31  ;;  %v3398_v43 = vadd.f32 1.0, %v7105_v41  ;;  %v3036_v61 = vmul.f32 0.5, %v9814_v8  ;;  %v3400_v26 = vadd.f32 1.0, %v7109_v48  ;;  %v10599_v27 = vld [vmem:[#allocation85_spill] sm:$0xff] }
 0xcbf   :  { %v7111_v20 = vpop.eup %7110  ;;  %v3449_v1 = vmul.f32 %v3397_v49, %v3033_v3  ;;  %3530 = vmatmul.mubr.f32.gmra.mrb[86].mxu0 %v7208_v13  ;;  %v3035_v6 = vmul.f32 0.5, %v9840_v23  ;;  %v3038_v9 = vmul.f32 0.5, %v9849_v28  ;;  %v3037_v11 = vmul.f32 0.5, %v9875_v62  ;;  %v7210_v28 = vld [vmem:[%s10440_s1 + $0x10] sm:$0xff]  ;;  %v7211_v62 = vld [vmem:[%s10440_s1 + $0x38] sm:$0xff]  ;;  %v10606_v13 = vld [vmem:[#allocation59_spill] sm:$0xff] }
 0xcc0   :  { %v7113_v51 = vpop.eup %7112  ;;  %6610 = vmatpush1.bf16.msra.mxu0 %v6609_v55  ;;  %v6621_v18 = vpack.c.bf16 %v3448_v19, %v3447_v60  ;;  %v3450_v44 = vmul.f32 %v3398_v43, %v3034_v16  ;;  %v3399_v45 = vadd.f32 1.0, %v7111_v20  ;;  %4693 = vmatprep.mubr.msk.f32.mxu0 %vm1708_vm2, %v7209_v52  ;;  %v3452_v8 = vmul.f32 %v3400_v26, %v3036_v61  ;;  %v7214_v55 = vld [vmem:[%s10440_s1 + $0x50] sm:$0xff]  ;;  %v10603_v16 = vld [vmem:[#allocation58_spill] sm:$0xff]  ;;  %v10605_v26 = vld [vmem:[#allocation61_spill] sm:$0xff] }
 0xcc1   :  { %6611 = vmatprep.subr.bf16.mxu0 %v10589_v7  ;;  %v3402_v41 = vadd.f32 1.0, %v7113_v51  ;;  %v10593_v21 = vmov 0.0   ;;  %v10602_v49 = vld [vmem:[#allocation60_spill] sm:$0xff]  ;;  %v10611_v52 = vld [vmem:[#allocation66_spill] sm:$0xff] }
 0xcc2   :  { %v6624_v32 = vpack.c.bf16 %v3450_v44, %v3449_v1  ;;  %v3451_v38 = vmul.f32 %v3399_v45, %v3035_v6  ;;  %v10604_v1 = vld [vmem:[#allocation94_spill] sm:$0xff]  ;;  %v10608_v44 = vld [vmem:[#allocation63_spill] sm:$0xff]  ;;  %v10609_v6 = vld [vmem:[#allocation64_spill] sm:$0xff] }
 0xcc3   :  { %v3454_v30 = vmul.f32 %v3402_v41, %v3038_v9  ;;  %v10610_v45 = vld [vmem:[#allocation65_spill] sm:$0xff] }
 0xcc4   :  { %6613 = vmatpush1.bf16.msra.mxu0 %v6612_v33  ;;  %v6627_v2 = vpack.c.bf16 %v3452_v8, %v3451_v38  ;;  %v10612_v8 = vld [vmem:[#allocation67_spill] sm:$0xff] }
 0xcc5   :  { %6614 = vmatprep.subr.bf16.mxu0 %v10589_v7 }
 0xcc6   :  { %v7115_v23 = vpop.eup %7114 }
 0xcc7   :  { %v3401_v15 = vadd.f32 1.0, %v7115_v23 }
 0xcc8   :  { %6616 = vmatpush1.bf16.msra.mxu0 %v6615_v63  ;;  %v10600_v63 = vld [vmem:[#allocation57_spill] sm:$0xff] }
 0xcc9   :  { %6617 = vmatprep.subr.bf16.mxu0 %v10589_v7  ;;  %v3453_v53 = vmul.f32 %v3401_v15, %v3037_v11  ;;  %v10613_v15 = vld [vmem:[#allocation68_spill] sm:$0xff] }
 0xccb   :  { %v6630_v25 = vpack.c.bf16 %v3454_v30, %v3453_v53 }
 0xccc   :  { %6619 = vmatpush1.bf16.msra.mxu0 %v6618_v39  ;;  %v10601_v39 = vld [vmem:[#allocation86_spill] sm:$0xff] }
 0xccd   :  { %6620 = vmatprep.subr.bf16.mxu0 %v10589_v7 }
 0xcd0   :  { %6622 = vmatpush1.bf16.msra.mxu0 %v6621_v18  ;;  %v10607_v18 = vld [vmem:[#allocation62_spill] sm:$0xff] }
 0xcd1   :  { %6623 = vmatprep.subr.bf16.mxu0 %v10589_v7 }
 0xcd4   :  { %6625 = vmatpush1.bf16.msra.mxu0 %v6624_v32 }
 0xcd5   :  { %6626 = vmatprep.subr.bf16.mxu0 %v10589_v7 }
 0xcd8   :  { %6628 = vmatpush1.bf16.msra.mxu0 %v6627_v2 }
 0xcd9   :  { %6629 = vmatprep.subr.bf16.mxu0 %v10589_v7 }
 0xcdc   :  { %6631 = vmatpush1.bf16.msra.mxu0 %v6630_v25 }
 0xcdd   :  { %6632 = vmatprep.subr.bf16.mxu0 %v10589_v7 }
 0xcdf   :  { %3600 = vmatmul.mubr.f32.vlgmr.msra.gmra.mrb[88].mxu0 %v7210_v28 }
 0xce0   :  { %4694 = vmatprep.mubr.msk.f32.mxu0 %vm1708_vm2, %v7211_v62  ;;  %6634 = vmatpush3.bf16.msra.mxu0 %v10590_v12  ;;  %v10614_v62 = vld [vmem:[#allocation69_spill] sm:$0xff] }
 0xce1   :  { %6635 = vmatprep.subr.bf16.mxu0 %v10589_v7 }
 0xce3   :  { %3605 = vmatmul.mubr.f32.gmra.mrb[90].mxu0 %v7212_v35 }
 0xce4   :  { %4695 = vmatprep.mubr.msk.f32.mxu0 %vm1708_vm2, %v7213_v40  ;;  %6637 = vmatpush3.bf16.msra.mxu0 %v10591_v24  ;;  %v10615_v40 = vld [vmem:[#allocation70_spill] sm:$0xff] }
 0xce5   :  { %6638 = vmatprep.subr.bf16.mxu0 %v10589_v7 }
 0xce7   :  { %3610 = vmatmul.mubr.f32.gmra.mrb[92].mxu0 %v7214_v55  ;;  %v10616_v55 = vld [vmem:[#allocation71_spill] sm:$0xff] }
 0xce8   :  { %6640 = vmatpush3.bf16.msra.mxu0 %v10592_v58  ;;  %5882 = vmatprep.mubr.msk.f32.mxu0 %vm7222_vm0, %v10593_v21 }
 0xce9   :  { %6641 = vmatprep.subr.bf16.mxu0 %v10589_v7 }
 0xcec   :  { %6643 = vmatpush3.bf16.msra.mxu0 %v10594_v42 }
 0xced   :  { %6644 = vmatprep.subr.bf16.mxu0 %v10589_v7 }
 0xcf0   :  { %6646 = vmatpush3.bf16.msra.mxu0 %v10595_v22 }
 0xcf1   :  { %6647 = vmatprep.subr.bf16.mxu0 %v10589_v7 }
 0xcf4   :  { %6649 = vmatpush3.bf16.msra.mxu0 %v10596_v5 }
 0xcf5   :  { %6650 = vmatprep.subr.bf16.mxu0 %v10589_v7 }
 0xcf8   :  { %6652 = vmatpush3.bf16.msra.mxu0 %v10597_v47 }
 0xcf9   :  { %6653 = vmatprep.subr.bf16.mxu0 %v10589_v7 }
 0xcfc   :  { %6655 = vmatpush3.bf16.msra.mxu0 %v10598_v17 }
 0xcfd   :  { %6680 = vmatprep.subr.bf16.mxu0 %v10589_v7 }
 0xd8a   :  { %v5073_v14 = vpop.f32.mrb[82].mxu0 }
 0xd8b   :  { %v5074_v4 = vpop.f32.mrb[83].mxu0 }
 0xd8c   :  { %v5075_v54 = vadd.f32 %v5074_v4, %v5073_v14  ;;  %v10617_v14 = vld [vmem:[#allocation72_spill] sm:$0xff]  ;;  %v10618_v4 = vld [vmem:[#allocation73_spill] sm:$0xff] }
 0xd8e   :  { %v5076_v46 = vpop.f32.mrb[84].mxu0 }
 0xd8f   :  { %v5077_v59 = vpop.f32.mrb[85].mxu0 }
 0xd90   :  { %v5078_v34 = vadd.f32 %v5077_v59, %v5076_v46  ;;  %v10620_v46 = vld [vmem:[#allocation75_spill] sm:$0xff] }
 0xd92   :  { %v5079_v36 = vpop.f32.mrb[86].mxu0 }
 0xd93   :  { %v5080_v33 = vpop.f32.mrb[87].mxu0 }
 0xd94   :  { %v5081_v10 = vadd.f32 %v5080_v33, %v5079_v36 }
 0xdb2   :  { %v3601_v48 = vpop.f32.mrb[88].mxu0 }
 0xdb3   :  { %v3602_v57 = vadd.f32 %v5075_v54, %v3601_v48  ;;  %v3603_v0 = vpop.f32.mrb[89].mxu0  ;;  %v10619_v54 = vld [vmem:[#allocation74_spill] sm:$0xff] }
 0xdb5   :  { %v3615_v37 = vadd.f32 %v3602_v57, %v10599_v27 }
 0xdb6   :  { %v3606_v56 = vpop.f32.mrb[90].mxu0 }
 0xdb7   :  { %v9975_v31 = vadd.f32 %v3615_v37, %v10600_v63  ;;  %v3607_v50 = vadd.f32 %v5078_v34, %v3606_v56  ;;  %v3608_v29 = vpop.f32.mrb[91].mxu0  ;;  %v7215_v63 = vld [vmem:[%s10254_s12] ss:$0 sm:$0xff] }
 0xdb9   :  { %v3616_v60 = vadd.f32 %v3607_v50, %v10601_v39  ;;  %5883 = vmatmul.mubr.f32.vlgmr.msra.gmra.mrb[94].mxu0 %v9975_v31  ;;  %v7216_v39 = vld [vmem:[%s10255_s13] ss:$0 sm:$0xff] }
 0xdba   :  { %v3611_v3 = vpop.f32.mrb[92].mxu0  ;;  %5885 = vmatprep.mubr.msk.f32.mxu0 %vm7222_vm0, %v10593_v21  ;;  %6682 = vmatpush3.bf16.msra.mxu0 %v10602_v49 }
 0xdbb   :  { %v3612_v19 = vadd.f32 %v5081_v10, %v3611_v3  ;;  %v9983_v43 = vadd.f32 %v3616_v60, %v10603_v16  ;;  %v3613_v20 = vpop.f32.mrb[93].mxu0  ;;  %6683 = vmatprep.subr.bf16.mxu0 %v10589_v7  ;;  %v10621_v16 = vld [vmem:[#allocation76_spill] sm:$0xff] }
 0xdbd   :  { %v3617_v61 = vadd.f32 %v3612_v19, %v10604_v1  ;;  %5886 = vmatmul.mubr.f32.gmra.mrb[96].mxu0 %v9983_v43 }
 0xdbe   :  { %5888 = vmatprep.mubr.msk.f32.mxu0 %vm7222_vm0, %v10593_v21  ;;  %6685 = vmatpush3.bf16.msra.mxu0 %v10605_v26  ;;  %v10622_v26 = vld [vmem:[#allocation77_spill] sm:$0xff] }
 0xdbf   :  { %v9992_v51 = vadd.f32 %v3617_v61, %v10606_v13  ;;  %6686 = vmatprep.subr.bf16.mxu0 %v10589_v7 }
 0xdc1   :  { %5889 = vmatmul.mubr.f32.gmra.mrb[98].mxu0 %v9992_v51 }
 0xdc2   :  { %6688 = vmatpush3.bf16.msra.mxu0 %v10607_v18  ;;  %5964 = vmatprep.mubr.msk.f32.mxu0 %vm7222_vm0, %v10593_v21  ;;  %v10623_v18 = vld [vmem:[#allocation78_spill] sm:$0xff] }
 0xdc3   :  { %6689 = vmatprep.subr.bf16.mxu0 %v10589_v7 }
 0xdc6   :  { %6691 = vmatpush3.bf16.msra.mxu0 %v10608_v44  ;;  %v10624_v44 = vld [vmem:[#allocation79_spill] sm:$0xff] }
 0xdc7   :  { %6692 = vmatprep.subr.bf16.mxu0 %v10589_v7 }
 0xdca   :  { %6694 = vmatpush3.bf16.msra.mxu0 %v10609_v6  ;;  %v10625_v6 = vld [vmem:[#allocation80_spill] sm:$0xff] }
 0xdcb   :  { %6695 = vmatprep.subr.bf16.mxu0 %v10589_v7 }
 0xdce   :  { %6697 = vmatpush3.bf16.msra.mxu0 %v10610_v45  ;;  %v10626_v45 = vld [vmem:[#allocation81_spill] sm:$0xff] }
 0xdcf   :  { %6698 = vmatprep.subr.bf16.mxu0 %v10589_v7 }
 0xdd2   :  { %6700 = vmatpush3.bf16.msra.mxu0 %v10611_v52  ;;  %v10627_v52 = vld [vmem:[#allocation82_spill] sm:$0xff] }
 0xdd3   :  { %6701 = vmatprep.subr.bf16.mxu0 %v10589_v7 }
 0xdd6   :  { %6703 = vmatpush3.bf16.msra.mxu0 %v10612_v8  ;;  %v10628_v8 = vld [vmem:[#allocation83_spill] sm:$0xff] }
 0xdd7   :  { %6728 = vmatprep.subr.bf16.mxu0 %v10589_v7 }
 0xe8c   :  { %v3687_v32 = vpop.f32.mrb[94].mxu0 }
 0xe8d   :  { %v3701_v38 = vsub.f32 %v9975_v31, %v3687_v32  ;;  %v5884_v41 = vpop.f32.mrb[95].mxu0 }
 0xe8f   :  { %v3704_v2 = vmul.f32 %v3701_v38, %v3701_v38 }
 0xe90   :  { %v3692_v9 = vpop.f32.mrb[96].mxu0 }
 0xe91   :  { %v3702_v23 = vsub.f32 %v9983_v43, %v3692_v9  ;;  %v5887_v11 = vpop.f32.mrb[97].mxu0  ;;  %5924 = vmatmul.mubr.f32.vlgmr.msra.gmra.mrb[94].mxu1 %v3704_v2 }
 0xe92   :  { %5926 = vmatprep.mubr.msk.f32.mxu1 %vm7222_vm0, %v10593_v21  ;;  %6706 = vmatpush3.bf16.msra.mxu1 %v10613_v15 }
 0xe93   :  { %v3705_v30 = vmul.f32 %v3702_v23, %v3702_v23  ;;  %6707 = vmatprep.subr.bf16.mxu1 %v10589_v7 }
 0xe94   :  { %v3697_v53 = vpop.f32.mrb[98].mxu0 }
 0xe95   :  { %v3703_v25 = vsub.f32 %v9992_v51, %v3697_v53  ;;  %v5890_v28 = vpop.f32.mrb[99].mxu0  ;;  %5927 = vmatmul.mubr.f32.gmra.mrb[96].mxu1 %v3705_v30 }
 0xe96   :  { %5929 = vmatprep.mubr.msk.f32.mxu1 %vm7222_vm0, %v10593_v21  ;;  %6709 = vmatpush3.bf16.msra.mxu1 %v10614_v62 }
 0xe97   :  { %v3706_v35 = vmul.f32 %v3703_v25, %v3703_v25  ;;  %6710 = vmatprep.subr.bf16.mxu1 %v10589_v7 }
 0xe99   :  { %5930 = vmatmul.mubr.f32.gmra.mrb[98].mxu1 %v3706_v35 }
 0xe9a   :  { %6712 = vmatpush3.bf16.msra.mxu1 %v10615_v40  ;;  %6005 = vmatprep.mubr.msk.f32.mxu1 %vm7222_vm0, %v10593_v21 }
 0xe9b   :  { %6713 = vmatprep.subr.bf16.mxu1 %v10589_v7 }
 0xe9e   :  { %6715 = vmatpush3.bf16.msra.mxu1 %v10616_v55 }
 0xe9f   :  { %6716 = vmatprep.subr.bf16.mxu1 %v10589_v7 }
 0xea2   :  { %6718 = vmatpush3.bf16.msra.mxu1 %v10617_v14 }
 0xea3   :  { %6719 = vmatprep.subr.bf16.mxu1 %v10589_v7 }
 0xea6   :  { %6721 = vmatpush3.bf16.msra.mxu1 %v10618_v4 }
 0xea7   :  { %6722 = vmatprep.subr.bf16.mxu1 %v10589_v7 }
 0xeaa   :  { %6724 = vmatpush3.bf16.msra.mxu1 %v10619_v54 }
 0xeab   :  { %6725 = vmatprep.subr.bf16.mxu1 %v10589_v7 }
 0xeae   :  { %6727 = vmatpush3.bf16.msra.mxu1 %v10620_v46 }
 0xeaf   :  { %6752 = vmatprep.subr.bf16.mxu1 %v10589_v7 }
 0xf64   :  { %v3773_v59 = vpop.f32.mrb[94].mxu1 }
 0xf65   :  { %v3774_v34 = vadd.f32 1e-05, %v3773_v59  ;;  %v5925_v36 = vpop.f32.mrb[95].mxu1 }
 0xf67   :  { %7116 = vrsqrt.f32 %v3774_v34 }
 0xf68   :  { %v3778_v33 = vpop.f32.mrb[96].mxu1 }
 0xf69   :  { %v3779_v10 = vadd.f32 1e-05, %v3778_v33  ;;  %v5928_v48 = vpop.f32.mrb[97].mxu1 }
 0xf6b   :  { %7118 = vrsqrt.f32 %v3779_v10 }
 0xf6c   :  { %v3783_v57 = vpop.f32.mrb[98].mxu1 }
 0xf6d   :  { %v3784_v0 = vadd.f32 1e-05, %v3783_v57  ;;  %v5931_v27 = vpop.f32.mrb[99].mxu1 }
 0xf6f   :  { %7120 = vrsqrt.f32 %v3784_v0 }
 0xf71   :  { %v7117_v37 = vpop.eup %7116 }
 0xf72   :  { %v3790_v56 = vmul.f32 %v7117_v37, %v3701_v38  ;;  %v7217_v38 = vld [vmem:[%s10257_s7] ss:$0 sm:$0xff] }
 0xf74   :  { %v3793_v50 = vmul.f32 %v7215_v63, %v3790_v56 }
 0xf75   :  { %v7119_v29 = vpop.eup %7118 }
 0xf76   :  { %v3796_v60 = vadd.f32 %v7216_v39, %v3793_v50  ;;  %v3791_v3 = vmul.f32 %v7119_v29, %v3702_v23  ;;  %v10629_v50 = vld [vmem:[#allocation84_spill] sm:$0xff] }
 0xf78   :  { %5965 = vmatmul.mubr.f32.vlgmr.msra.gmra.mrb[100].mxu0 %v3796_v60  ;;  %v3794_v49 = vmul.f32 %v7215_v63, %v3791_v3 }
 0xf79   :  { %v7121_v19 = vpop.eup %7120  ;;  %5967 = vmatprep.mubr.msk.f32.mxu0 %vm7222_vm0, %v10593_v21  ;;  %6730 = vmatpush3.bf16.msra.mxu0 %v10621_v16  ;;  %v10631_v16 = vld [vmem:[#allocation88_spill] sm:$0xff] }
 0xf7a   :  { %v3797_v20 = vadd.f32 %v7216_v39, %v3794_v49  ;;  %v3792_v1 = vmul.f32 %v7121_v19, %v3703_v25  ;;  %6731 = vmatprep.subr.bf16.mxu0 %v10589_v7  ;;  %v10630_v49 = vld [vmem:[#allocation87_spill] sm:$0xff] }
 0xf7c   :  { %5968 = vmatmul.mubr.f32.gmra.mrb[102].mxu0 %v3797_v20  ;;  %v3795_v61 = vmul.f32 %v7215_v63, %v3792_v1  ;;  %v10632_v20 = vld [vmem:[#allocation89_spill] sm:$0xff]  ;;  %v10633_v1 = vld [vmem:[#allocation90_spill] sm:$0xff] }
 0xf7d   :  { %5970 = vmatprep.mubr.msk.f32.mxu0 %vm7222_vm0, %v10593_v21  ;;  %6733 = vmatpush3.bf16.msra.mxu0 %v10622_v26  ;;  %v10635_v26 = vld [vmem:[#allocation92_spill] sm:$0xff] }
 0xf7e   :  { %v3798_v13 = vadd.f32 %v7216_v39, %v3795_v61  ;;  %6734 = vmatprep.subr.bf16.mxu0 %v10589_v7  ;;  %v10634_v61 = vld [vmem:[#allocation91_spill] sm:$0xff] }
 0xf80   :  { %5971 = vmatmul.mubr.f32.gmra.mrb[104].mxu0 %v3798_v13  ;;  %v10636_v13 = vld [vmem:[#allocation93_spill] sm:$0xff] }
 0xf81   :  { %6736 = vmatpush3.bf16.msra.mxu0 %v10623_v18  ;;  %6046 = vmatprep.mubr.msk.f32.mxu0 %vm7222_vm0, %v10593_v21 }
 0xf82   :  { %6737 = vmatprep.subr.bf16.mxu0 %v10589_v7 }
 0xf85   :  { %6739 = vmatpush3.bf16.msra.mxu0 %v10624_v44 }
 0xf86   :  { %6740 = vmatprep.subr.bf16.mxu0 %v10589_v7 }
 0xf89   :  { %6742 = vmatpush3.bf16.msra.mxu0 %v10625_v6 }
 0xf8a   :  { %6743 = vmatprep.subr.bf16.mxu0 %v10589_v7 }
 0xf8d   :  { %6745 = vmatpush3.bf16.msra.mxu0 %v10626_v45  ;;  %v7218_v45 = vld [vmem:[%s10259_s9] ss:$0 sm:$0xff] }
 0xf8e   :  { %6746 = vmatprep.subr.bf16.mxu0 %v10589_v7 }
 0xf91   :  { %6748 = vmatpush3.bf16.msra.mxu0 %v10627_v52 }
 0xf92   :  { %6749 = vmatprep.subr.bf16.mxu0 %v10589_v7 }
 0xf95   :  { %6751 = vmatpush3.bf16.msra.mxu0 %v10628_v8 }
 0xf96   :  { %6776 = vmatprep.subr.bf16.mxu0 %v10589_v7 }
0x104b   :  { %v3865_v32 = vpop.f32.mrb[100].mxu0 }
0x104c   :  { %v3866_v41 = vadd.f32 %v7217_v38, %v3865_v32  ;;  %v5966_v2 = vpop.f32.mrb[101].mxu0 }
0x104e   :  { %v3882_v9 = vmul.f32 0.044715, %v3866_v41  ;;  %v3879_v57 = vmul.f32 0.5, %v3866_v41 }
0x104f   :  { %v3870_v23 = vpop.f32.mrb[102].mxu0 }
0x1050   :  { %v3885_v11 = vmul.f32 %v3882_v9, %v3866_v41  ;;  %v3871_v15 = vadd.f32 %v7217_v38, %v3870_v23  ;;  %v5969_v30 = vpop.f32.mrb[103].mxu0  ;;  %v7219_v23 = vld [vmem:[%s10260_s15] ss:$0 sm:$0xff] }
0x1052   :  { %v3888_v53 = vmul.f32 %v3885_v11, %v3866_v41  ;;  %v3883_v25 = vmul.f32 0.044715, %v3871_v15  ;;  %v3880_v56 = vmul.f32 0.5, %v3871_v15 }
0x1053   :  { %v3875_v28 = vpop.f32.mrb[104].mxu0 }
0x1054   :  { %v3891_v62 = vadd.f32 %v3888_v53, %v3866_v41  ;;  %v3886_v35 = vmul.f32 %v3883_v25, %v3871_v15  ;;  %v3876_v40 = vadd.f32 %v7217_v38, %v3875_v28  ;;  %v5972_v55 = vpop.f32.mrb[105].mxu0 }
0x1056   :  { %v3894_v14 = vmul.f32 0.7978846, %v3891_v62  ;;  %v3884_v4 = vmul.f32 0.044715, %v3876_v40  ;;  %v3889_v54 = vmul.f32 %v3886_v35, %v3871_v15  ;;  %v3881_v60 = vmul.f32 0.5, %v3876_v40 }
0x1058   :  { %7122 = vtanh.f32 %v3894_v14  ;;  %v3887_v46 = vmul.f32 %v3884_v4, %v3876_v40  ;;  %v3892_v59 = vadd.f32 %v3889_v54, %v3871_v15 }
0x105a   :  { %v3895_v34 = vmul.f32 0.7978846, %v3892_v59  ;;  %v3890_v36 = vmul.f32 %v3887_v46, %v3876_v40 }
0x105c   :  { %7124 = vtanh.f32 %v3895_v34  ;;  %v3893_v33 = vadd.f32 %v3890_v36, %v3876_v40 }
0x105e   :  { %v3896_v10 = vmul.f32 0.7978846, %v3893_v33 }
0x1060   :  { %7126 = vtanh.f32 %v3896_v10 }
0x1062   :  { %v7123_v48 = vpop.eup %7122 }
0x1063   :  { %v3900_v0 = vadd.f32 1.0, %v7123_v48 }
0x1065   :  { %v3903_v27 = vmul.f32 %v3900_v0, %v3879_v57 }
0x1066   :  { %v7125_v37 = vpop.eup %7124 }
0x1067   :  { %6006 = vmatmul.mubr.f32.vlgmr.msra.gmra.mrb[100].mxu1 %v3903_v27  ;;  %v3901_v63 = vadd.f32 1.0, %v7125_v37 }
0x1068   :  { %6008 = vmatprep.mubr.msk.f32.mxu1 %vm7222_vm0, %v10593_v21  ;;  %6754 = vmatpush3.bf16.msra.mxu1 %v10629_v50 }
0x1069   :  { %v3904_v29 = vmul.f32 %v3901_v63, %v3880_v56  ;;  %6755 = vmatprep.subr.bf16.mxu1 %v10589_v7 }
0x106a   :  { %v7127_v39 = vpop.eup %7126 }
0x106b   :  { %6009 = vmatmul.mubr.f32.gmra.mrb[102].mxu1 %v3904_v29  ;;  %v3902_v3 = vadd.f32 1.0, %v7127_v39 }
0x106c   :  { %6011 = vmatprep.mubr.msk.f32.mxu1 %vm7222_vm0, %v10593_v21  ;;  %6757 = vmatpush3.bf16.msra.mxu1 %v10630_v49 }
0x106d   :  { %v3905_v19 = vmul.f32 %v3902_v3, %v3881_v60  ;;  %6758 = vmatprep.subr.bf16.mxu1 %v10589_v7 }
0x106f   :  { %6012 = vmatmul.mubr.f32.gmra.mrb[104].mxu1 %v3905_v19 }
0x1070   :  { %6760 = vmatpush3.bf16.msra.mxu1 %v10631_v16  ;;  %6087 = vmatprep.mubr.msk.f32.mxu1 %vm7222_vm0, %v10593_v21 }
0x1071   :  { %6761 = vmatprep.subr.bf16.mxu1 %v10589_v7 }
0x1074   :  { %6763 = vmatpush3.bf16.msra.mxu1 %v10632_v20 }
0x1075   :  { %6764 = vmatprep.subr.bf16.mxu1 %v10589_v7 }
0x1078   :  { %6766 = vmatpush3.bf16.msra.mxu1 %v10633_v1 }
0x1079   :  { %6767 = vmatprep.subr.bf16.mxu1 %v10589_v7 }
0x107c   :  { %6769 = vmatpush3.bf16.msra.mxu1 %v10634_v61 }
0x107d   :  { %6770 = vmatprep.subr.bf16.mxu1 %v10589_v7 }
0x1080   :  { %6772 = vmatpush3.bf16.msra.mxu1 %v10635_v26 }
0x1081   :  { %6773 = vmatprep.subr.bf16.mxu1 %v10589_v7 }
0x1084   :  { %6775 = vmatpush3.bf16.msra.mxu1 %v10636_v13 }
0x1085   :  { %6800 = vmatprep.subr.bf16.mxu1 %v10589_v7 }
0x113a   :  { %v3972_v18 = vpop.f32.mrb[100].mxu1 }
0x113b   :  { %v3986_v44 = vadd.f32 %v3972_v18, %v9975_v31  ;;  %v6007_v6 = vpop.f32.mrb[101].mxu1 }
0x113d   :  { %v10092_v52 = vadd.f32 %v7218_v45, %v3986_v44 }
0x113e   :  { %v3977_v8 = vpop.f32.mrb[102].mxu1 }
0x113f   :  { %v3987_v32 = vadd.f32 %v3977_v8, %v9983_v43  ;;  %v6010_v38 = vpop.f32.mrb[103].mxu1  ;;  %6047 = vmatmul.mubr.f32.vlgmr.msra.gmra.mrb[106].mxu0 %v10092_v52 }
0x1140   :  { %6778 = vmatpush3.bf16.msra.mxu0 %v10590_v12  ;;  %6049 = vmatprep.mubr.msk.f32.mxu0 %vm7222_vm0, %v10593_v21 }
0x1141   :  { %v10099_v41 = vadd.f32 %v7218_v45, %v3987_v32  ;;  %6779 = vmatprep.subr.bf16.mxu0 %v10589_v7 }
0x1142   :  { %v3982_v31 = vpop.f32.mrb[104].mxu1 }
0x1143   :  { %v3988_v2 = vadd.f32 %v3982_v31, %v9992_v51  ;;  %v6013_v9 = vpop.f32.mrb[105].mxu1  ;;  %6050 = vmatmul.mubr.f32.gmra.mrb[108].mxu0 %v10099_v41 }
0x1144   :  { %6781 = vmatpush3.bf16.msra.mxu0 %v10591_v24  ;;  %6052 = vmatprep.mubr.msk.f32.mxu0 %vm7222_vm0, %v10593_v21 }
0x1145   :  { %v10107_v43 = vadd.f32 %v7218_v45, %v3988_v2  ;;  %6782 = vmatprep.subr.bf16.mxu0 %v10589_v7 }
0x1147   :  { %6053 = vmatmul.mubr.f32.gmra.mrb[110].mxu0 %v10107_v43 }
0x1148   :  { %6784 = vmatpush3.bf16.msra.mxu0 %v10592_v58  ;;  %6128 = vmatprep.mubr.msk.f32.mxu0 %vm7222_vm0, %v10593_v21 }
0x1149   :  { %6785 = vmatprep.subr.bf16.mxu0 %v10589_v7 }
0x114c   :  { %6787 = vmatpush3.bf16.msra.mxu0 %v10594_v42 }
0x114d   :  { %6788 = vmatprep.subr.bf16.mxu0 %v10589_v7 }
0x1150   :  { %6790 = vmatpush3.bf16.msra.mxu0 %v10595_v22 }
0x1151   :  { %6791 = vmatprep.subr.bf16.mxu0 %v10589_v7 }
0x1154   :  { %6793 = vmatpush3.bf16.msra.mxu0 %v10596_v5 }
0x1155   :  { %6794 = vmatprep.subr.bf16.mxu0 %v10589_v7 }
0x1158   :  { %6796 = vmatpush3.bf16.msra.mxu0 %v10597_v47 }
0x1159   :  { %6797 = vmatprep.subr.bf16.mxu0 %v10589_v7 }
0x115c   :  { %6799 = vmatpush3.bf16.msra.mxu0 %v10598_v17 }
0x115d   :  { %6824 = vmatprep.subr.bf16.mxu0 %v10589_v7 }
0x115f   :  { %6129 = vmatmul.mubr.f32.vlgmr.msra.gmra.mrb[112].mxu0 %v10092_v52 }
0x1160   :  { %6131 = vmatprep.mubr.msk.f32.mxu0 %vm7222_vm0, %v10593_v21  ;;  %6826 = vmatpush3.bf16.msra.mxu0 %v10590_v12 }
0x1161   :  { %6827 = vmatprep.subr.bf16.mxu0 %v10589_v7 }
0x1163   :  { %6132 = vmatmul.mubr.f32.gmra.mrb[114].mxu0 %v10099_v41 }
0x1164   :  { %6134 = vmatprep.mubr.msk.f32.mxu0 %vm7222_vm0, %v10593_v21  ;;  %6829 = vmatpush3.bf16.msra.mxu0 %v10591_v24 }
0x1165   :  { %6830 = vmatprep.subr.bf16.mxu0 %v10589_v7 }
0x1167   :  { %6135 = vmatmul.mubr.f32.gmra.mrb[116].mxu0 %v10107_v43 }
0x1168   :  { %6832 = vmatpush3.bf16.msra.mxu0 %v10592_v58  ;;  %6210 = vmatprep.mubr.msk.f32.mxu0 %vm7222_vm0, %v10593_v21 }
0x1169   :  { %6833 = vmatprep.subr.bf16.mxu0 %v10589_v7 }
0x116c   :  { %6835 = vmatpush3.bf16.msra.mxu0 %v10594_v42 }
0x116d   :  { %6836 = vmatprep.subr.bf16.mxu0 %v10589_v7 }
0x1170   :  { %6838 = vmatpush3.bf16.msra.mxu0 %v10595_v22 }
0x1171   :  { %6839 = vmatprep.subr.bf16.mxu0 %v10589_v7 }
0x1174   :  { %6841 = vmatpush3.bf16.msra.mxu0 %v10596_v5 }
0x1175   :  { %6842 = vmatprep.subr.bf16.mxu0 %v10589_v7 }
0x1178   :  { %6844 = vmatpush3.bf16.msra.mxu0 %v10597_v47 }
0x1179   :  { %6845 = vmatprep.subr.bf16.mxu0 %v10589_v7 }
0x117c   :  { %6847 = vmatpush3.bf16.msra.mxu0 %v10598_v17 }
0x1212   :  { %v4058_v51 = vpop.f32.mrb[106].mxu0 }
0x1213   :  { %v4059_v11 = vadd.f32 %v7219_v23, %v4058_v51  ;;  %v6048_v15 = vpop.f32.mrb[107].mxu0 }
0x1215   :  { %v4075_v30 = vmul.f32 0.044715, %v4059_v11  ;;  %v4072_v56 = vmul.f32 0.5, %v4059_v11 }
0x1216   :  { %v4063_v53 = vpop.f32.mrb[108].mxu0 }
0x1217   :  { %v4078_v25 = vmul.f32 %v4075_v30, %v4059_v11  ;;  %v4064_v28 = vadd.f32 %v7219_v23, %v4063_v53  ;;  %v6051_v62 = vpop.f32.mrb[109].mxu0 }
0x1218   :  { %v4697_v62 = vld [vmem:[%s10263_s19] ss:$0 sm:$0xff] }
0x1219   :  { %v4081_v35 = vmul.f32 %v4078_v25, %v4059_v11  ;;  %v4076_v40 = vmul.f32 0.044715, %v4064_v28  ;;  %v4073_v39 = vmul.f32 0.5, %v4064_v28  ;;  %v4696_v25 = vld [vmem:[%s10262_s18] ss:$0 sm:$0xff] }
0x121a   :  { %v4068_v55 = vpop.f32.mrb[110].mxu0 }
0x121b   :  { %v4084_v14 = vadd.f32 %v4081_v35, %v4059_v11  ;;  %v4079_v4 = vmul.f32 %v4076_v40, %v4064_v28  ;;  %v4069_v54 = vadd.f32 %v7219_v23, %v4068_v55  ;;  %v6054_v46 = vpop.f32.mrb[111].mxu0 }
0x121d   :  { %v4087_v59 = vmul.f32 0.7978846, %v4084_v14  ;;  %v4077_v34 = vmul.f32 0.044715, %v4069_v54  ;;  %v4082_v36 = vmul.f32 %v4079_v4, %v4064_v28  ;;  %v4074_v16 = vmul.f32 0.5, %v4069_v54 }
0x121f   :  { %7128 = vtanh.f32 %v4087_v59  ;;  %v4080_v33 = vmul.f32 %v4077_v34, %v4069_v54  ;;  %v4085_v10 = vadd.f32 %v4082_v36, %v4064_v28 }
0x1221   :  { %v4088_v48 = vmul.f32 0.7978846, %v4085_v10  ;;  %v4083_v57 = vmul.f32 %v4080_v33, %v4069_v54 }
0x1223   :  { %7130 = vtanh.f32 %v4088_v48  ;;  %v4086_v0 = vadd.f32 %v4083_v57, %v4069_v54 }
0x1225   :  { %v4089_v27 = vmul.f32 0.7978846, %v4086_v0 }
0x1227   :  { %7132 = vtanh.f32 %v4089_v27 }
0x1229   :  { %v7129_v37 = vpop.eup %7128 }
0x122a   :  { %v4093_v63 = vadd.f32 1.0, %v7129_v37 }
0x122c   :  { %v4096_v50 = vmul.f32 %v4093_v63, %v4072_v56 }
0x122d   :  { %v7131_v29 = vpop.eup %7130 }
0x122e   :  { %6088 = vmatmul.mubr.f32.vlgmr.msra.gmra.mrb[106].mxu1 %v4096_v50  ;;  %v4094_v60 = vadd.f32 1.0, %v7131_v29 }
0x122f   :  { %6802 = vmatpush3.bf16.msra.mxu1 %v10590_v12  ;;  %6090 = vmatprep.mubr.msk.f32.mxu1 %vm7222_vm0, %v10593_v21 }
0x1230   :  { %6803 = vmatprep.subr.bf16.mxu1 %v10589_v7  ;;  %v4097_v3 = vmul.f32 %v4094_v60, %v4073_v39 }
0x1231   :  { %v7133_v49 = vpop.eup %7132 }
0x1232   :  { %v4247_v19 = vpop.f32.mrb[112].mxu0  ;;  %6091 = vmatmul.mubr.f32.gmra.mrb[108].mxu1 %v4097_v3  ;;  %v4095_v20 = vadd.f32 1.0, %v7133_v49 }
0x1233   :  { %v6130_v1 = vpop.f32.mrb[113].mxu0  ;;  %6805 = vmatpush3.bf16.msra.mxu1 %v10591_v24  ;;  %6093 = vmatprep.mubr.msk.f32.mxu1 %vm7222_vm0, %v10593_v21  ;;  %v4261_v6 = vsub.f32 %v10092_v52, %v4247_v19 }
0x1234   :  { %6806 = vmatprep.subr.bf16.mxu1 %v10589_v7  ;;  %v4098_v61 = vmul.f32 %v4095_v20, %v4074_v16 }
0x1235   :  { %v4264_v45 = vmul.f32 %v4261_v6, %v4261_v6 }
0x1236   :  { %v4252_v26 = vpop.f32.mrb[114].mxu0  ;;  %6094 = vmatmul.mubr.f32.gmra.mrb[110].mxu1 %v4098_v61 }
0x1237   :  { %v6133_v13 = vpop.f32.mrb[115].mxu0  ;;  %6808 = vmatpush3.bf16.msra.mxu1 %v10592_v58  ;;  %6169 = vmatprep.mubr.msk.f32.mxu1 %vm7222_vm0, %v10593_v21  ;;  %v10175_v8 = vsub.f32 %v10099_v41, %v4252_v26 }
0x1238   :  { %6809 = vmatprep.subr.bf16.mxu1 %v10589_v7 }
0x1239   :  { %v4265_v32 = vmul.f32 %v10175_v8, %v10175_v8 }
0x123a   :  { %v4257_v18 = vpop.f32.mrb[116].mxu0 }
0x123b   :  { %v6136_v44 = vpop.f32.mrb[117].mxu0  ;;  %6811 = vmatpush3.bf16.msra.mxu1 %v10594_v42  ;;  %v4263_v52 = vsub.f32 %v10107_v43, %v4257_v18  ;;  %v4698_v18 = vld [vmem:[%s10265_s20] ss:$0 sm:$0xff] }
0x123c   :  { %6812 = vmatprep.subr.bf16.mxu1 %v10589_v7  ;;  %v4699_v44 = vld [vmem:[%s10266_s21] ss:$0 sm:$0xff] }
0x123d   :  { %v4266_v38 = vmul.f32 %v4263_v52, %v4263_v52 }
0x123f   :  { %6814 = vmatpush3.bf16.msra.mxu1 %v10595_v22 }
0x1240   :  { %6815 = vmatprep.subr.bf16.mxu1 %v10589_v7 }
0x1243   :  { %6817 = vmatpush3.bf16.msra.mxu1 %v10596_v5 }
0x1244   :  { %6818 = vmatprep.subr.bf16.mxu1 %v10589_v7 }
0x1247   :  { %6820 = vmatpush3.bf16.msra.mxu1 %v10597_v47 }
0x1248   :  { %6821 = vmatprep.subr.bf16.mxu1 %v10589_v7 }
0x124b   :  { %6823 = vmatpush3.bf16.msra.mxu1 %v10598_v17 }
0x124c   :  { %6848 = vmatprep.subr.bf16.mxu1 %v10589_v7 }
0x124e   :  { %6170 = vmatmul.mubr.f32.vlgmr.msra.gmra.mrb[112].mxu1 %v4264_v45 }
0x124f   :  { %6172 = vmatprep.mubr.msk.f32.mxu1 %vm7222_vm0, %v10593_v21  ;;  %6850 = vmatpush3.bf16.msra.mxu1 %v10590_v12 }
0x1250   :  { %6851 = vmatprep.subr.bf16.mxu1 %v10589_v7 }
0x1252   :  { %6173 = vmatmul.mubr.f32.gmra.mrb[114].mxu1 %v4265_v32 }
0x1253   :  { %6175 = vmatprep.mubr.msk.f32.mxu1 %vm7222_vm0, %v10593_v21  ;;  %6853 = vmatpush3.bf16.msra.mxu1 %v10591_v24  ;;  %v7220_v24 = vld [vmem:[%s10261_s17] ss:$0 sm:$0xff] }
0x1254   :  { %6854 = vmatprep.subr.bf16.mxu1 %v10589_v7 }
0x1256   :  { %6176 = vmatmul.mubr.f32.gmra.mrb[116].mxu1 %v4266_v38 }
0x1257   :  { %6856 = vmatpush3.bf16.msra.mxu1 %v10592_v58  ;;  %6251 = vmatprep.mubr.msk.f32.mxu1 %vm7222_vm0, %v10593_v21 }
0x1258   :  { %6857 = vmatprep.subr.bf16.mxu1 %v10589_v7 }
0x125b   :  { %6859 = vmatpush3.bf16.msra.mxu1 %v10594_v42 }
0x125c   :  { %6860 = vmatprep.subr.bf16.mxu1 %v10589_v7 }
0x125f   :  { %6862 = vmatpush3.bf16.msra.mxu1 %v10595_v22 }
0x1260   :  { %6863 = vmatprep.subr.bf16.mxu1 %v10589_v7 }
0x1263   :  { %6865 = vmatpush3.bf16.msra.mxu1 %v10596_v5 }
0x1264   :  { %6866 = vmatprep.subr.bf16.mxu1 %v10589_v7 }
0x1267   :  { %6868 = vmatpush3.bf16.msra.mxu1 %v10597_v47 }
0x1268   :  { %6869 = vmatprep.subr.bf16.mxu1 %v10589_v7 }
0x126b   :  { %6871 = vmatpush3.bf16.msra.mxu1 %v10598_v17 }
0x1301   :  { %v4165_v12 = vpop.f32.mrb[106].mxu1 }
0x1302   :  { %v4166_v58 = vadd.f32 %v7220_v24, %v4165_v12  ;;  %v6089_v42 = vpop.f32.mrb[107].mxu1 }
0x1304   :  { %6211 = vmatmul.mubr.f32.vlgmr.msra.gmra.mrb[118].mxu0 %v4166_v58 }
0x1305   :  { %v4170_v22 = vpop.f32.mrb[108].mxu1  ;;  %6213 = vmatprep.mubr.msk.f32.mxu0 %vm7222_vm0, %v10593_v21 }
0x1306   :  { %v4171_v5 = vadd.f32 %v7220_v24, %v4170_v22  ;;  %v6092_v41 = vpop.f32.mrb[109].mxu1 }
0x1308   :  { %6214 = vmatmul.mubr.f32.gmra.mrb[120].mxu0 %v4171_v5 }
0x1309   :  { %v4175_v47 = vpop.f32.mrb[110].mxu1  ;;  %6216 = vmatprep.mubr.msk.f32.mxu0 %vm7222_vm0, %v10593_v21 }
0x130a   :  { %v4176_v7 = vadd.f32 %v7220_v24, %v4175_v47  ;;  %v6095_v17 = vpop.f32.mrb[111].mxu1 }
0x130c   :  { %6217 = vmatmul.mubr.f32.gmra.mrb[122].mxu0 %v4176_v7 }
0x1321   :  { %v4333_v31 = vpop.f32.mrb[112].mxu1 }
0x1322   :  { %v4334_v2 = vadd.f32 1e-05, %v4333_v31  ;;  %v6171_v9 = vpop.f32.mrb[113].mxu1 }
0x1324   :  { %7134 = vrsqrt.f32 %v4334_v2 }
0x1325   :  { %v4338_v43 = vpop.f32.mrb[114].mxu1 }
0x1326   :  { %v4339_v51 = vadd.f32 1e-05, %v4338_v43  ;;  %v6174_v23 = vpop.f32.mrb[115].mxu1 }
0x1328   :  { %7136 = vrsqrt.f32 %v4339_v51 }
0x1329   :  { %v4343_v11 = vpop.f32.mrb[116].mxu1 }
0x132a   :  { %v4344_v15 = vadd.f32 1e-05, %v4343_v11  ;;  %v6177_v30 = vpop.f32.mrb[117].mxu1 }
0x132c   :  { %7138 = vrsqrt.f32 %v4344_v15 }
0x132e   :  { %v7135_v53 = vpop.eup %7134 }
0x132f   :  { %v4350_v28 = vmul.f32 %v7135_v53, %v4261_v6 }
0x1331   :  { %v4359_v35 = vmul.f32 %v4696_v25, %v4350_v28 }
0x1332   :  { %v7137_v40 = vpop.eup %7136 }
0x1333   :  { %v4368_v55 = vadd.f32 %v4697_v62, %v4359_v35  ;;  %v4351_v14 = vmul.f32 %v7137_v40, %v10175_v8 }
0x1335   :  { %4371 = vst [vmem:[%s10264_s22] sm:$0xff] %v4368_v55  ;;  %v4360_v4 = vmul.f32 %v4696_v25, %v4351_v14 }
0x1336   :  { %v7139_v54 = vpop.eup %7138 }
0x1337   :  { %v4369_v46 = vadd.f32 %v4697_v62, %v4360_v4  ;;  %v4352_v59 = vmul.f32 %v7139_v54, %v4263_v52 }
0x1339   :  { %4372 = vst [vmem:[%s10264_s22 + $0x8] sm:$0xff] %v4369_v46  ;;  %v4361_v34 = vmul.f32 %v4696_v25, %v4352_v59 }
0x133b   :  { %v4370_v36 = vadd.f32 %v4697_v62, %v4361_v34 }
0x133d   :  { %4373 = vst [vmem:[%s10264_s22 + $0x10] sm:$0xff] %v4370_v36 }
0x13d7   :  { %v4442_v33 = vpop.f32.mrb[118].mxu0 }
0x13d8   :  { %v4456_v10 = vsub.f32 %v4166_v58, %v4442_v33  ;;  %v6212_v48 = vpop.f32.mrb[119].mxu0 }
0x13da   :  { %v4459_v57 = vmul.f32 %v4456_v10, %v4456_v10 }
0x13db   :  { %v4447_v0 = vpop.f32.mrb[120].mxu0 }
0x13dc   :  { %v4457_v27 = vsub.f32 %v4171_v5, %v4447_v0  ;;  %v6215_v37 = vpop.f32.mrb[121].mxu0  ;;  %6252 = vmatmul.mubr.f32.vlgmr.msra.gmra.mrb[118].mxu1 %v4459_v57 }
0x13dd   :  { %6254 = vmatprep.mubr.msk.f32.mxu1 %vm7222_vm0, %v10593_v21 }
0x13de   :  { %v4460_v56 = vmul.f32 %v4457_v27, %v4457_v27 }
0x13df   :  { %v4452_v63 = vpop.f32.mrb[122].mxu0 }
0x13e0   :  { %v4458_v50 = vsub.f32 %v4176_v7, %v4452_v63  ;;  %v6218_v29 = vpop.f32.mrb[123].mxu0  ;;  %6255 = vmatmul.mubr.f32.gmra.mrb[120].mxu1 %v4460_v56 }
0x13e1   :  { %6257 = vmatprep.mubr.msk.f32.mxu1 %vm7222_vm0, %v10593_v21 }
0x13e2   :  { %v4461_v39 = vmul.f32 %v4458_v50, %v4458_v50 }
0x13e4   :  { %6258 = vmatmul.mubr.f32.gmra.mrb[122].mxu1 %v4461_v39 }
0x14af   :  { %v4528_v60 = vpop.f32.mrb[118].mxu1 }
0x14b0   :  { %v4529_v3 = vadd.f32 1e-05, %v4528_v60  ;;  %v6253_v49 = vpop.f32.mrb[119].mxu1 }
0x14b2   :  { %7140 = vrsqrt.f32 %v4529_v3 }
0x14b3   :  { %v4533_v19 = vpop.f32.mrb[120].mxu1 }
0x14b4   :  { %v4534_v16 = vadd.f32 1e-05, %v4533_v19  ;;  %v6256_v20 = vpop.f32.mrb[121].mxu1 }
0x14b6   :  { %7142 = vrsqrt.f32 %v4534_v16 }
0x14b7   :  { %v4538_v1 = vpop.f32.mrb[122].mxu1 }
0x14b8   :  { %v4539_v61 = vadd.f32 1e-05, %v4538_v1  ;;  %v6259_v26 = vpop.f32.mrb[123].mxu1 }
0x14ba   :  { %7144 = vrsqrt.f32 %v4539_v61 }
0x14bc   :  { %v7141_v13 = vpop.eup %7140 }
0x14bd   :  { %v4545_v21 = vmul.f32 %v7141_v13, %v4456_v10 }
0x14bf   :  { %v4554_v6 = vmul.f32 %v4698_v18, %v4545_v21 }
0x14c0   :  { %v7143_v45 = vpop.eup %7142 }
0x14c1   :  { %v4563_v8 = vadd.f32 %v4699_v44, %v4554_v6  ;;  %v4546_v32 = vmul.f32 %v7143_v45, %v4457_v27 }
0x14c3   :  { %4566 = vst [vmem:[%s10267_s23] sm:$0xff] %v4563_v8  ;;  %v4555_v52 = vmul.f32 %v4698_v18, %v4546_v32 }
0x14c4   :  { %v7145_v38 = vpop.eup %7144 }
0x14c5   :  { %v4564_v12 = vadd.f32 %v4699_v44, %v4555_v52  ;;  %v4547_v24 = vmul.f32 %v7145_v38, %v4458_v50 }
0x14c7   :  { %4567 = vst [vmem:[%s10267_s23 + $0x8] sm:$0xff] %v4564_v12  ;;  %v4556_v58 = vmul.f32 %v4698_v18, %v4547_v24 }
0x14c9   :  { %v4565_v42 = vadd.f32 %v4699_v44, %v4556_v58 }
0x14cb   :  { %4568 = vst [vmem:[%s10267_s23 + $0x10] sm:$0xff] %v4565_v42 }

</bundles_post_ra>
